<compile_context>
chip_gen: v7x
topology: tpu7x:2x2x1
jax: 0.10.0
libtpu: 0.0.40
codegen_flags: <defaults>
</compile_context>

<pallas_src>
import functools

import jax
import jax.numpy as jnp
from jax.experimental import pallas as pl
from jax.experimental.pallas import tpu as pltpu

_ALPHA = 0.2          # LeakyReLU negative slope
_EPS = 1e-5           # BatchNorm eps
_LANE = 128
_SUBLANE = 8
_DEFAULT_TILE_M = 512  # rows per grid step; re-derive per chip if VMEM-tight


def _round_up(x, m):
    return (x + m - 1) // m * m


# ----------------------------------------------------------------------------
# Pallas kernels
# ----------------------------------------------------------------------------
def _conv_stats_kernel(p_ref, w_ref, b_ref, y_ref, stats_ref, *, m_true, tile_m):
    """conv tile: (tile_m,K)@(K,OC)+b -> f32 y, plus per-tile BN partial sums."""
    y = jnp.dot(p_ref[...], w_ref[...], preferred_element_type=jnp.float32)
    y = y + b_ref[...]
    # Mask rows that are M-padding so they do not pollute the BN statistics.
    rows = pl.program_id(0) * tile_m + jax.lax.broadcasted_iota(
        jnp.int32, (tile_m, 1), 0)
    ym = jnp.where(rows < m_true, y, 0.0)
    s1 = jnp.sum(ym, axis=0, keepdims=True)          # (1, OC)
    s2 = jnp.sum(ym * ym, axis=0, keepdims=True)     # (1, OC)
    stats_ref[...] = jnp.concatenate([s1, s2], axis=0)[None]   # (1, 2, OC)
    y_ref[...] = y


def _conv_lrelu_kernel(p_ref, w_ref, b_ref, o_ref):
    """conv tile + bias, LeakyReLU epilogue (input activation of next layer)."""
    y = jnp.dot(p_ref[...], w_ref[...], preferred_element_type=jnp.float32)
    y = y + b_ref[...]
    y = jnp.where(y >= 0, y, _ALPHA * y)
    o_ref[...] = y.astype(o_ref.dtype)


def _convT_sigmoid_kernel(wT_ref, pT_ref, b_ref, o_ref):
    """(OC,K)@(K,tile_m)+b -> sigmoid; output last dim is M (lane-dense)."""
    y = jnp.dot(wT_ref[...], pT_ref[...], preferred_element_type=jnp.float32)
    y = y + b_ref[...]
    o_ref[...] = jax.nn.sigmoid(y).astype(o_ref.dtype)


def _bn_lrelu_kernel(y_ref, mean_ref, inv_ref, a_ref):
    """Apply batch-norm (precomputed mean / inv-std) + LeakyReLU, emit bf16."""
    z = (y_ref[...] - mean_ref[...]) * inv_ref[...]
    a_ref[...] = jnp.where(z >= 0, z, _ALPHA * z).astype(a_ref.dtype)


# ----------------------------------------------------------------------------
# Wrapper glue
# ----------------------------------------------------------------------------
# TODO(synk): replace the HBM-materialized im2col with in-kernel KH*KW tap
# accumulation (manual halo DMA over the NHWC activation) to cut activation
# HBM traffic ~16x; patches are at least built from / stored as bf16 here.
def _im2col(x_nhwc, kh, kw, stride, padding):
    """NHWC -> (M, K) patch matrix, M = N*OH*OW, K = kh*kw*C (tap-major)."""
    N, H, W, C = x_nhwc.shape
    xp = jnp.pad(x_nhwc, ((0, 0), (padding, padding), (padding, padding), (0, 0)))
    OH = (H + 2 * padding - kh) // stride + 1
    OW = (W + 2 * padding - kw) // stride + 1
    cols = []
    for i in range(kh):
        for j in range(kw):
            cols.append(xp[:, i:i + stride * OH:stride, j:j + stride * OW:stride, :])
    patches = jnp.stack(cols, axis=-2)                # (N, OH, OW, kh*kw, C)
    return patches.reshape(N * OH * OW, kh * kw * C), (N, OH, OW)


def _prep_weight(w_oihw):
    # (OC, IC, KH, KW) -> (KH, KW, IC, OC) -> (KH*KW*IC, OC), matching im2col.
    OC, IC, KH, KW = w_oihw.shape
    return jnp.transpose(w_oihw, (2, 3, 1, 0)).reshape(KH * KW * IC, OC)


def _tiling(m, tile_target):
    m_pad = _round_up(m, _SUBLANE)
    if m_pad > tile_target:
        tile = tile_target
        m_pad = _round_up(m, tile)
    else:
        tile = m_pad
    return m_pad, tile, m_pad // tile


def conv_stage(a_nhwc, w_oihw, b, *, stride, padding, post,
               tile_m=_DEFAULT_TILE_M):
    """One fused ConvBlock stage.

    post: "lrelu"    conv + bias, LeakyReLU epilogue (feeds next conv)
          "bn_lrelu" conv + bias, BatchNorm (batch stats) + LeakyReLU epilogue
          "sigmoid"  conv + bias + sigmoid (final layer), transposed (OC, M)
                     lane-dense output layout inside the kernel.
    """
    OC, IC, KH, KW = w_oihw.shape
    tile_m = _round_up(tile_m, _LANE)

    # im2col on the bf16 activation (LeakyReLU / BN were already applied by the
    # producing stage, so no 16x-redundant elementwise work here).
    patches, (N, OH, OW) = _im2col(a_nhwc.astype(jnp.bfloat16),
                                   KH, KW, stride, padding)
    M, K = patches.shape
    K_pad = _round_up(K, _LANE)
    M_pad, tile, n_tiles = _tiling(M, tile_m)
    parallel = pltpu.CompilerParams(dimension_semantics=("parallel",))

    w2 = _prep_weight(w_oihw).astype(jnp.bfloat16)          # (K, OC)

    if post == "sigmoid":
        # Lane-dense final layer (OC is tiny, e.g. 1): compute (OC, M) so the
        # stored last dim is the large M axis instead of a 1-lane masked store.
        OC_r = _round_up(OC, _SUBLANE)
        pT = jnp.pad(patches.T, ((0, K_pad - K), (0, M_pad - M)))   # (K_pad, M_pad)
        wT = jnp.pad(w2.T, ((0, OC_r - OC), (0, K_pad - K)))        # (OC_r, K_pad)
        bT = jnp.pad(b.astype(jnp.float32), (0, OC_r - OC)).reshape(OC_r, 1)
        cost = pl.CostEstimate(flops=2 * M_pad * K_pad * OC_r,
                               transcendentals=M_pad * OC_r,
                               bytes_accessed=pT.size * 2 + wT.size * 2
                               + bT.size * 4 + OC_r * M_pad * 4)
        out = pl.pallas_call(
            _convT_sigmoid_kernel,
            out_shape=jax.ShapeDtypeStruct((OC_r, M_pad), jnp.float32),
            grid=(n_tiles,),
            in_specs=[
                pl.BlockSpec((OC_r, K_pad), lambda i: (0, 0)),
                pl.BlockSpec((K_pad, tile), lambda i: (0, i)),
                pl.BlockSpec((OC_r, 1), lambda i: (0, 0)),
            ],
            out_specs=pl.BlockSpec((OC_r, tile), lambda i: (0, i)),
            compiler_params=parallel,
            cost_estimate=cost,
        )(wT, pT, bT)
        return out[:OC, :M].T.reshape(N, OH, OW, OC)

    # Standard (M, OC_pad) layout; OC padded up to a lane multiple so stores
    # are unmasked (the MXU emits full 128-lane result vregs either way).
    OC_pad = _round_up(OC, _LANE)
    p = jnp.pad(patches, ((0, M_pad - M), (0, K_pad - K)))
    w2 = jnp.pad(w2, ((0, K_pad - K), (0, OC_pad - OC)))
    b2 = jnp.pad(b.astype(jnp.float32), (0, OC_pad - OC)).reshape(1, OC_pad)

    in_specs = [
        pl.BlockSpec((tile, K_pad), lambda i: (i, 0)),
        pl.BlockSpec((K_pad, OC_pad), lambda i: (0, 0)),
        pl.BlockSpec((1, OC_pad), lambda i: (0, 0)),
    ]
    flops = 2 * M_pad * K_pad * OC_pad
    bytes_in = p.size * 2 + w2.size * 2 + b2.size * 4

    if post == "lrelu":
        cost = pl.CostEstimate(flops=flops, transcendentals=0,
                               bytes_accessed=bytes_in + M_pad * OC_pad * 2)
        act = pl.pallas_call(
            _conv_lrelu_kernel,
            out_shape=jax.ShapeDtypeStruct((M_pad, OC_pad), jnp.bfloat16),
            grid=(n_tiles,),
            in_specs=in_specs,
            out_specs=pl.BlockSpec((tile, OC_pad), lambda i: (i, 0)),
            compiler_params=parallel,
            cost_estimate=cost,
        )(p, w2, b2)
        return act[:M, :OC].reshape(N, OH, OW, OC)

    assert post == "bn_lrelu"
    # Pass 1: conv + bias + per-tile BN partial sums (grid stays "parallel";
    # the tiny (n_tiles, 2, OC) reduction happens in plain JAX below).
    kern = functools.partial(_conv_stats_kernel, m_true=M, tile_m=tile)
    cost = pl.CostEstimate(flops=flops, transcendentals=0,
                           bytes_accessed=bytes_in + M_pad * OC_pad * 4
                           + n_tiles * 2 * OC_pad * 4)
    y, part = pl.pallas_call(
        kern,
        out_shape=(jax.ShapeDtypeStruct((M_pad, OC_pad), jnp.float32),
                   jax.ShapeDtypeStruct((n_tiles, 2, OC_pad), jnp.float32)),
        grid=(n_tiles,),
        in_specs=in_specs,
        out_specs=(pl.BlockSpec((tile, OC_pad), lambda i: (i, 0)),
                   pl.BlockSpec((1, 2, OC_pad), lambda i: (i, 0, 0))),
        compiler_params=parallel,
        cost_estimate=cost,
    )(p, w2, b2)

    # BN statistics over the full M axis (biased variance, training mode).
    tot = jnp.sum(part, axis=0)                        # (2, OC_pad)
    mean = tot[0] / M
    var = jnp.maximum(tot[1] / M - mean * mean, 0.0)
    inv = jax.lax.rsqrt(var + _EPS)

    # Pass 2: lightweight normalize + LeakyReLU epilogue, bf16 activation out.
    cost2 = pl.CostEstimate(flops=3 * M_pad * OC_pad, transcendentals=0,
                            bytes_accessed=M_pad * OC_pad * (4 + 2))
    act = pl.pallas_call(
        _bn_lrelu_kernel,
        out_shape=jax.ShapeDtypeStruct((M_pad, OC_pad), jnp.bfloat16),
        grid=(n_tiles,),
        in_specs=[
            pl.BlockSpec((tile, OC_pad), lambda i: (i, 0)),
            pl.BlockSpec((1, OC_pad), lambda i: (0, 0)),
            pl.BlockSpec((1, OC_pad), lambda i: (0, 0)),
        ],
        out_specs=pl.BlockSpec((tile, OC_pad), lambda i: (i, 0)),
        compiler_params=parallel,
        cost_estimate=cost2,
    )(y, mean.reshape(1, OC_pad), inv.reshape(1, OC_pad))
    return act[:M, :OC].reshape(N, OH, OW, OC)


# ----------------------------------------------------------------------------
# Discriminator forward (matches the PyTorch module)
# ----------------------------------------------------------------------------
_LAYER_CFG = [
    # name,   stride, pad, post
    ("conv1", 2, 1, "lrelu"),      # ConvBlock(act=False, bn=False); the lrelu
                                   # is conv2's input activation, fused here.
    ("conv2", 2, 1, "bn_lrelu"),
    ("conv3", 2, 1, "bn_lrelu"),
    ("conv4", 1, 1, "bn_lrelu"),
    ("conv5", 1, 1, "sigmoid"),    # bn=False; final sigmoid fused here.
]


def discriminator_forward(params, x_nchw, label_nchw, *, tile_m=_DEFAULT_TILE_M):
    h = jnp.concatenate([x_nchw, label_nchw], axis=1)    # cat along channels
    h = jnp.transpose(h, (0, 2, 3, 1))                   # NCHW -> NHWC
    for name, stride, pad, post in _LAYER_CFG:
        w, b = params[name]
        h = conv_stage(h, w, b, stride=stride, padding=pad, post=post,
                       tile_m=tile_m)
    return jnp.transpose(h, (0, 3, 1, 2)).astype(jnp.float32)   # NHWC -> NCHW


# ----------------------------------------------------------------------------
# Pure-JAX reference (lax.conv). matmul_dtype=bf16 mirrors the kernel's
# precision policy exactly (bf16 operands, f32 accumulation / BN / sigmoid).
# ----------------------------------------------------------------------------
def _ref_forward(params, x, label, *, matmul_dtype):
    def conv(h, w, b, stride, pad):
        out = jax.lax.conv_general_dilated(
            h.astype(matmul_dtype), w.astype(matmul_dtype),
            (stride, stride), [(pad, pad), (pad, pad)],
            dimension_numbers=("NCHW", "OIHW", "NCHW"),
            preferred_element_type=jnp.float32)
        return out + b.reshape(1, -1, 1, 1)

    def bn(h):
        mean = jnp.mean(h, axis=(0, 2, 3), keepdims=True)
        var = jnp.mean((h - mean) ** 2, axis=(0, 2, 3), keepdims=True)
        return (h - mean) / jnp.sqrt(var + _EPS)

    def lrelu(h):
        return jnp.where(h >= 0, h, _ALPHA * h)

    h = jnp.concatenate([x, label], axis=1)
    h = conv(h, *params["conv1"], 2, 1)
    h = bn(conv(lrelu(h), *params["conv2"], 2, 1))
    h = bn(conv(lrelu(h), *params["conv3"], 2, 1))
    h = bn(conv(lrelu(h), *params["conv4"], 1, 1))
    h = conv(lrelu(h), *params["conv5"], 1, 1)
    return jax.nn.sigmoid(h)


# ----------------------------------------------------------------------------
# Deterministic parameter init (normal(0, 0.02) weights, zero biases)
# ----------------------------------------------------------------------------
def init_params(key, input_dim, num_filter, output_dim):
    shapes = {
        "conv1": (num_filter,      input_dim,       4, 4),
        "conv2": (num_filter * 2,  num_filter,      4, 4),
        "conv3": (num_filter * 4,  num_filter * 2,  4, 4),
        "conv4": (num_filter * 8,  num_filter * 4,  4, 4),
        "conv5": (output_dim,      num_filter * 8,  4, 4),
    }
    params = {}
    for name, shp in shapes.items():
        key, sub = jax.random.split(key)
        w = 0.02 * jax.random.normal(sub, shp, dtype=jnp.float32)
        b = jnp.zeros((shp[0],), dtype=jnp.float32)
        params[name] = (w, b)
    return params


if __name__ == "__main__":
    # Small but non-trivial shapes: x and label each 2 channels -> input_dim=4
    # after concat; spatial 64 so the stride-2/stride-1 stack produces a range
    # of M = N*OH*OW sizes (2048 .. 72), exercising multi-tile grids, the
    # cross-tile BatchNorm reduction, and ragged-tail row masking.
    batch, x_ch, lbl_ch, spatial = 2, 2, 2, 64
    input_dim, num_filter, output_dim = x_ch + lbl_ch, 8, 1

    key = jax.random.PRNGKey(0)
    kx, kl, kp = jax.random.split(key, 3)
    x = jax.random.normal(kx, (batch, x_ch, spatial, spatial), dtype=jnp.float32)
    label = jax.random.normal(kl, (batch, lbl_ch, spatial, spatial),
                              dtype=jnp.float32)
    params = init_params(kp, input_dim, num_filter, output_dim)

    # tile_m=256 (vs the 512 default) so these toy shapes still hit multi-tile
    # grids; at production sizes keep/raise the default per chip's VMEM budget.
    fwd = jax.jit(functools.partial(discriminator_forward, tile_m=256))
    out = jax.block_until_ready(fwd(params, x, label))

    # Tight check vs. a precision-matched reference (bf16 operands, f32 accum).
    ref_bf16 = jax.block_until_ready(
        jax.jit(functools.partial(_ref_forward, matmul_dtype=jnp.bfloat16))(
            params, x, label))
    assert out.shape == ref_bf16.shape, (out.shape, ref_bf16.shape)
    err_bf16 = float(jnp.max(jnp.abs(out - ref_bf16)))
    assert err_bf16 < 1e-3, err_bf16

    # Loose check vs. the full-f32 module semantics (only bf16 operand rounding
    # separates the two).
    ref_f32 = jax.block_until_ready(
        jax.jit(functools.partial(_ref_forward, matmul_dtype=jnp.float32))(
            params, x, label))
    err_f32 = float(jnp.max(jnp.abs(out - ref_f32)))
    assert err_f32 < 5e-2, err_f32

    print("KERNEL_OK")
</pallas_src>

<mosaic_0001>
module attributes {stable_mosaic.version = 11 : i64} {
  func.func @_conv_lrelu_kernel(%arg0: i32, %arg1: memref<256x128xbf16, #tpu.memory_space<vmem>>, %arg2: memref<128x128xbf16, #tpu.memory_space<vmem>>, %arg3: memref<1x128xf32, #tpu.memory_space<vmem>>, %arg4: memref<256x128xbf16, #tpu.memory_space<vmem>>) attributes {dimension_semantics = [#tpu.dimension_semantics<parallel>], iteration_bounds = array<i64: 8>, scalar_prefetch = 0 : i64, scratch_operands = 0 : i64, tpu.core_type = #tpu.core_type<tc>, window_params = [{transform_indices = @transform_0, window_bounds = array<i64: 256, 128>}, {pipeline_mode = #tpu.pipeline_mode<synchronous>, transform_indices = @transform_1, window_bounds = array<i64: 128, 128>}, {pipeline_mode = #tpu.pipeline_mode<synchronous>, transform_indices = @transform_2, window_bounds = array<i64: 1, 128>}, {transform_indices = @transform_3, window_bounds = array<i64: 256, 128>}]} {
    %c0 = arith.constant 0 : index
    %c0_0 = arith.constant 0 : index
    %0 = vector.load %arg1[%c0, %c0_0] : memref<256x128xbf16, #tpu.memory_space<vmem>>, vector<256x128xbf16>
    %c0_1 = arith.constant 0 : index
    %c0_2 = arith.constant 0 : index
    %1 = vector.load %arg2[%c0_1, %c0_2] : memref<128x128xbf16, #tpu.memory_space<vmem>>, vector<128x128xbf16>
    %cst = arith.constant dense<0.000000e+00> : vector<256x128xf32>
    %2 = tpu.matmul %0, %1, %cst {dimension_numbers = #tpu.dot_dimension_numbers<[1], [0], [0], [1], [0, 0, 1, 1], [], []>} : vector<256x128xbf16>, vector<128x128xbf16>, vector<256x128xf32> -> vector<256x128xf32>
    %c0_3 = arith.constant 0 : index
    %c0_4 = arith.constant 0 : index
    %3 = vector.load %arg3[%c0_3, %c0_4] : memref<1x128xf32, #tpu.memory_space<vmem>>, vector<1x128xf32>
    %4 = vector.broadcast %3 : vector<1x128xf32> to vector<256x128xf32>
    %5 = arith.addf %2, %4 : vector<256x128xf32>
    %cst_5 = arith.constant 0.000000e+00 : f32
    %6 = vector.broadcast %cst_5 : f32 to vector<256x128xf32>
    %7 = arith.cmpf oge, %5, %6 : vector<256x128xf32>
    %cst_6 = arith.constant 2.000000e-01 : f32
    %8 = vector.broadcast %cst_6 : f32 to vector<256x128xf32>
    %9 = arith.mulf %8, %5 : vector<256x128xf32>
    %10 = arith.select %7, %5, %9 : vector<256x128xi1>, vector<256x128xf32>
    %11 = arith.truncf %10 : vector<256x128xf32> to vector<256x128xbf16>
    %c0_7 = arith.constant 0 : index
    %c0_8 = arith.constant 0 : index
    %12 = vector.load %arg4[%c0_7, %c0_8] : memref<256x128xbf16, #tpu.memory_space<vmem>>, vector<256x128xbf16>
    tpu.vector_store %arg4[%c0_7, %c0_8], %11 {strides = array<i32>} : memref<256x128xbf16, #tpu.memory_space<vmem>>, vector<256x128xbf16>,
    return
  }
  func.func @transform_0(%arg0: i32) -> (i32, i32) {
    %c0_i32 = arith.constant 0 : i32
    %c0_i32_0 = arith.constant 0 : i32
    return %arg0, %c0_i32 : i32, i32
  }
  func.func @transform_1(%arg0: i32) -> (i32, i32) {
    %c0_i32 = arith.constant 0 : i32
    %c0_i32_0 = arith.constant 0 : i32
    %c0_i32_1 = arith.constant 0 : i32
    return %c0_i32, %c0_i32_0 : i32, i32
  }
  func.func @transform_2(%arg0: i32) -> (i32, i32) {
    %c0_i32 = arith.constant 0 : i32
    %c0_i32_0 = arith.constant 0 : i32
    %c0_i32_1 = arith.constant 0 : i32
    return %c0_i32, %c0_i32_0 : i32, i32
  }
  func.func @transform_3(%arg0: i32) -> (i32, i32) {
    %c0_i32 = arith.constant 0 : i32
    %c0_i32_0 = arith.constant 0 : i32
    return %arg0, %c0_i32 : i32, i32
  }
}

module attributes {stable_mosaic.version = 11 : i64} {
  func.func @_conv_stats_kernel(%arg0: i32, %arg1: memref<256x128xbf16, #tpu.memory_space<vmem>>, %arg2: memref<128x128xbf16, #tpu.memory_space<vmem>>, %arg3: memref<1x128xf32, #tpu.memory_space<vmem>>, %arg4: memref<256x128xf32, #tpu.memory_space<vmem>>, %arg5: memref<1x2x128xf32, #tpu.memory_space<vmem>>) attributes {dimension_semantics = [#tpu.dimension_semantics<parallel>], iteration_bounds = array<i64: 2>, scalar_prefetch = 0 : i64, scratch_operands = 0 : i64, tpu.core_type = #tpu.core_type<tc>, window_params = [{transform_indices = @transform_0, window_bounds = array<i64: 256, 128>}, {pipeline_mode = #tpu.pipeline_mode<synchronous>, transform_indices = @transform_1, window_bounds = array<i64: 128, 128>}, {pipeline_mode = #tpu.pipeline_mode<synchronous>, transform_indices = @transform_2, window_bounds = array<i64: 1, 128>}, {transform_indices = @transform_3, window_bounds = array<i64: 256, 128>}, {transform_indices = @transform_4, window_bounds = array<i64: 1, 2, 128>}]} {
    %c0 = arith.constant 0 : index
    %c0_0 = arith.constant 0 : index
    %0 = vector.load %arg1[%c0, %c0_0] : memref<256x128xbf16, #tpu.memory_space<vmem>>, vector<256x128xbf16>
    %c0_1 = arith.constant 0 : index
    %c0_2 = arith.constant 0 : index
    %1 = vector.load %arg2[%c0_1, %c0_2] : memref<128x128xbf16, #tpu.memory_space<vmem>>, vector<128x128xbf16>
    %cst = arith.constant dense<0.000000e+00> : vector<256x128xf32>
    %2 = tpu.matmul %0, %1, %cst {dimension_numbers = #tpu.dot_dimension_numbers<[1], [0], [0], [1], [0, 0, 1, 1], [], []>} : vector<256x128xbf16>, vector<128x128xbf16>, vector<256x128xf32> -> vector<256x128xf32>
    %c0_3 = arith.constant 0 : index
    %c0_4 = arith.constant 0 : index
    %3 = vector.load %arg3[%c0_3, %c0_4] : memref<1x128xf32, #tpu.memory_space<vmem>>, vector<1x128xf32>
    %4 = vector.broadcast %3 : vector<1x128xf32> to vector<256x128xf32>
    %5 = arith.addf %2, %4 : vector<256x128xf32>
    %c256_i32 = arith.constant 256 : i32
    %6 = arith.muli %arg0, %c256_i32 : i32
    %7 = tpu.iota {dimensions = array<i32: 0>} : vector<256x1xi32>
    %8 = vector.broadcast %6 : i32 to vector<256x1xi32>
    %9 = arith.addi %8, %7 : vector<256x1xi32>
    %c512_i32 = arith.constant 512 : i32
    %10 = vector.broadcast %c512_i32 : i32 to vector<256x1xi32>
    %11 = arith.cmpi slt, %9, %10 : vector<256x1xi32>
    %cst_5 = arith.constant 0.000000e+00 : f32
    %12 = vector.shape_cast %11 : vector<256x1xi1> to vector<256x1xi1>
    %13 = vector.broadcast %12 : vector<256x1xi1> to vector<256x128xi1>
    %14 = vector.broadcast %cst_5 : f32 to vector<256x128xf32>
    %15 = arith.select %13, %5, %14 : vector<256x128xi1>, vector<256x128xf32>
    %cst_6 = arith.constant dense<0.000000e+00> : vector<128xf32>
    %16 = vector.multi_reduction <add>, %15, %cst_6 [0] : vector<256x128xf32> to vector<128xf32>
    %17 = vector.shape_cast %16 : vector<128xf32> to vector<1x128xf32>
    %18 = arith.mulf %15, %15 : vector<256x128xf32>
    %cst_7 = arith.constant dense<0.000000e+00> : vector<128xf32>
    %19 = vector.multi_reduction <add>, %18, %cst_7 [0] : vector<256x128xf32> to vector<128xf32>
    %20 = vector.shape_cast %19 : vector<128xf32> to vector<1x128xf32>
    %21 = tpu.concatenate %17, %20 in 0 : vector<1x128xf32>, vector<1x128xf32> -> vector<2x128xf32>
    %22 = vector.shape_cast %21 : vector<2x128xf32> to vector<1x2x128xf32>
    %c0_8 = arith.constant 0 : index
    %c0_9 = arith.constant 0 : index
    %c0_10 = arith.constant 0 : index
    %23 = vector.load %arg5[%c0_8, %c0_9, %c0_10] : memref<1x2x128xf32, #tpu.memory_space<vmem>>, vector<1x2x128xf32>
    tpu.vector_store %arg5[%c0_8, %c0_9, %c0_10], %22 {strides = array<i32>} : memref<1x2x128xf32, #tpu.memory_space<vmem>>, vector<1x2x128xf32>,
    %c0_11 = arith.constant 0 : index
    %c0_12 = arith.constant 0 : index
    %24 = vector.load %arg4[%c0_11, %c0_12] : memref<256x128xf32, #tpu.memory_space<vmem>>, vector<256x128xf32>
    tpu.vector_store %arg4[%c0_11, %c0_12], %5 {strides = array<i32>} : memref<256x128xf32, #tpu.memory_space<vmem>>, vector<256x128xf32>,
    return
  }
  func.func @transform_0(%arg0: i32) -> (i32, i32) {
    %c0_i32 = arith.constant 0 : i32
    %c0_i32_0 = arith.constant 0 : i32
    return %arg0, %c0_i32 : i32, i32
  }
  func.func @transform_1(%arg0: i32) -> (i32, i32) {
    %c0_i32 = arith.constant 0 : i32
    %c0_i32_0 = arith.constant 0 : i32
    %c0_i32_1 = arith.constant 0 : i32
    return %c0_i32, %c0_i32_0 : i32, i32
  }
  func.func @transform_2(%arg0: i32) -> (i32, i32) {
    %c0_i32 = arith.constant 0 : i32
    %c0_i32_0 = arith.constant 0 : i32
    %c0_i32_1 = arith.constant 0 : i32
    return %c0_i32, %c0_i32_0 : i32, i32
  }
  func.func @transform_3(%arg0: i32) -> (i32, i32) {
    %c0_i32 = arith.constant 0 : i32
    %c0_i32_0 = arith.constant 0 : i32
    return %arg0, %c0_i32 : i32, i32
  }
  func.func @transform_4(%arg0: i32) -> (i32, i32, i32) {
    %c0_i32 = arith.constant 0 : i32
    %c0_i32_0 = arith.constant 0 : i32
    %c0_i32_1 = arith.constant 0 : i32
    return %arg0, %c0_i32, %c0_i32_0 : i32, i32, i32
  }
}

module attributes {stable_mosaic.version = 11 : i64} {
  func.func @_bn_lrelu_kernel(%arg0: i32, %arg1: memref<256x128xf32, #tpu.memory_space<vmem>>, %arg2: memref<1x128xf32, #tpu.memory_space<vmem>>, %arg3: memref<1x128xf32, #tpu.memory_space<vmem>>, %arg4: memref<256x128xbf16, #tpu.memory_space<vmem>>) attributes {dimension_semantics = [#tpu.dimension_semantics<parallel>], iteration_bounds = array<i64: 2>, scalar_prefetch = 0 : i64, scratch_operands = 0 : i64, tpu.core_type = #tpu.core_type<tc>, window_params = [{transform_indices = @transform_0, window_bounds = array<i64: 256, 128>}, {pipeline_mode = #tpu.pipeline_mode<synchronous>, transform_indices = @transform_1, window_bounds = array<i64: 1, 128>}, {pipeline_mode = #tpu.pipeline_mode<synchronous>, transform_indices = @transform_2, window_bounds = array<i64: 1, 128>}, {transform_indices = @transform_3, window_bounds = array<i64: 256, 128>}]} {
    %c0 = arith.constant 0 : index
    %c0_0 = arith.constant 0 : index
    %0 = vector.load %arg1[%c0, %c0_0] : memref<256x128xf32, #tpu.memory_space<vmem>>, vector<256x128xf32>
    %c0_1 = arith.constant 0 : index
    %c0_2 = arith.constant 0 : index
    %1 = vector.load %arg2[%c0_1, %c0_2] : memref<1x128xf32, #tpu.memory_space<vmem>>, vector<1x128xf32>
    %2 = vector.broadcast %1 : vector<1x128xf32> to vector<256x128xf32>
    %3 = arith.subf %0, %2 : vector<256x128xf32>
    %c0_3 = arith.constant 0 : index
    %c0_4 = arith.constant 0 : index
    %4 = vector.load %arg3[%c0_3, %c0_4] : memref<1x128xf32, #tpu.memory_space<vmem>>, vector<1x128xf32>
    %5 = vector.broadcast %4 : vector<1x128xf32> to vector<256x128xf32>
    %6 = arith.mulf %3, %5 : vector<256x128xf32>
    %cst = arith.constant 0.000000e+00 : f32
    %7 = vector.broadcast %cst : f32 to vector<256x128xf32>
    %8 = arith.cmpf oge, %6, %7 : vector<256x128xf32>
    %cst_5 = arith.constant 2.000000e-01 : f32
    %9 = vector.broadcast %cst_5 : f32 to vector<256x128xf32>
    %10 = arith.mulf %9, %6 : vector<256x128xf32>
    %11 = arith.select %8, %6, %10 : vector<256x128xi1>, vector<256x128xf32>
    %12 = arith.truncf %11 : vector<256x128xf32> to vector<256x128xbf16>
    %c0_6 = arith.constant 0 : index
    %c0_7 = arith.constant 0 : index
    %13 = vector.load %arg4[%c0_6, %c0_7] : memref<256x128xbf16, #tpu.memory_space<vmem>>, vector<256x128xbf16>
    tpu.vector_store %arg4[%c0_6, %c0_7], %12 {strides = array<i32>} : memref<256x128xbf16, #tpu.memory_space<vmem>>, vector<256x128xbf16>,
    return
  }
  func.func @transform_0(%arg0: i32) -> (i32, i32) {
    %c0_i32 = arith.constant 0 : i32
    %c0_i32_0 = arith.constant 0 : i32
    return %arg0, %c0_i32 : i32, i32
  }
  func.func @transform_1(%arg0: i32) -> (i32, i32) {
    %c0_i32 = arith.constant 0 : i32
    %c0_i32_0 = arith.constant 0 : i32
    %c0_i32_1 = arith.constant 0 : i32
    return %c0_i32, %c0_i32_0 : i32, i32
  }
  func.func @transform_2(%arg0: i32) -> (i32, i32) {
    %c0_i32 = arith.constant 0 : i32
    %c0_i32_0 = arith.constant 0 : i32
    %c0_i32_1 = arith.constant 0 : i32
    return %c0_i32, %c0_i32_0 : i32, i32
  }
  func.func @transform_3(%arg0: i32) -> (i32, i32) {
    %c0_i32 = arith.constant 0 : i32
    %c0_i32_0 = arith.constant 0 : i32
    return %arg0, %c0_i32 : i32, i32
  }
}

module attributes {stable_mosaic.version = 11 : i64} {
  func.func @_conv_stats_kernel(%arg0: i32, %arg1: memref<128x256xbf16, #tpu.memory_space<vmem>>, %arg2: memref<256x128xbf16, #tpu.memory_space<vmem>>, %arg3: memref<1x128xf32, #tpu.memory_space<vmem>>, %arg4: memref<128x128xf32, #tpu.memory_space<vmem>>, %arg5: memref<1x2x128xf32, #tpu.memory_space<vmem>>) attributes {dimension_semantics = [#tpu.dimension_semantics<parallel>], iteration_bounds = array<i64: 1>, scalar_prefetch = 0 : i64, scratch_operands = 0 : i64, tpu.core_type = #tpu.core_type<tc>, window_params = [{transform_indices = @transform_0, window_bounds = array<i64: 128, 256>}, {pipeline_mode = #tpu.pipeline_mode<synchronous>, transform_indices = @transform_1, window_bounds = array<i64: 256, 128>}, {pipeline_mode = #tpu.pipeline_mode<synchronous>, transform_indices = @transform_2, window_bounds = array<i64: 1, 128>}, {transform_indices = @transform_3, window_bounds = array<i64: 128, 128>}, {transform_indices = @transform_4, window_bounds = array<i64: 1, 2, 128>}]} {
    %c0 = arith.constant 0 : index
    %c0_0 = arith.constant 0 : index
    %0 = vector.load %arg1[%c0, %c0_0] : memref<128x256xbf16, #tpu.memory_space<vmem>>, vector<128x256xbf16>
    %c0_1 = arith.constant 0 : index
    %c0_2 = arith.constant 0 : index
    %1 = vector.load %arg2[%c0_1, %c0_2] : memref<256x128xbf16, #tpu.memory_space<vmem>>, vector<256x128xbf16>
    %cst = arith.constant dense<0.000000e+00> : vector<128x128xf32>
    %2 = tpu.matmul %0, %1, %cst {dimension_numbers = #tpu.dot_dimension_numbers<[1], [0], [0], [1], [0, 0, 1, 1], [], []>} : vector<128x256xbf16>, vector<256x128xbf16>, vector<128x128xf32> -> vector<128x128xf32>
    %c0_3 = arith.constant 0 : index
    %c0_4 = arith.constant 0 : index
    %3 = vector.load %arg3[%c0_3, %c0_4] : memref<1x128xf32, #tpu.memory_space<vmem>>, vector<1x128xf32>
    %4 = vector.broadcast %3 : vector<1x128xf32> to vector<128x128xf32>
    %5 = arith.addf %2, %4 : vector<128x128xf32>
    %c128_i32 = arith.constant 128 : i32
    %6 = arith.muli %arg0, %c128_i32 : i32
    %7 = tpu.iota {dimensions = array<i32: 0>} : vector<128x1xi32>
    %8 = vector.broadcast %6 : i32 to vector<128x1xi32>
    %9 = arith.addi %8, %7 : vector<128x1xi32>
    %c128_i32_5 = arith.constant 128 : i32
    %10 = vector.broadcast %c128_i32_5 : i32 to vector<128x1xi32>
    %11 = arith.cmpi slt, %9, %10 : vector<128x1xi32>
    %cst_6 = arith.constant 0.000000e+00 : f32
    %12 = vector.shape_cast %11 : vector<128x1xi1> to vector<128x1xi1>
    %13 = vector.broadcast %12 : vector<128x1xi1> to vector<128x128xi1>
    %14 = vector.broadcast %cst_6 : f32 to vector<128x128xf32>
    %15 = arith.select %13, %5, %14 : vector<128x128xi1>, vector<128x128xf32>
    %cst_7 = arith.constant dense<0.000000e+00> : vector<128xf32>
    %16 = vector.multi_reduction <add>, %15, %cst_7 [0] : vector<128x128xf32> to vector<128xf32>
    %17 = vector.shape_cast %16 : vector<128xf32> to vector<1x128xf32>
    %18 = arith.mulf %15, %15 : vector<128x128xf32>
    %cst_8 = arith.constant dense<0.000000e+00> : vector<128xf32>
    %19 = vector.multi_reduction <add>, %18, %cst_8 [0] : vector<128x128xf32> to vector<128xf32>
    %20 = vector.shape_cast %19 : vector<128xf32> to vector<1x128xf32>
    %21 = tpu.concatenate %17, %20 in 0 : vector<1x128xf32>, vector<1x128xf32> -> vector<2x128xf32>
    %22 = vector.shape_cast %21 : vector<2x128xf32> to vector<1x2x128xf32>
    %c0_9 = arith.constant 0 : index
    %c0_10 = arith.constant 0 : index
    %c0_11 = arith.constant 0 : index
    %23 = vector.load %arg5[%c0_9, %c0_10, %c0_11] : memref<1x2x128xf32, #tpu.memory_space<vmem>>, vector<1x2x128xf32>
    tpu.vector_store %arg5[%c0_9, %c0_10, %c0_11], %22 {strides = array<i32>} : memref<1x2x128xf32, #tpu.memory_space<vmem>>, vector<1x2x128xf32>,
    %c0_12 = arith.constant 0 : index
    %c0_13 = arith.constant 0 : index
    %24 = vector.load %arg4[%c0_12, %c0_13] : memref<128x128xf32, #tpu.memory_space<vmem>>, vector<128x128xf32>
    tpu.vector_store %arg4[%c0_12, %c0_13], %5 {strides = array<i32>} : memref<128x128xf32, #tpu.memory_space<vmem>>, vector<128x128xf32>,
    return
  }
  func.func @transform_0(%arg0: i32) -> (i32, i32) {
    %c0_i32 = arith.constant 0 : i32
    %c0_i32_0 = arith.constant 0 : i32
    return %arg0, %c0_i32 : i32, i32
  }
  func.func @transform_1(%arg0: i32) -> (i32, i32) {
    %c0_i32 = arith.constant 0 : i32
    %c0_i32_0 = arith.constant 0 : i32
    %c0_i32_1 = arith.constant 0 : i32
    return %c0_i32, %c0_i32_0 : i32, i32
  }
  func.func @transform_2(%arg0: i32) -> (i32, i32) {
    %c0_i32 = arith.constant 0 : i32
    %c0_i32_0 = arith.constant 0 : i32
    %c0_i32_1 = arith.constant 0 : i32
    return %c0_i32, %c0_i32_0 : i32, i32
  }
  func.func @transform_3(%arg0: i32) -> (i32, i32) {
    %c0_i32 = arith.constant 0 : i32
    %c0_i32_0 = arith.constant 0 : i32
    return %arg0, %c0_i32 : i32, i32
  }
  func.func @transform_4(%arg0: i32) -> (i32, i32, i32) {
    %c0_i32 = arith.constant 0 : i32
    %c0_i32_0 = arith.constant 0 : i32
    %c0_i32_1 = arith.constant 0 : i32
    return %arg0, %c0_i32, %c0_i32_0 : i32, i32, i32
  }
}

module attributes {stable_mosaic.version = 11 : i64} {
  func.func @_bn_lrelu_kernel(%arg0: i32, %arg1: memref<128x128xf32, #tpu.memory_space<vmem>>, %arg2: memref<1x128xf32, #tpu.memory_space<vmem>>, %arg3: memref<1x128xf32, #tpu.memory_space<vmem>>, %arg4: memref<128x128xbf16, #tpu.memory_space<vmem>>) attributes {dimension_semantics = [#tpu.dimension_semantics<parallel>], iteration_bounds = array<i64: 1>, scalar_prefetch = 0 : i64, scratch_operands = 0 : i64, tpu.core_type = #tpu.core_type<tc>, window_params = [{transform_indices = @transform_0, window_bounds = array<i64: 128, 128>}, {pipeline_mode = #tpu.pipeline_mode<synchronous>, transform_indices = @transform_1, window_bounds = array<i64: 1, 128>}, {pipeline_mode = #tpu.pipeline_mode<synchronous>, transform_indices = @transform_2, window_bounds = array<i64: 1, 128>}, {transform_indices = @transform_3, window_bounds = array<i64: 128, 128>}]} {
    %c0 = arith.constant 0 : index
    %c0_0 = arith.constant 0 : index
    %0 = vector.load %arg1[%c0, %c0_0] : memref<128x128xf32, #tpu.memory_space<vmem>>, vector<128x128xf32>
    %c0_1 = arith.constant 0 : index
    %c0_2 = arith.constant 0 : index
    %1 = vector.load %arg2[%c0_1, %c0_2] : memref<1x128xf32, #tpu.memory_space<vmem>>, vector<1x128xf32>
    %2 = vector.broadcast %1 : vector<1x128xf32> to vector<128x128xf32>
    %3 = arith.subf %0, %2 : vector<128x128xf32>
    %c0_3 = arith.constant 0 : index
    %c0_4 = arith.constant 0 : index
    %4 = vector.load %arg3[%c0_3, %c0_4] : memref<1x128xf32, #tpu.memory_space<vmem>>, vector<1x128xf32>
    %5 = vector.broadcast %4 : vector<1x128xf32> to vector<128x128xf32>
    %6 = arith.mulf %3, %5 : vector<128x128xf32>
    %cst = arith.constant 0.000000e+00 : f32
    %7 = vector.broadcast %cst : f32 to vector<128x128xf32>
    %8 = arith.cmpf oge, %6, %7 : vector<128x128xf32>
    %cst_5 = arith.constant 2.000000e-01 : f32
    %9 = vector.broadcast %cst_5 : f32 to vector<128x128xf32>
    %10 = arith.mulf %9, %6 : vector<128x128xf32>
    %11 = arith.select %8, %6, %10 : vector<128x128xi1>, vector<128x128xf32>
    %12 = arith.truncf %11 : vector<128x128xf32> to vector<128x128xbf16>
    %c0_6 = arith.constant 0 : index
    %c0_7 = arith.constant 0 : index
    %13 = vector.load %arg4[%c0_6, %c0_7] : memref<128x128xbf16, #tpu.memory_space<vmem>>, vector<128x128xbf16>
    tpu.vector_store %arg4[%c0_6, %c0_7], %12 {strides = array<i32>} : memref<128x128xbf16, #tpu.memory_space<vmem>>, vector<128x128xbf16>,
    return
  }
  func.func @transform_0(%arg0: i32) -> (i32, i32) {
    %c0_i32 = arith.constant 0 : i32
    %c0_i32_0 = arith.constant 0 : i32
    return %arg0, %c0_i32 : i32, i32
  }
  func.func @transform_1(%arg0: i32) -> (i32, i32) {
    %c0_i32 = arith.constant 0 : i32
    %c0_i32_0 = arith.constant 0 : i32
    %c0_i32_1 = arith.constant 0 : i32
    return %c0_i32, %c0_i32_0 : i32, i32
  }
  func.func @transform_2(%arg0: i32) -> (i32, i32) {
    %c0_i32 = arith.constant 0 : i32
    %c0_i32_0 = arith.constant 0 : i32
    %c0_i32_1 = arith.constant 0 : i32
    return %c0_i32, %c0_i32_0 : i32, i32
  }
  func.func @transform_3(%arg0: i32) -> (i32, i32) {
    %c0_i32 = arith.constant 0 : i32
    %c0_i32_0 = arith.constant 0 : i32
    return %arg0, %c0_i32 : i32, i32
  }
}

module attributes {stable_mosaic.version = 11 : i64} {
  func.func @_bn_lrelu_kernel(%arg0: i32, %arg1: memref<104x128xf32, #tpu.memory_space<vmem>>, %arg2: memref<1x128xf32, #tpu.memory_space<vmem>>, %arg3: memref<1x128xf32, #tpu.memory_space<vmem>>, %arg4: memref<104x128xbf16, #tpu.memory_space<vmem>>) attributes {dimension_semantics = [#tpu.dimension_semantics<parallel>], iteration_bounds = array<i64: 1>, scalar_prefetch = 0 : i64, scratch_operands = 0 : i64, tpu.core_type = #tpu.core_type<tc>, window_params = [{transform_indices = @transform_0, window_bounds = array<i64: 104, 128>}, {pipeline_mode = #tpu.pipeline_mode<synchronous>, transform_indices = @transform_1, window_bounds = array<i64: 1, 128>}, {pipeline_mode = #tpu.pipeline_mode<synchronous>, transform_indices = @transform_2, window_bounds = array<i64: 1, 128>}, {transform_indices = @transform_3, window_bounds = array<i64: 104, 128>}]} {
    %c0 = arith.constant 0 : index
    %c0_0 = arith.constant 0 : index
    %0 = vector.load %arg1[%c0, %c0_0] : memref<104x128xf32, #tpu.memory_space<vmem>>, vector<104x128xf32>
    %c0_1 = arith.constant 0 : index
    %c0_2 = arith.constant 0 : index
    %1 = vector.load %arg2[%c0_1, %c0_2] : memref<1x128xf32, #tpu.memory_space<vmem>>, vector<1x128xf32>
    %2 = vector.broadcast %1 : vector<1x128xf32> to vector<104x128xf32>
    %3 = arith.subf %0, %2 : vector<104x128xf32>
    %c0_3 = arith.constant 0 : index
    %c0_4 = arith.constant 0 : index
    %4 = vector.load %arg3[%c0_3, %c0_4] : memref<1x128xf32, #tpu.memory_space<vmem>>, vector<1x128xf32>
    %5 = vector.broadcast %4 : vector<1x128xf32> to vector<104x128xf32>
    %6 = arith.mulf %3, %5 : vector<104x128xf32>
    %cst = arith.constant 0.000000e+00 : f32
    %7 = vector.broadcast %cst : f32 to vector<104x128xf32>
    %8 = arith.cmpf oge, %6, %7 : vector<104x128xf32>
    %cst_5 = arith.constant 2.000000e-01 : f32
    %9 = vector.broadcast %cst_5 : f32 to vector<104x128xf32>
    %10 = arith.mulf %9, %6 : vector<104x128xf32>
    %11 = arith.select %8, %6, %10 : vector<104x128xi1>, vector<104x128xf32>
    %12 = arith.truncf %11 : vector<104x128xf32> to vector<104x128xbf16>
    %c0_6 = arith.constant 0 : index
    %c0_7 = arith.constant 0 : index
    %13 = vector.load %arg4[%c0_6, %c0_7] : memref<104x128xbf16, #tpu.memory_space<vmem>>, vector<104x128xbf16>
    tpu.vector_store %arg4[%c0_6, %c0_7], %12 {strides = array<i32>} : memref<104x128xbf16, #tpu.memory_space<vmem>>, vector<104x128xbf16>,
    return
  }
  func.func @transform_0(%arg0: i32) -> (i32, i32) {
    %c0_i32 = arith.constant 0 : i32
    %c0_i32_0 = arith.constant 0 : i32
    return %arg0, %c0_i32 : i32, i32
  }
  func.func @transform_1(%arg0: i32) -> (i32, i32) {
    %c0_i32 = arith.constant 0 : i32
    %c0_i32_0 = arith.constant 0 : i32
    %c0_i32_1 = arith.constant 0 : i32
    return %c0_i32, %c0_i32_0 : i32, i32
  }
  func.func @transform_2(%arg0: i32) -> (i32, i32) {
    %c0_i32 = arith.constant 0 : i32
    %c0_i32_0 = arith.constant 0 : i32
    %c0_i32_1 = arith.constant 0 : i32
    return %c0_i32, %c0_i32_0 : i32, i32
  }
  func.func @transform_3(%arg0: i32) -> (i32, i32) {
    %c0_i32 = arith.constant 0 : i32
    %c0_i32_0 = arith.constant 0 : i32
    return %arg0, %c0_i32 : i32, i32
  }
}

module attributes {stable_mosaic.version = 11 : i64} {
  func.func @_conv_stats_kernel(%arg0: i32, %arg1: memref<104x512xbf16, #tpu.memory_space<vmem>>, %arg2: memref<512x128xbf16, #tpu.memory_space<vmem>>, %arg3: memref<1x128xf32, #tpu.memory_space<vmem>>, %arg4: memref<104x128xf32, #tpu.memory_space<vmem>>, %arg5: memref<1x2x128xf32, #tpu.memory_space<vmem>>) attributes {dimension_semantics = [#tpu.dimension_semantics<parallel>], iteration_bounds = array<i64: 1>, scalar_prefetch = 0 : i64, scratch_operands = 0 : i64, tpu.core_type = #tpu.core_type<tc>, window_params = [{transform_indices = @transform_0, window_bounds = array<i64: 104, 512>}, {pipeline_mode = #tpu.pipeline_mode<synchronous>, transform_indices = @transform_1, window_bounds = array<i64: 512, 128>}, {pipeline_mode = #tpu.pipeline_mode<synchronous>, transform_indices = @transform_2, window_bounds = array<i64: 1, 128>}, {transform_indices = @transform_3, window_bounds = array<i64: 104, 128>}, {transform_indices = @transform_4, window_bounds = array<i64: 1, 2, 128>}]} {
    %c0 = arith.constant 0 : index
    %c0_0 = arith.constant 0 : index
    %0 = vector.load %arg1[%c0, %c0_0] : memref<104x512xbf16, #tpu.memory_space<vmem>>, vector<104x512xbf16>
    %c0_1 = arith.constant 0 : index
    %c0_2 = arith.constant 0 : index
    %1 = vector.load %arg2[%c0_1, %c0_2] : memref<512x128xbf16, #tpu.memory_space<vmem>>, vector<512x128xbf16>
    %cst = arith.constant dense<0.000000e+00> : vector<104x128xf32>
    %2 = tpu.matmul %0, %1, %cst {dimension_numbers = #tpu.dot_dimension_numbers<[1], [0], [0], [1], [0, 0, 1, 1], [], []>} : vector<104x512xbf16>, vector<512x128xbf16>, vector<104x128xf32> -> vector<104x128xf32>
    %c0_3 = arith.constant 0 : index
    %c0_4 = arith.constant 0 : index
    %3 = vector.load %arg3[%c0_3, %c0_4] : memref<1x128xf32, #tpu.memory_space<vmem>>, vector<1x128xf32>
    %4 = vector.broadcast %3 : vector<1x128xf32> to vector<104x128xf32>
    %5 = arith.addf %2, %4 : vector<104x128xf32>
    %c104_i32 = arith.constant 104 : i32
    %6 = arith.muli %arg0, %c104_i32 : i32
    %7 = tpu.iota {dimensions = array<i32: 0>} : vector<104x1xi32>
    %8 = vector.broadcast %6 : i32 to vector<104x1xi32>
    %9 = arith.addi %8, %7 : vector<104x1xi32>
    %c98_i32 = arith.constant 98 : i32
    %10 = vector.broadcast %c98_i32 : i32 to vector<104x1xi32>
    %11 = arith.cmpi slt, %9, %10 : vector<104x1xi32>
    %cst_5 = arith.constant 0.000000e+00 : f32
    %12 = vector.shape_cast %11 : vector<104x1xi1> to vector<104x1xi1>
    %13 = vector.broadcast %12 : vector<104x1xi1> to vector<104x128xi1>
    %14 = vector.broadcast %cst_5 : f32 to vector<104x128xf32>
    %15 = arith.select %13, %5, %14 : vector<104x128xi1>, vector<104x128xf32>
    %cst_6 = arith.constant dense<0.000000e+00> : vector<128xf32>
    %16 = vector.multi_reduction <add>, %15, %cst_6 [0] : vector<104x128xf32> to vector<128xf32>
    %17 = vector.shape_cast %16 : vector<128xf32> to vector<1x128xf32>
    %18 = arith.mulf %15, %15 : vector<104x128xf32>
    %cst_7 = arith.constant dense<0.000000e+00> : vector<128xf32>
    %19 = vector.multi_reduction <add>, %18, %cst_7 [0] : vector<104x128xf32> to vector<128xf32>
    %20 = vector.shape_cast %19 : vector<128xf32> to vector<1x128xf32>
    %21 = tpu.concatenate %17, %20 in 0 : vector<1x128xf32>, vector<1x128xf32> -> vector<2x128xf32>
    %22 = vector.shape_cast %21 : vector<2x128xf32> to vector<1x2x128xf32>
    %c0_8 = arith.constant 0 : index
    %c0_9 = arith.constant 0 : index
    %c0_10 = arith.constant 0 : index
    %23 = vector.load %arg5[%c0_8, %c0_9, %c0_10] : memref<1x2x128xf32, #tpu.memory_space<vmem>>, vector<1x2x128xf32>
    tpu.vector_store %arg5[%c0_8, %c0_9, %c0_10], %22 {strides = array<i32>} : memref<1x2x128xf32, #tpu.memory_space<vmem>>, vector<1x2x128xf32>,
    %c0_11 = arith.constant 0 : index
    %c0_12 = arith.constant 0 : index
    %24 = vector.load %arg4[%c0_11, %c0_12] : memref<104x128xf32, #tpu.memory_space<vmem>>, vector<104x128xf32>
    tpu.vector_store %arg4[%c0_11, %c0_12], %5 {strides = array<i32>} : memref<104x128xf32, #tpu.memory_space<vmem>>, vector<104x128xf32>,
    return
  }
  func.func @transform_0(%arg0: i32) -> (i32, i32) {
    %c0_i32 = arith.constant 0 : i32
    %c0_i32_0 = arith.constant 0 : i32
    return %arg0, %c0_i32 : i32, i32
  }
  func.func @transform_1(%arg0: i32) -> (i32, i32) {
    %c0_i32 = arith.constant 0 : i32
    %c0_i32_0 = arith.constant 0 : i32
    %c0_i32_1 = arith.constant 0 : i32
    return %c0_i32, %c0_i32_0 : i32, i32
  }
  func.func @transform_2(%arg0: i32) -> (i32, i32) {
    %c0_i32 = arith.constant 0 : i32
    %c0_i32_0 = arith.constant 0 : i32
    %c0_i32_1 = arith.constant 0 : i32
    return %c0_i32, %c0_i32_0 : i32, i32
  }
  func.func @transform_3(%arg0: i32) -> (i32, i32) {
    %c0_i32 = arith.constant 0 : i32
    %c0_i32_0 = arith.constant 0 : i32
    return %arg0, %c0_i32 : i32, i32
  }
  func.func @transform_4(%arg0: i32) -> (i32, i32, i32) {
    %c0_i32 = arith.constant 0 : i32
    %c0_i32_0 = arith.constant 0 : i32
    %c0_i32_1 = arith.constant 0 : i32
    return %arg0, %c0_i32, %c0_i32_0 : i32, i32, i32
  }
}

module attributes {stable_mosaic.version = 11 : i64} {
  func.func @_convT_sigmoid_kernel(%arg0: i32, %arg1: memref<8x1024xbf16, #tpu.memory_space<vmem>>, %arg2: memref<1024x72xbf16, #tpu.memory_space<vmem>>, %arg3: memref<8x1xf32, #tpu.memory_space<vmem>>, %arg4: memref<8x72xf32, #tpu.memory_space<vmem>>) attributes {dimension_semantics = [#tpu.dimension_semantics<parallel>], iteration_bounds = array<i64: 1>, scalar_prefetch = 0 : i64, scratch_operands = 0 : i64, tpu.core_type = #tpu.core_type<tc>, window_params = [{pipeline_mode = #tpu.pipeline_mode<synchronous>, transform_indices = @transform_0, window_bounds = array<i64: 8, 1024>}, {transform_indices = @transform_1, window_bounds = array<i64: 1024, 72>}, {pipeline_mode = #tpu.pipeline_mode<synchronous>, transform_indices = @transform_2, window_bounds = array<i64: 8, 1>}, {transform_indices = @transform_3, window_bounds = array<i64: 8, 72>}]} {
    %c0 = arith.constant 0 : index
    %c0_0 = arith.constant 0 : index
    %0 = vector.load %arg1[%c0, %c0_0] : memref<8x1024xbf16, #tpu.memory_space<vmem>>, vector<8x1024xbf16>
    %c0_1 = arith.constant 0 : index
    %c0_2 = arith.constant 0 : index
    %1 = vector.load %arg2[%c0_1, %c0_2] : memref<1024x72xbf16, #tpu.memory_space<vmem>>, vector<1024x72xbf16>
    %cst = arith.constant dense<0.000000e+00> : vector<8x72xf32>
    %2 = tpu.matmul %0, %1, %cst {dimension_numbers = #tpu.dot_dimension_numbers<[1], [0], [0], [1], [0, 0, 1, 1], [], []>} : vector<8x1024xbf16>, vector<1024x72xbf16>, vector<8x72xf32> -> vector<8x72xf32>
    %c0_3 = arith.constant 0 : index
    %c0_4 = arith.constant 0 : index
    %3 = vector.load %arg3[%c0_3, %c0_4] : memref<8x1xf32, #tpu.memory_space<vmem>>, vector<8x1xf32>
    %4 = vector.broadcast %3 : vector<8x1xf32> to vector<8x72xf32>
    %5 = arith.addf %2, %4 : vector<8x72xf32>
    %6 = arith.negf %5 : vector<8x72xf32>
    %7 = math.exp %6 : vector<8x72xf32>
    %cst_5 = arith.constant 1.000000e+00 : f32
    %8 = vector.broadcast %cst_5 : f32 to vector<8x72xf32>
    %9 = arith.addf %8, %7 : vector<8x72xf32>
    %10 = arith.divf %8, %9 : vector<8x72xf32>
    %c0_6 = arith.constant 0 : index
    %c0_7 = arith.constant 0 : index
    %11 = vector.load %arg4[%c0_6, %c0_7] : memref<8x72xf32, #tpu.memory_space<vmem>>, vector<8x72xf32>
    tpu.vector_store %arg4[%c0_6, %c0_7], %10 {strides = array<i32>} : memref<8x72xf32, #tpu.memory_space<vmem>>, vector<8x72xf32>,
    return
  }
  func.func @transform_0(%arg0: i32) -> (i32, i32) {
    %c0_i32 = arith.constant 0 : i32
    %c0_i32_0 = arith.constant 0 : i32
    %c0_i32_1 = arith.constant 0 : i32
    return %c0_i32, %c0_i32_0 : i32, i32
  }
  func.func @transform_1(%arg0: i32) -> (i32, i32) {
    %c0_i32 = arith.constant 0 : i32
    %c0_i32_0 = arith.constant 0 : i32
    return %c0_i32, %arg0 : i32, i32
  }
  func.func @transform_2(%arg0: i32) -> (i32, i32) {
    %c0_i32 = arith.constant 0 : i32
    %c0_i32_0 = arith.constant 0 : i32
    %c0_i32_1 = arith.constant 0 : i32
    return %c0_i32, %c0_i32_0 : i32, i32
  }
  func.func @transform_3(%arg0: i32) -> (i32, i32) {
    %c0_i32 = arith.constant 0 : i32
    %c0_i32_0 = arith.constant 0 : i32
    return %c0_i32, %arg0 : i32, i32
  }
}

</mosaic_0001>

<bundles_post_ra>
// kernel: discriminator_forward.8
= control target key start
LH: loop header
LB: loop body
LE: loop exit
PB: predicated region body
PF: predicated region fallthrough
CT: control target
= control target key end

     0   :  { %s1190_s12 = smov 0   ;;  %s1317_s0 = inlined_call_operand.vmem [shape: bf16[2048,128], index: 0, kind: input, shape index: {}]   ;;  %s1318_s1 = inlined_call_operand.vmem [shape: bf16[128,128], index: 1, kind: input, shape index: {}]   ;;  %s1319_s2 = inlined_call_operand.vmem [shape: f32[1,128], index: 2, kind: input, shape index: {}]   ;;  %s1320_s3 = inlined_call_operand.vmem [shape: bf16[2048,128], index: 3, kind: output, shape index: {}]  }
   0x1 LB: > { %s847_s13 = sadd.s32 4294967295, %s1168_s12   ;;  %p851_p0 = scmp.ge.s32.totalorder %s1168_s12, 1  ;;  %s1168_s12 = sphi %s1190_s12, %s13_s12  }
   0x2   : > { %p138_p1 = scmp.lt.s32.totalorder %s1168_s12, 9 }
   0x4   : > { %p139_p2 = pnand %p851_p0, %p138_p1 }
   0x5   : > { %v1138_v0 = vld [vmem:[%s1318_s1] sm:$0xff] (!%p139_p2)   ;;  %s852_s16 = sshll.u32 (!%p139_p2), %s847_s13, 5  ;;  %v1139_v1 = vld [vmem:[%s1318_s1 + $0x8] sm:$0xff] (!%p139_p2)   ;;  %v1140_v2 = vld [vmem:[%s1318_s1 + $0x10] sm:$0xff] (!%p139_p2)  }
   0x6   : > { %142 = sbr.rel (%p139_p2) target bundleno = 293 (0x125), region = 32  ;;  %p163_p3 = scmp.lt.s32.totalorder (!%p139_p2), %s852_s16, 255  ;;  %1066 = vmatprep.subr.bf16.mxu0 (!%p139_p2), %v1138_v0  ;;  %1114 = vmatprep.subr.bf16.mxu1 (!%p139_p2), %v1138_v0  ;;  %v1141_v3 = vld [vmem:[%s1318_s1 + $0x18] sm:$0xff] (!%p139_p2)   ;;  %v1142_v6 = vld [vmem:[%s1318_s1 + $0x20] sm:$0xff] (!%p139_p2)   ;;  %v1143_v7 = vld [vmem:[%s1318_s1 + $0x28] sm:$0xff] (!%p139_p2)  }
   0x7   : > { %1067 = vmatpush3.bf16.msra.mxu0 (!%p139_p2), %v1138_v0  ;;  %1122 = vmatpush3.bf16.msra.mxu1 (!%p139_p2), %v1138_v0  ;;  %v1144_v8 = vld [vmem:[%s1318_s1 + $0x30] sm:$0xff] (!%p139_p2)   ;;  %v1145_v9 = vld [vmem:[%s1318_s1 + $0x38] sm:$0xff] (!%p139_p2)   ;;  %v1251_v24 = vld [vmem:[%s1319_s2] ss:$0 sm:$0xff] (!%p139_p2) }
   0x8   : > { %1068 = vmatprep.subr.bf16.mxu0 (!%p139_p2), %v1139_v1  ;;  %1115 = vmatprep.subr.bf16.mxu1 (!%p139_p2), %v1139_v1 }
   0xb   : > { %1069 = vmatpush3.bf16.msra.mxu0 (!%p139_p2), %v1139_v1  ;;  %1123 = vmatpush3.bf16.msra.mxu1 (!%p139_p2), %v1139_v1 }
   0xc   : > { %1070 = vmatprep.subr.bf16.mxu0 (!%p139_p2), %v1140_v2  ;;  %1116 = vmatprep.subr.bf16.mxu1 (!%p139_p2), %v1140_v2 }
   0xd   : > { %s1322_s16 = smov (!%p163_p3, %s852_s16), 255 }
   0xe   : > { %s853_s21 = sshll.u32 %s1322_s16, 2 }
   0xf   : > { %s1215_s24 = scalar_lea.vmem %s1317_s0, %s853_s21  ;;  %1071 = vmatpush3.bf16.msra.mxu0 %v1140_v2  ;;  %1124 = vmatpush3.bf16.msra.mxu1 %v1140_v2  ;;  %s1268_s13 = scalar_lea.vmem %s1320_s3, %s853_s21 }
  0x10   : > { %v1146_v4 = vld [vmem:[%s1215_s24] sm:$0xff]   ;;  %1072 = vmatprep.subr.bf16.mxu0 %v1141_v3  ;;  %1117 = vmatprep.subr.bf16.mxu1 %v1141_v3  ;;  %v1148_v10 = vld [vmem:[%s1215_s24 + $0x8] sm:$0xff]   ;;  %v1150_v12 = vld [vmem:[%s1215_s24 + $0x10] sm:$0xff]  }
  0x11   : > { %v1147_v5 = vld [vmem:[%s1215_s24 + $0x40] sm:$0xff]   ;;  %1082 = vmatprep.mubr.bf16.mxu0 %v1146_v4  ;;  %v1149_v11 = vld [vmem:[%s1215_s24 + $0x48] sm:$0xff]   ;;  %v1151_v13 = vld [vmem:[%s1215_s24 + $0x50] sm:$0xff]  }
  0x12   : > { %1098 = vmatprep.mubr.bf16.mxu1 %v1147_v5  ;;  %v1152_v14 = vld [vmem:[%s1215_s24 + $0x18] sm:$0xff]   ;;  %v1154_v16 = vld [vmem:[%s1215_s24 + $0x20] sm:$0xff]   ;;  %v1156_v18 = vld [vmem:[%s1215_s24 + $0x28] sm:$0xff]  }
  0x13   : > { %1073 = vmatpush3.bf16.msra.mxu0 %v1141_v3  ;;  %1125 = vmatpush3.bf16.msra.mxu1 %v1141_v3  ;;  %v1153_v15 = vld [vmem:[%s1215_s24 + $0x58] sm:$0xff]   ;;  %v1155_v17 = vld [vmem:[%s1215_s24 + $0x60] sm:$0xff]   ;;  %v1157_v19 = vld [vmem:[%s1215_s24 + $0x68] sm:$0xff]  }
  0x14   : > { %1074 = vmatprep.subr.bf16.mxu0 %v1142_v6  ;;  %1118 = vmatprep.subr.bf16.mxu1 %v1142_v6  ;;  %v1158_v20 = vld [vmem:[%s1215_s24 + $0x30] sm:$0xff]   ;;  %v1160_v22 = vld [vmem:[%s1215_s24 + $0x38] sm:$0xff]  }
  0x15   : > { %v1159_v21 = vld [vmem:[%s1215_s24 + $0x70] sm:$0xff]   ;;  %v1161_v23 = vld [vmem:[%s1215_s24 + $0x78] sm:$0xff]  }
  0x17   : > { %1075 = vmatpush3.bf16.msra.mxu0 %v1142_v6  ;;  %1126 = vmatpush3.bf16.msra.mxu1 %v1142_v6 }
  0x18   : > { %1076 = vmatprep.subr.bf16.mxu0 %v1143_v7  ;;  %1119 = vmatprep.subr.bf16.mxu1 %v1143_v7 }
  0x1b   : > { %1077 = vmatpush3.bf16.msra.mxu0 %v1143_v7  ;;  %1127 = vmatpush3.bf16.msra.mxu1 %v1143_v7 }
  0x1c   : > { %1078 = vmatprep.subr.bf16.mxu0 %v1144_v8  ;;  %1120 = vmatprep.subr.bf16.mxu1 %v1144_v8 }
  0x1f   : > { %1079 = vmatpush3.bf16.msra.mxu0 %v1144_v8  ;;  %1128 = vmatpush3.bf16.msra.mxu1 %v1144_v8 }
  0x20   : > { %1080 = vmatprep.subr.bf16.mxu0 %v1145_v9  ;;  %1121 = vmatprep.subr.bf16.mxu1 %v1145_v9 }
  0x23   : > { %1081 = vmatpush3.bf16.msra.mxu0 %v1145_v9  ;;  %1129 = vmatpush3.bf16.msra.mxu1 %v1145_v9 }
  0x26   : > { %1083 = vmatmul.mubr.bf16.vlgmr.msra.gmra.mrb[0].mxu0 %v1148_v10  ;;  %1099 = vmatmul.mubr.bf16.vlgmr.msra.gmra.mrb[0].mxu1 %v1149_v11 }
  0x27   : > { %1086 = vmatprep.mubr.bf16.mxu0 %v1150_v12  ;;  %1102 = vmatprep.mubr.bf16.mxu1 %v1151_v13 }
  0x2e   : > { %1087 = vmatmul.mubr.bf16.gmra.mrb[4].mxu0 %v1152_v14  ;;  %1103 = vmatmul.mubr.bf16.gmra.mrb[4].mxu1 %v1153_v15 }
  0x2f   : > { %1090 = vmatprep.mubr.bf16.mxu0 %v1154_v16  ;;  %1106 = vmatprep.mubr.bf16.mxu1 %v1155_v17 }
  0x36   : > { %1091 = vmatmul.mubr.bf16.gmra.mrb[8].mxu0 %v1156_v18  ;;  %1107 = vmatmul.mubr.bf16.gmra.mrb[8].mxu1 %v1157_v19 }
  0x37   : > { %1094 = vmatprep.mubr.bf16.mxu0 %v1158_v20  ;;  %1110 = vmatprep.mubr.bf16.mxu1 %v1159_v21 }
  0x3e   : > { %1095 = vmatmul.mubr.bf16.gmra.mrb[12].mxu0 %v1160_v22  ;;  %1111 = vmatmul.mubr.bf16.gmra.mrb[12].mxu1 %v1161_v23 }
  0xf9   : > { %v1084_v25 = vpop.f32.mrb[0].mxu0  ;;  %v1100_v26 = vpop.f32.mrb[0].mxu1 }
  0xfa   : > { %v417_v27 = vadd.f32 %v1084_v25, %v1251_v24  ;;  %v481_v28 = vadd.f32 %v1100_v26, %v1251_v24  ;;  %v408_v29 = vpop.f32.mrb[1].mxu0  ;;  %v472_v30 = vpop.f32.mrb[1].mxu1 }
  0xfb   : > { %v409_v31 = vadd.f32 %v1251_v24, %v408_v29  ;;  %v473_v32 = vadd.f32 %v1251_v24, %v472_v30  ;;  %v1085_v33 = vpop.f32.mrb[2].mxu0  ;;  %v1101_v34 = vpop.f32.mrb[2].mxu1 }
  0xfc   : > { %vm537_vm0 = vcmp.ge.f32.partialorder %v417_v27, 0.0  ;;  %v569_v35 = vmul.f32 0.2, %v417_v27  ;;  %vm553_vm1 = vcmp.ge.f32.partialorder %v481_v28, 0.0  ;;  %v585_v36 = vmul.f32 0.2, %v481_v28 }
  0xfd   : > { %vm535_vm2 = vcmp.ge.f32.partialorder %v409_v31, 0.0  ;;  %v567_v37 = vmul.f32 0.2, %v409_v31  ;;  %vm551_vm3 = vcmp.ge.f32.partialorder %v473_v32, 0.0  ;;  %v583_v38 = vmul.f32 0.2, %v473_v32 }
  0xfe   : > { %v420_v39 = vadd.f32 %v1085_v33, %v1251_v24  ;;  %v484_v40 = vadd.f32 %v1101_v34, %v1251_v24  ;;  %v411_v41 = vpop.f32.mrb[3].mxu0  ;;  %v475_v42 = vpop.f32.mrb[3].mxu1  ;;  %v601_v43 = vsel %vm537_vm0, %v417_v27, %v569_v35  ;;  %v617_v44 = vsel %vm553_vm1, %v481_v28, %v585_v36 }
  0xff   : > { %v412_v45 = vadd.f32 %v1251_v24, %v411_v41  ;;  %v476_v46 = vadd.f32 %v1251_v24, %v475_v42  ;;  %v599_v51 = vsel %vm535_vm2, %v409_v31, %v567_v37  ;;  %v615_v52 = vsel %vm551_vm3, %v473_v32, %v583_v38 }
 0x100   : > { %vm538_vm4 = vcmp.ge.f32.partialorder %v420_v39, 0.0  ;;  %v570_v47 = vmul.f32 0.2, %v420_v39  ;;  %vm554_vm5 = vcmp.ge.f32.partialorder %v484_v40, 0.0  ;;  %v586_v48 = vmul.f32 0.2, %v484_v40 }
 0x101   : > { %vm536_vm6 = vcmp.ge.f32.partialorder %v412_v45, 0.0  ;;  %v568_v49 = vmul.f32 0.2, %v412_v45  ;;  %vm552_vm7 = vcmp.ge.f32.partialorder %v476_v46, 0.0  ;;  %v584_v50 = vmul.f32 0.2, %v476_v46 }
 0x102   : > { %v602_v53 = vsel %vm538_vm4, %v420_v39, %v570_v47  ;;  %v618_v54 = vsel %vm554_vm5, %v484_v40, %v586_v48  ;;  %v1088_v55 = vpop.f32.mrb[4].mxu0  ;;  %v1104_v56 = vpop.f32.mrb[4].mxu1 }
 0x103   : > { %v955_v57 = vpack.c.bf16 %v602_v53, %v601_v43  ;;  %v995_v58 = vpack.c.bf16 %v618_v54, %v617_v44  ;;  %v600_v59 = vsel %vm536_vm6, %v412_v45, %v568_v49  ;;  %v616_v60 = vsel %vm552_vm7, %v476_v46, %v584_v50  ;;  %v424_v61 = vpop.f32.mrb[5].mxu0  ;;  %v488_v62 = vpop.f32.mrb[5].mxu1 }
 0x104   : > { %v950_v63 = vpack.c.bf16 %v600_v59, %v599_v51  ;;  %v990_v0 = vpack.c.bf16 %v616_v60, %v615_v52  ;;  %v433_v1 = vadd.f32 %v1088_v55, %v1251_v24  ;;  %v497_v2 = vadd.f32 %v1104_v56, %v1251_v24  ;;  %v1089_v3 = vpop.f32.mrb[6].mxu0  ;;  %v1105_v4 = vpop.f32.mrb[6].mxu1 }
 0x105   : > { %1027 = vst [vmem:[%s1268_s13 + $0x8] sm:$0xff] %v955_v57   ;;  %1035 = vst [vmem:[%s1268_s13 + $0x48] sm:$0xff] %v995_v58   ;;  %v425_v5 = vadd.f32 %v1251_v24, %v424_v61  ;;  %v489_v6 = vadd.f32 %v1251_v24, %v488_v62  ;;  %v436_v7 = vadd.f32 %v1089_v3, %v1251_v24  ;;  %v427_v9 = vpop.f32.mrb[7].mxu0  ;;  %v491_v10 = vpop.f32.mrb[7].mxu1 }
 0x106   : > { %v500_v8 = vadd.f32 %v1105_v4, %v1251_v24  ;;  %951 = vst [vmem:[%s1268_s13] sm:$0xff] %v950_v63   ;;  %1034 = vst [vmem:[%s1268_s13 + $0x40] sm:$0xff] %v990_v0   ;;  %vm541_vm8 = vcmp.ge.f32.partialorder %v433_v1, 0.0  ;;  %v573_v11 = vmul.f32 0.2, %v433_v1  ;;  %vm557_vm9 = vcmp.ge.f32.partialorder %v497_v2, 0.0 }
 0x107   : > { %v589_v12 = vmul.f32 0.2, %v497_v2  ;;  %vm539_vm10 = vcmp.ge.f32.partialorder %v425_v5, 0.0  ;;  %v571_v13 = vmul.f32 0.2, %v425_v5  ;;  %vm555_vm11 = vcmp.ge.f32.partialorder %v489_v6, 0.0 }
 0x108   : > { %v605_v14 = vsel %vm541_vm8, %v433_v1, %v573_v11  ;;  %v587_v15 = vmul.f32 0.2, %v489_v6  ;;  %vm542_vm12 = vcmp.ge.f32.partialorder %v436_v7, 0.0  ;;  %v574_v16 = vmul.f32 0.2, %v436_v7 }
 0x109   : > { %v621_v17 = vsel %vm557_vm9, %v497_v2, %v589_v12  ;;  %v603_v18 = vsel %vm539_vm10, %v425_v5, %v571_v13  ;;  %vm558_vm13 = vcmp.ge.f32.partialorder %v500_v8, 0.0  ;;  %v590_v19 = vmul.f32 0.2, %v500_v8  ;;  %v1092_v20 = vpop.f32.mrb[8].mxu0  ;;  %v1108_v21 = vpop.f32.mrb[8].mxu1 }
 0x10a   : > { %v606_v22 = vsel %vm542_vm12, %v436_v7, %v574_v16  ;;  %v428_v23 = vadd.f32 %v1251_v24, %v427_v9  ;;  %v492_v25 = vadd.f32 %v1251_v24, %v491_v10  ;;  %v449_v26 = vadd.f32 %v1092_v20, %v1251_v24  ;;  %v440_v27 = vpop.f32.mrb[9].mxu0  ;;  %v504_v28 = vpop.f32.mrb[9].mxu1 }
 0x10b   : > { %v965_v29 = vpack.c.bf16 %v606_v22, %v605_v14  ;;  %v622_v30 = vsel %vm558_vm13, %v500_v8, %v590_v19  ;;  %v513_v31 = vadd.f32 %v1108_v21, %v1251_v24  ;;  %v441_v32 = vadd.f32 %v1251_v24, %v440_v27  ;;  %v1093_v33 = vpop.f32.mrb[10].mxu0  ;;  %v1109_v34 = vpop.f32.mrb[10].mxu1 }
 0x10c   : > { %v1005_v35 = vpack.c.bf16 %v622_v30, %v621_v17  ;;  %vm540_vm14 = vcmp.ge.f32.partialorder %v428_v23, 0.0  ;;  %v572_v36 = vmul.f32 0.2, %v428_v23  ;;  %vm556_vm15 = vcmp.ge.f32.partialorder %v492_v25, 0.0  ;;  %v443_v37 = vpop.f32.mrb[11].mxu0  ;;  %v507_v38 = vpop.f32.mrb[11].mxu1 }
 0x10d   : > { %1029 = vst [vmem:[%s1268_s13 + $0x18] sm:$0xff] %v965_v29   ;;  %v588_v39 = vmul.f32 0.2, %v492_v25  ;;  %vm545_vm0 = vcmp.ge.f32.partialorder %v449_v26, 0.0  ;;  %v577_v40 = vmul.f32 0.2, %v449_v26  ;;  %v619_v41 = vsel %vm555_vm11, %v489_v6, %v587_v15 }
 0x10e   : > { %vm561_vm1 = vcmp.ge.f32.partialorder %v513_v31, 0.0  ;;  %1037 = vst [vmem:[%s1268_s13 + $0x58] sm:$0xff] %v1005_v35   ;;  %v604_v42 = vsel %vm540_vm14, %v428_v23, %v572_v36  ;;  %v593_v43 = vmul.f32 0.2, %v513_v31  ;;  %vm543_vm2 = vcmp.ge.f32.partialorder %v441_v32, 0.0 }
 0x10f   : > { %v960_v44 = vpack.c.bf16 %v604_v42, %v603_v18  ;;  %v620_v45 = vsel %vm556_vm15, %v492_v25, %v588_v39  ;;  %v575_v46 = vmul.f32 0.2, %v441_v32  ;;  %v505_v47 = vadd.f32 %v1251_v24, %v504_v28 }
 0x110   : > { %v1000_v48 = vpack.c.bf16 %v620_v45, %v619_v41  ;;  %v609_v49 = vsel %vm545_vm0, %v449_v26, %v577_v40  ;;  %v625_v50 = vsel %vm561_vm1, %v513_v31, %v593_v43  ;;  %v452_v51 = vadd.f32 %v1093_v33, %v1251_v24 }
 0x111   : > { %1028 = vst [vmem:[%s1268_s13 + $0x10] sm:$0xff] %v960_v44   ;;  %vm559_vm3 = vcmp.ge.f32.partialorder %v505_v47, 0.0  ;;  %v591_v52 = vmul.f32 0.2, %v505_v47  ;;  %v516_v53 = vadd.f32 %v1109_v34, %v1251_v24  ;;  %v444_v54 = vadd.f32 %v1251_v24, %v443_v37  ;;  %v1096_v55 = vpop.f32.mrb[12].mxu0  ;;  %v1112_v56 = vpop.f32.mrb[12].mxu1 }
 0x112   : > { %1036 = vst [vmem:[%s1268_s13 + $0x50] sm:$0xff] %v1000_v48   ;;  %vm546_vm4 = vcmp.ge.f32.partialorder %v452_v51, 0.0  ;;  %v578_v57 = vmul.f32 0.2, %v452_v51  ;;  %v508_v58 = vadd.f32 %v1251_v24, %v507_v38  ;;  %v465_v59 = vadd.f32 %v1096_v55, %v1251_v24  ;;  %v456_v60 = vpop.f32.mrb[13].mxu0  ;;  %v520_v61 = vpop.f32.mrb[13].mxu1 }
 0x113   : > { %v607_v62 = vsel %vm543_vm2, %v441_v32, %v575_v46  ;;  %vm562_vm5 = vcmp.ge.f32.partialorder %v516_v53, 0.0  ;;  %v594_v63 = vmul.f32 0.2, %v516_v53  ;;  %vm544_vm6 = vcmp.ge.f32.partialorder %v444_v54, 0.0  ;;  %v1097_v0 = vpop.f32.mrb[14].mxu0  ;;  %v1113_v1 = vpop.f32.mrb[14].mxu1 }
 0x114   : > { %v610_v2 = vsel %vm546_vm4, %v452_v51, %v578_v57  ;;  %v576_v3 = vmul.f32 0.2, %v444_v54  ;;  %vm560_vm7 = vcmp.ge.f32.partialorder %v508_v58, 0.0  ;;  %v592_v4 = vmul.f32 0.2, %v508_v58  ;;  %v459_v5 = vpop.f32.mrb[15].mxu0 }
 0x115   : > { %v623_v6 = vsel %vm559_vm3, %v505_v47, %v591_v52  ;;  %v975_v7 = vpack.c.bf16 %v610_v2, %v609_v49  ;;  %v626_v8 = vsel %vm562_vm5, %v516_v53, %v594_v63  ;;  %v581_v9 = vmul.f32 0.2, %v465_v59  ;;  %v523_v10 = vpop.f32.mrb[15].mxu1 }
 0x116   : > { %v1015_v11 = vpack.c.bf16 %v626_v8, %v625_v50  ;;  %v608_v12 = vsel %vm544_vm6, %v444_v54, %v576_v3  ;;  %v624_v13 = vsel %vm560_vm7, %v508_v58, %v592_v4  ;;  %v529_v14 = vadd.f32 %v1112_v56, %v1251_v24 }
 0x117   : > { %1031 = vst [vmem:[%s1268_s13 + $0x28] sm:$0xff] %v975_v7   ;;  %v970_v15 = vpack.c.bf16 %v608_v12, %v607_v62  ;;  %v1010_v16 = vpack.c.bf16 %v624_v13, %v623_v6  ;;  %vm549_vm8 = vcmp.ge.f32.partialorder %v465_v59, 0.0  ;;  %v457_v17 = vadd.f32 %v1251_v24, %v456_v60 }
 0x118   : > { %1039 = vst [vmem:[%s1268_s13 + $0x68] sm:$0xff] %v1015_v11   ;;  %vm565_vm9 = vcmp.ge.f32.partialorder %v529_v14, 0.0  ;;  %v597_v18 = vmul.f32 0.2, %v529_v14  ;;  %v521_v19 = vadd.f32 %v1251_v24, %v520_v61  ;;  %v468_v20 = vadd.f32 %v1097_v0, %v1251_v24 }
 0x119   : > { %1030 = vst [vmem:[%s1268_s13 + $0x20] sm:$0xff] %v970_v15   ;;  %1038 = vst [vmem:[%s1268_s13 + $0x60] sm:$0xff] %v1010_v16   ;;  %v579_v21 = vmul.f32 0.2, %v457_v17  ;;  %v532_v22 = vadd.f32 %v1113_v1, %v1251_v24  ;;  %v460_v23 = vadd.f32 %v1251_v24, %v459_v5  ;;  %v613_v25 = vsel %vm549_vm8, %v465_v59, %v581_v9 }
 0x11a   : > { %vm547_vm10 = vcmp.ge.f32.partialorder %v457_v17, 0.0  ;;  %vm550_vm11 = vcmp.ge.f32.partialorder %v468_v20, 0.0  ;;  %v629_v26 = vsel %vm565_vm9, %v529_v14, %v597_v18  ;;  %v582_v27 = vmul.f32 0.2, %v468_v20 }
 0x11b   : > { %vm566_vm12 = vcmp.ge.f32.partialorder %v532_v22, 0.0  ;;  %v598_v28 = vmul.f32 0.2, %v532_v22  ;;  %vm563_vm13 = vcmp.ge.f32.partialorder %v521_v19, 0.0  ;;  %vm548_vm14 = vcmp.ge.f32.partialorder %v460_v23, 0.0 }
 0x11c   : > { %v580_v29 = vmul.f32 0.2, %v460_v23  ;;  %v524_v30 = vadd.f32 %v1251_v24, %v523_v10  ;;  %v611_v31 = vsel %vm547_vm10, %v457_v17, %v579_v21  ;;  %v595_v32 = vmul.f32 0.2, %v521_v19 }
 0x11d   : > { %v614_v33 = vsel %vm550_vm11, %v468_v20, %v582_v27  ;;  %v630_v34 = vsel %vm566_vm12, %v532_v22, %v598_v28 }
 0x11e   : > { %v985_v35 = vpack.c.bf16 %v614_v33, %v613_v25  ;;  %v1025_v36 = vpack.c.bf16 %v630_v34, %v629_v26  ;;  %v612_v37 = vsel %vm548_vm14, %v460_v23, %v580_v29  ;;  %vm564_vm15 = vcmp.ge.f32.partialorder %v524_v30, 0.0 }
 0x11f   : > { %v980_v38 = vpack.c.bf16 %v612_v37, %v611_v31  ;;  %v596_v39 = vmul.f32 0.2, %v524_v30  ;;  %v627_v40 = vsel %vm563_vm13, %v521_v19, %v595_v32 }
 0x120   : > { %1033 = vst [vmem:[%s1268_s13 + $0x38] sm:$0xff] %v985_v35   ;;  %1041 = vst [vmem:[%s1268_s13 + $0x78] sm:$0xff] %v1025_v36  }
 0x121   : > { %1032 = vst [vmem:[%s1268_s13 + $0x30] sm:$0xff] %v980_v38   ;;  %v628_v41 = vsel %vm564_vm15, %v524_v30, %v596_v39 }
 0x122   : > { %v1020_v42 = vpack.c.bf16 %v628_v41, %v627_v40 }
 0x124   : > { %1040 = vst [vmem:[%s1268_s13 + $0x70] sm:$0xff] %v1020_v42  }
 0x125 PF: > { %s13_s12 = sadd.s32 1, %s1168_s12  }
 0x126   : > { %p10_p4 = scmp.ge.s32.totalorder %s13_s12, 10  }
 0x128   :  { %12 = sbr.rel (!%p10_p4) target bundleno = 1 (0x1), region = 62 }

// kernel: discriminator_forward.9
= control target key start
LH: loop header
LB: loop body
LE: loop exit
PB: predicated region body
PF: predicated region fallthrough
CT: control target
= control target key end

     0   :  { %s1187_s15 = smov 0   ;;  %s1525_s0 = inlined_call_operand.vmem [shape: bf16[512,128], index: 0, kind: input, shape index: {}]   ;;  %s1526_s1 = inlined_call_operand.vmem [shape: bf16[128,128], index: 1, kind: input, shape index: {}]   ;;  %s1527_s2 = inlined_call_operand.vmem [shape: f32[1,128], index: 2, kind: input, shape index: {}]   ;;  %s1528_s3 = inlined_call_operand.vmem [shape: f32[512,128], index: 3, kind: output, shape index: {0}]   ;;  %s1529_s4 = inlined_call_operand.vmem [shape: f32[2,2,128], index: 4, kind: output, shape index: {1}]  }
   0x1 LB: > { %s1193_s16 = sadd.s32 4294967295, %s1160_s15   ;;  %p1000_p0 = scmp.ge.s32.totalorder %s1160_s15, 1  ;;  %s1160_s15 = sphi %s1187_s15, %s15_s15  }
   0x2   : > { %p166_p1 = scmp.lt.s32.totalorder %s1160_s15, 3 }
   0x4   : > { %p167_p2 = pnand %p1000_p0, %p166_p1 }
   0x5   : > { %v1130_v0 = vld [vmem:[%s1526_s1] sm:$0xff] (!%p167_p2)   ;;  %s1001_s19 = sshll.u32 (!%p167_p2), %s1193_s16, 5  ;;  %v1131_v1 = vld [vmem:[%s1526_s1 + $0x8] sm:$0xff] (!%p167_p2)   ;;  %v1132_v2 = vld [vmem:[%s1526_s1 + $0x10] sm:$0xff] (!%p167_p2)   ;;  %v574_v24 = vlaneseq (!%p167_p2)  ;;  %s1031_s12 = sshll.u32 (!%p167_p2), %s1193_s16, 8 }
   0x6   : > { %170 = sbr.rel (%p167_p2) target bundleno = 334 (0x14e), region = 32  ;;  %p197_p3 = scmp.lt.s32.totalorder (!%p167_p2), %s1001_s19, 63  ;;  %1058 = vmatprep.subr.bf16.mxu0 (!%p167_p2), %v1130_v0  ;;  %1106 = vmatprep.subr.bf16.mxu1 (!%p167_p2), %v1130_v0  ;;  %v1133_v3 = vld [vmem:[%s1526_s1 + $0x18] sm:$0xff] (!%p167_p2)   ;;  %v1134_v5 = vld [vmem:[%s1526_s1 + $0x20] sm:$0xff] (!%p167_p2)   ;;  %v1135_v6 = vld [vmem:[%s1526_s1 + $0x28] sm:$0xff] (!%p167_p2)   ;;  %v1249_v26 = vstv (!%p167_p2), %s1031_s12 }
   0x7   : > { %1059 = vmatpush3.bf16.msra.mxu0 (!%p167_p2), %v1130_v0  ;;  %1114 = vmatpush3.bf16.msra.mxu1 (!%p167_p2), %v1130_v0  ;;  %v1136_v8 = vld [vmem:[%s1526_s1 + $0x30] sm:$0xff] (!%p167_p2)   ;;  %v1137_v9 = vld [vmem:[%s1526_s1 + $0x38] sm:$0xff] (!%p167_p2)   ;;  %v1247_v25 = vshrl.u32 (!%p167_p2), %v574_v24, 7  ;;  %v1264_v35 = vld [vmem:[%s1527_s2] ss:$0 sm:$0xff] (!%p167_p2)  ;;  %p208_p4 = scmp.lt.s32.totalorder (!%p167_p2), %s1193_s16, 1 }
   0x8   : > { %1060 = vmatprep.subr.bf16.mxu0 (!%p167_p2), %v1131_v1  ;;  %1107 = vmatprep.subr.bf16.mxu1 (!%p167_p2), %v1131_v1 }
   0x9   : > { %v577_v27 = vadd.s32 (!%p167_p2), 16, %v1247_v25  ;;  %v608_v28 = vadd.s32 (!%p167_p2), %v1249_v26, %v1247_v25  ;;  %v578_v29 = vadd.s32 (!%p167_p2), 24, %v1247_v25  ;;  %v576_v30 = vadd.s32 (!%p167_p2), 8, %v1247_v25 }
   0xa   : > { %v581_v31 = vadd.s32 (!%p167_p2), 48, %v1247_v25  ;;  %v579_v32 = vadd.s32 (!%p167_p2), 32, %v1247_v25  ;;  %v582_v33 = vadd.s32 (!%p167_p2), 56, %v1247_v25  ;;  %v580_v34 = vadd.s32 (!%p167_p2), 40, %v1247_v25 }
   0xb   : > { %1061 = vmatpush3.bf16.msra.mxu0 (!%p167_p2), %v1131_v1  ;;  %1115 = vmatpush3.bf16.msra.mxu1 (!%p167_p2), %v1131_v1  ;;  %v610_v36 = vadd.s32 (!%p167_p2), %v1249_v26, %v577_v27  ;;  %vm640_vm0 = vcmp.lt.s32.totalorder (!%p167_p2), %v608_v28, 512  ;;  %v611_v37 = vadd.s32 (!%p167_p2), %v1249_v26, %v578_v29  ;;  %v609_v38 = vadd.s32 (!%p167_p2), %v1249_v26, %v576_v30 }
   0xc   : > { %1062 = vmatprep.subr.bf16.mxu0 (!%p167_p2), %v1132_v2  ;;  %1108 = vmatprep.subr.bf16.mxu1 (!%p167_p2), %v1132_v2  ;;  %v1275_v40 = vadd.s32 (!%p167_p2), %v1249_v26, %v581_v31  ;;  %v1278_v41 = vadd.s32 (!%p167_p2), %v1249_v26, %v579_v32  ;;  %v1281_v42 = vadd.s32 (!%p167_p2), %v1249_v26, %v582_v33  ;;  %v585_v47 = vadd.s32 (!%p167_p2), 80, %v1247_v25 }
   0xd   : > { %s1531_s19 = smov (!%p197_p3, %s1001_s19), 63  ;;  %v1284_v43 = vadd.s32 %v1249_v26, %v580_v34  ;;  %v583_v48 = vadd.s32 64, %v1247_v25  ;;  %vm642_vm1 = vcmp.lt.s32.totalorder %v610_v36, 512  ;;  %v586_v53 = vadd.s32 88, %v1247_v25  ;;  %s1533_s16 = smov (!%p208_p4, %s1193_s16), 1 }
   0xe   : > { %s1002_s24 = sshll.u32 %s1531_s19, 2  ;;  %s1004_s13 = sshll.u32 %s1531_s19, 3  ;;  %vm643_vm2 = vcmp.lt.s32.totalorder %v611_v37, 512  ;;  %vm641_vm3 = vcmp.lt.s32.totalorder %v609_v38, 512  ;;  %vm646_vm4 = vcmp.lt.s32.totalorder %v1275_v40, 512  ;;  %vm644_vm5 = vcmp.lt.s32.totalorder %v1278_v41, 512 }
   0xf   : > { %s1213_s27 = scalar_lea.vmem %s1525_s0, %s1002_s24  ;;  %1063 = vmatpush3.bf16.msra.mxu0 %v1132_v2  ;;  %1116 = vmatpush3.bf16.msra.mxu1 %v1132_v2  ;;  %s1272_s21 = scalar_lea.vmem %s1528_s3, %s1004_s13  ;;  %vm647_vm6 = vcmp.lt.s32.totalorder %v1281_v42, 512  ;;  %vm645_vm7 = vcmp.lt.s32.totalorder %v1284_v43, 512  ;;  %v1315_v62 = vadd.s32 %v1249_v26, %v585_v47  ;;  %v1318_v63 = vadd.s32 %v1249_v26, %v583_v48 }
  0x10   : > { %v1138_v4 = vld [vmem:[%s1213_s27] sm:$0xff]   ;;  %1064 = vmatprep.subr.bf16.mxu0 %v1133_v3  ;;  %1109 = vmatprep.subr.bf16.mxu1 %v1133_v3  ;;  %v1139_v10 = vld [vmem:[%s1213_s27 + $0x8] sm:$0xff]   ;;  %v1140_v12 = vld [vmem:[%s1213_s27 + $0x10] sm:$0xff]   ;;  %v1326_v2 = vadd.s32 %v1249_v26, %v586_v53  ;;  %s1005_s19 = sshll.u32 %s1533_s16, 1 }
  0x11   : > { %1074 = vmatprep.mubr.bf16.mxu0 %v1138_v4  ;;  %v1146_v7 = vld [vmem:[%s1213_s27 + $0x40] sm:$0xff]   ;;  %v1147_v11 = vld [vmem:[%s1213_s27 + $0x48] sm:$0xff]   ;;  %v1148_v13 = vld [vmem:[%s1213_s27 + $0x50] sm:$0xff]   ;;  %vm650_vm8 = vcmp.lt.s32.totalorder %v1315_v62, 512  ;;  %vm648_vm9 = vcmp.lt.s32.totalorder %v1318_v63, 512  ;;  %s211_s24 = scalar_lea.vmem %s1529_s4, %s1005_s19 }
  0x12   : > { %1090 = vmatprep.mubr.bf16.mxu1 %v1146_v7  ;;  %v1141_v14 = vld [vmem:[%s1213_s27 + $0x18] sm:$0xff]   ;;  %v1142_v16 = vld [vmem:[%s1213_s27 + $0x20] sm:$0xff]   ;;  %v1143_v18 = vld [vmem:[%s1213_s27 + $0x28] sm:$0xff]   ;;  %vm651_vm10 = vcmp.lt.s32.totalorder %v1326_v2, 512 }
  0x13   : > { %1065 = vmatpush3.bf16.msra.mxu0 %v1133_v3  ;;  %1117 = vmatpush3.bf16.msra.mxu1 %v1133_v3  ;;  %v1149_v15 = vld [vmem:[%s1213_s27 + $0x58] sm:$0xff]   ;;  %v1150_v17 = vld [vmem:[%s1213_s27 + $0x60] sm:$0xff]   ;;  %v1151_v19 = vld [vmem:[%s1213_s27 + $0x68] sm:$0xff]   ;;  %v584_v3 = vadd.s32 72, %v1247_v25 }
  0x14   : > { %1066 = vmatprep.subr.bf16.mxu0 %v1134_v5  ;;  %1110 = vmatprep.subr.bf16.mxu1 %v1134_v5  ;;  %v1144_v20 = vld [vmem:[%s1213_s27 + $0x30] sm:$0xff]   ;;  %v1145_v22 = vld [vmem:[%s1213_s27 + $0x38] sm:$0xff]  }
  0x15   : > { %v1152_v21 = vld [vmem:[%s1213_s27 + $0x70] sm:$0xff]   ;;  %v1153_v23 = vld [vmem:[%s1213_s27 + $0x78] sm:$0xff]   ;;  %v617_v37 = vadd.s32 %v1249_v26, %v584_v3 }
  0x17   : > { %1067 = vmatpush3.bf16.msra.mxu0 %v1134_v5  ;;  %1118 = vmatpush3.bf16.msra.mxu1 %v1134_v5  ;;  %vm649_vm11 = vcmp.lt.s32.totalorder %v617_v37, 512 }
  0x18   : > { %1068 = vmatprep.subr.bf16.mxu0 %v1135_v6  ;;  %1111 = vmatprep.subr.bf16.mxu1 %v1135_v6 }
  0x1b   : > { %1069 = vmatpush3.bf16.msra.mxu0 %v1135_v6  ;;  %1119 = vmatpush3.bf16.msra.mxu1 %v1135_v6 }
  0x1c   : > { %1070 = vmatprep.subr.bf16.mxu0 %v1136_v8  ;;  %1112 = vmatprep.subr.bf16.mxu1 %v1136_v8 }
  0x1f   : > { %1071 = vmatpush3.bf16.msra.mxu0 %v1136_v8  ;;  %1120 = vmatpush3.bf16.msra.mxu1 %v1136_v8 }
  0x20   : > { %1072 = vmatprep.subr.bf16.mxu0 %v1137_v9  ;;  %1113 = vmatprep.subr.bf16.mxu1 %v1137_v9 }
  0x23   : > { %1073 = vmatpush3.bf16.msra.mxu0 %v1137_v9  ;;  %1121 = vmatpush3.bf16.msra.mxu1 %v1137_v9 }
  0x26   : > { %1075 = vmatmul.mubr.bf16.vlgmr.msra.gmra.mrb[0].mxu0 %v1139_v10  ;;  %1091 = vmatmul.mubr.bf16.vlgmr.msra.gmra.mrb[0].mxu1 %v1147_v11  ;;  %v589_v10 = vadd.s32 112, %v1247_v25  ;;  %v587_v11 = vadd.s32 96, %v1247_v25 }
  0x27   : > { %1078 = vmatprep.mubr.bf16.mxu0 %v1140_v12  ;;  %1094 = vmatprep.mubr.bf16.mxu1 %v1148_v13  ;;  %v590_v12 = vadd.s32 120, %v1247_v25 }
  0x28   : > { %v1370_v47 = vadd.s32 %v1249_v26, %v587_v11 }
  0x29   : > { %v1373_v48 = vadd.s32 %v1249_v26, %v590_v12 }
  0x2a   : > { %vm652_vm13 = vcmp.lt.s32.totalorder %v1370_v47, 512 }
  0x2b   : > { %vm655_vm14 = vcmp.lt.s32.totalorder %v1373_v48, 512  ;;  %v598_v48 = vadd.s32 184, %v1247_v25 }
  0x2e   : > { %1079 = vmatmul.mubr.bf16.gmra.mrb[4].mxu0 %v1141_v14  ;;  %1095 = vmatmul.mubr.bf16.gmra.mrb[4].mxu1 %v1149_v15 }
  0x2f   : > { %1082 = vmatprep.mubr.bf16.mxu0 %v1142_v16  ;;  %1098 = vmatprep.mubr.bf16.mxu1 %v1150_v17 }
  0x36   : > { %1083 = vmatmul.mubr.bf16.gmra.mrb[8].mxu0 %v1143_v18  ;;  %1099 = vmatmul.mubr.bf16.gmra.mrb[8].mxu1 %v1151_v19 }
  0x37   : > { %1086 = vmatprep.mubr.bf16.mxu0 %v1144_v20  ;;  %1102 = vmatprep.mubr.bf16.mxu1 %v1152_v21 }
  0x3e   : > { %1087 = vmatmul.mubr.bf16.gmra.mrb[12].mxu0 %v1145_v22  ;;  %1103 = vmatmul.mubr.bf16.gmra.mrb[12].mxu1 %v1153_v23  ;;  %v588_v22 = vadd.s32 104, %v1247_v25 }
  0xf9   : > { %v1076_v39 = vpop.f32.mrb[0].mxu0  ;;  %v1092_v44 = vpop.f32.mrb[0].mxu1 }
  0xfa   : > { %v455_v45 = vadd.f32 %v1076_v39, %v1264_v35  ;;  %v446_v46 = vpop.f32.mrb[1].mxu0  ;;  %v1290_v49 = vadd.f32 %v1092_v44, %v1264_v35  ;;  %v510_v50 = vpop.f32.mrb[1].mxu1 }
  0xfb   : > { %v447_v51 = vadd.f32 %v1264_v35, %v446_v46  ;;  %v1077_v52 = vpop.f32.mrb[2].mxu0  ;;  %v1295_v54 = vadd.f32 %v1264_v35, %v510_v50  ;;  %v1093_v55 = vpop.f32.mrb[2].mxu1  ;;  %v1367_v46 = vadd.s32 %v1249_v26, %v589_v10 }
  0xfc   : > { %879 = vst [vmem:[%s1272_s21 + $0x10] sm:$0xff] %v455_v45  ;;  %v458_v56 = vadd.f32 %v1077_v52, %v1264_v35  ;;  %v449_v57 = vpop.f32.mrb[3].mxu0  ;;  %895 = vst [vmem:[%s1272_s21 + $0x90] sm:$0xff] %v1290_v49  ;;  %v1302_v58 = vadd.f32 %v1093_v55, %v1264_v35  ;;  %v513_v59 = vpop.f32.mrb[3].mxu1  ;;  %v738_v0 = vsel %vm642_vm1, %v455_v45, 0.0  ;;  %v1376_v52 = vadd.s32 %v1249_v26, %v588_v22 }
  0xfd   : > { %v736_v60 = vsel %vm640_vm0, %v447_v51, 0.0  ;;  %877 = vst [vmem:[%s1272_s21] sm:$0xff] %v447_v51  ;;  %v450_v61 = vadd.f32 %v1264_v35, %v449_v57  ;;  %893 = vst [vmem:[%s1272_s21 + $0x80] sm:$0xff] %v1295_v54  ;;  %v1330_v7 = vadd.f32 %v1264_v35, %v513_v59  ;;  %v807_v14 = vmul.f32 %v738_v0, %v738_v0 }
  0xfe   : > { %880 = vst [vmem:[%s1272_s21 + $0x18] sm:$0xff] %v458_v56  ;;  %896 = vst [vmem:[%s1272_s21 + $0x98] sm:$0xff] %v1302_v58  ;;  %v805_v4 = vmul.f32 %v736_v60, %v736_v60  ;;  %v739_v8 = vsel %vm643_vm2, %v458_v56, 0.0  ;;  %vm654_vm12 = vcmp.lt.s32.totalorder %v1367_v46, 512  ;;  %vm653_vm15 = vcmp.lt.s32.totalorder %v1376_v52, 512 }
  0xff   : > { %v737_v1 = vsel %vm641_vm3, %v450_v61, 0.0  ;;  %878 = vst [vmem:[%s1272_s21 + $0x8] sm:$0xff] %v450_v61  ;;  %894 = vst [vmem:[%s1272_s21 + $0x88] sm:$0xff] %v1330_v7  ;;  %v808_v28 = vmul.f32 %v739_v8, %v739_v8  ;;  %v593_v22 = vadd.s32 144, %v1247_v25 }
 0x100   : > { %v768_v5 = vadd.f32 %v737_v1, %v736_v60  ;;  %v806_v6 = vmul.f32 %v737_v1, %v737_v1 }
 0x101   : > { %v1080_v9 = vpop.f32.mrb[4].mxu0  ;;  %v1096_v13 = vpop.f32.mrb[4].mxu1 }
 0x102   : > { %v769_v15 = vadd.f32 %v768_v5, %v738_v0  ;;  %v837_v16 = vadd.f32 %v806_v6, %v805_v4  ;;  %v471_v17 = vadd.f32 %v1080_v9, %v1264_v35  ;;  %v462_v18 = vpop.f32.mrb[5].mxu0  ;;  %v526_v19 = vpop.f32.mrb[5].mxu1  ;;  %v1342_v23 = vadd.f32 %v1096_v13, %v1264_v35 }
 0x103   : > { %v463_v20 = vadd.f32 %v1264_v35, %v462_v18  ;;  %v1081_v21 = vpop.f32.mrb[6].mxu0  ;;  %v1345_v24 = vadd.f32 %v1264_v35, %v526_v19  ;;  %v1097_v27 = vpop.f32.mrb[6].mxu1 }
 0x104   : > { %v838_v29 = vadd.f32 %v837_v16, %v807_v14  ;;  %883 = vst [vmem:[%s1272_s21 + $0x30] sm:$0xff] %v471_v17  ;;  %v770_v30 = vadd.f32 %v769_v15, %v739_v8  ;;  %v474_v31 = vadd.f32 %v1081_v21, %v1264_v35  ;;  %v465_v32 = vpop.f32.mrb[7].mxu0  ;;  %v529_v33 = vpop.f32.mrb[7].mxu1  ;;  %899 = vst [vmem:[%s1272_s21 + $0xb0] sm:$0xff] %v1342_v23  ;;  %v742_v38 = vsel %vm646_vm4, %v471_v17, 0.0 }
 0x105   : > { %v740_v34 = vsel %vm644_vm5, %v463_v20, 0.0  ;;  %881 = vst [vmem:[%s1272_s21 + $0x20] sm:$0xff] %v463_v20  ;;  %v466_v36 = vadd.f32 %v1264_v35, %v465_v32  ;;  %897 = vst [vmem:[%s1272_s21 + $0xa0] sm:$0xff] %v1345_v24  ;;  %v811_v53 = vmul.f32 %v742_v38, %v742_v38  ;;  %v1381_v56 = vadd.f32 %v1097_v27, %v1264_v35 }
 0x106   : > { %v771_v39 = vadd.f32 %v770_v30, %v740_v34  ;;  %v809_v44 = vmul.f32 %v740_v34, %v740_v34  ;;  %v839_v45 = vadd.f32 %v838_v29, %v808_v28  ;;  %884 = vst [vmem:[%s1272_s21 + $0x38] sm:$0xff] %v474_v31  ;;  %v743_v43 = vsel %vm647_vm6, %v474_v31, 0.0 }
 0x107   : > { %v741_v41 = vsel %vm645_vm7, %v466_v36, 0.0  ;;  %882 = vst [vmem:[%s1272_s21 + $0x28] sm:$0xff] %v466_v36  ;;  %v1384_v57 = vadd.f32 %v1264_v35, %v529_v33  ;;  %900 = vst [vmem:[%s1272_s21 + $0xb8] sm:$0xff] %v1381_v56  ;;  %v812_v9 = vmul.f32 %v743_v43, %v743_v43  ;;  %v591_v17 = vadd.s32 128, %v1247_v25 }
 0x108   : > { %v840_v50 = vadd.f32 %v839_v45, %v809_v44  ;;  %v772_v40 = vadd.f32 %v771_v39, %v741_v41  ;;  %v810_v51 = vmul.f32 %v741_v41, %v741_v41  ;;  %v592_v27 = vadd.s32 136, %v1247_v25 }
 0x109   : > { %v1084_v55 = vpop.f32.mrb[8].mxu0  ;;  %v1100_v59 = vpop.f32.mrb[8].mxu1  ;;  %898 = vst [vmem:[%s1272_s21 + $0xa8] sm:$0xff] %v1384_v57  ;;  %v594_v31 = vadd.s32 152, %v1247_v25  ;;  %v624_v62 = vadd.s32 %v1249_v26, %v591_v17 }
 0x10a   : > { %v773_v60 = vadd.f32 %v772_v40, %v742_v38  ;;  %v841_v61 = vadd.f32 %v840_v50, %v810_v51  ;;  %v487_v0 = vadd.f32 %v1084_v55, %v1264_v35  ;;  %v478_v1 = vpop.f32.mrb[9].mxu0  ;;  %v1388_v3 = vadd.f32 %v1100_v59, %v1264_v35  ;;  %v542_v42 = vpop.f32.mrb[9].mxu1 }
 0x10b   : > { %v479_v4 = vadd.f32 %v1264_v35, %v478_v1  ;;  %v1085_v5 = vpop.f32.mrb[10].mxu0  ;;  %v1397_v6 = vadd.f32 %v1264_v35, %v542_v42  ;;  %v1101_v8 = vpop.f32.mrb[10].mxu1  ;;  %v626_v51 = vadd.s32 %v1249_v26, %v593_v22  ;;  %vm656_vm0 = vcmp.lt.s32.totalorder %v624_v62, 512 }
 0x10c   : > { %v842_v10 = vadd.f32 %v841_v61, %v811_v53  ;;  %887 = vst [vmem:[%s1272_s21 + $0x50] sm:$0xff] %v487_v0  ;;  %v774_v11 = vadd.f32 %v773_v60, %v743_v43  ;;  %v490_v12 = vadd.f32 %v1085_v5, %v1264_v35  ;;  %v481_v13 = vpop.f32.mrb[11].mxu0  ;;  %903 = vst [vmem:[%s1272_s21 + $0xd0] sm:$0xff] %v1388_v3  ;;  %v545_v14 = vpop.f32.mrb[11].mxu1  ;;  %v746_v63 = vsel %vm650_vm8, %v487_v0, 0.0 }
 0x10d   : > { %v744_v15 = vsel %vm648_vm9, %v479_v4, 0.0  ;;  %885 = vst [vmem:[%s1272_s21 + $0x40] sm:$0xff] %v479_v4  ;;  %v482_v16 = vadd.f32 %v1264_v35, %v481_v13  ;;  %901 = vst [vmem:[%s1272_s21 + $0xc0] sm:$0xff] %v1397_v6  ;;  %v1426_v34 = vadd.f32 %v1101_v8, %v1264_v35  ;;  %v1429_v36 = vadd.f32 %v1264_v35, %v545_v14 }
 0x10e   : > { %v775_v18 = vadd.f32 %v774_v11, %v744_v15  ;;  %v813_v19 = vmul.f32 %v744_v15, %v744_v15  ;;  %v843_v20 = vadd.f32 %v842_v10, %v812_v9  ;;  %888 = vst [vmem:[%s1272_s21 + $0x58] sm:$0xff] %v490_v12  ;;  %v747_v32 = vsel %vm651_vm10, %v490_v12, 0.0 }
 0x10f   : > { %v745_v21 = vsel %vm649_vm11, %v482_v16, 0.0  ;;  %886 = vst [vmem:[%s1272_s21 + $0x48] sm:$0xff] %v482_v16  ;;  %v815_v38 = vmul.f32 %v746_v63, %v746_v63  ;;  %v625_v53 = vadd.s32 %v1249_v26, %v592_v27  ;;  %904 = vst [vmem:[%s1272_s21 + $0xd8] sm:$0xff] %v1426_v34  ;;  %v816_v59 = vmul.f32 %v747_v32, %v747_v32 }
 0x110   : > { %v844_v28 = vadd.f32 %v843_v20, %v813_v19  ;;  %v776_v29 = vadd.f32 %v775_v18, %v745_v21  ;;  %v814_v30 = vmul.f32 %v745_v21, %v745_v21  ;;  %902 = vst [vmem:[%s1272_s21 + $0xc8] sm:$0xff] %v1429_v36  ;;  %v627_v8 = vadd.s32 %v1249_v26, %v594_v31 }
 0x111   : > { %v1088_v33 = vpop.f32.mrb[12].mxu0  ;;  %v1104_v37 = vpop.f32.mrb[12].mxu1  ;;  %v595_v12 = vadd.s32 160, %v1247_v25  ;;  %vm657_vm1 = vcmp.lt.s32.totalorder %v625_v53, 512  ;;  %v596_v14 = vadd.s32 168, %v1247_v25  ;;  %v752_v18 = vsel %vm656_vm0, %v1295_v54, 0.0 }
 0x112   : > { %v777_v39 = vadd.f32 %v776_v29, %v746_v63  ;;  %v845_v44 = vadd.f32 %v844_v28, %v814_v30  ;;  %v503_v45 = vadd.f32 %v1088_v33, %v1264_v35  ;;  %v494_v2 = vpop.f32.mrb[13].mxu0  ;;  %v558_v41 = vpop.f32.mrb[13].mxu1  ;;  %v1440_v43 = vadd.f32 %v1104_v37, %v1264_v35 }
 0x113   : > { %v495_v50 = vadd.f32 %v1264_v35, %v494_v2  ;;  %v1089_v40 = vpop.f32.mrb[14].mxu0  ;;  %v1105_v55 = vpop.f32.mrb[14].mxu1  ;;  %v1464_v19 = vadd.f32 %v1264_v35, %v558_v41  ;;  %v628_v27 = vadd.s32 %v1249_v26, %v595_v12  ;;  %vm658_vm2 = vcmp.lt.s32.totalorder %v626_v51, 512 }
 0x114   : > { %v846_v60 = vadd.f32 %v845_v44, %v815_v38  ;;  %891 = vst [vmem:[%s1272_s21 + $0x70] sm:$0xff] %v503_v45  ;;  %v778_v61 = vadd.f32 %v777_v39, %v747_v32  ;;  %v506_v0 = vadd.f32 %v1089_v40, %v1264_v35  ;;  %v497_v1 = vpop.f32.mrb[15].mxu0  ;;  %v561_v42 = vpop.f32.mrb[15].mxu1  ;;  %907 = vst [vmem:[%s1272_s21 + $0xf0] sm:$0xff] %v1440_v43  ;;  %v750_v13 = vsel %vm654_vm12, %v503_v45, 0.0 }
 0x115   : > { %v748_v4 = vsel %vm652_vm13, %v495_v50, 0.0  ;;  %889 = vst [vmem:[%s1272_s21 + $0x60] sm:$0xff] %v495_v50  ;;  %v498_v5 = vadd.f32 %v1264_v35, %v497_v1  ;;  %v1467_v52 = vadd.f32 %v1105_v55, %v1264_v35  ;;  %v1470_v20 = vadd.f32 %v1264_v35, %v561_v42  ;;  %905 = vst [vmem:[%s1272_s21 + $0xe0] sm:$0xff] %v1464_v19 }
 0x116   : > { %v779_v9 = vadd.f32 %v778_v61, %v748_v4  ;;  %v817_v10 = vmul.f32 %v748_v4, %v748_v4  ;;  %v847_v11 = vadd.f32 %v846_v60, %v816_v59  ;;  %892 = vst [vmem:[%s1272_s21 + $0x78] sm:$0xff] %v506_v0  ;;  %v751_v46 = vsel %vm655_vm14, %v506_v0, 0.0 }
 0x117   : > { %v749_v47 = vsel %vm653_vm15, %v498_v5, 0.0  ;;  %890 = vst [vmem:[%s1272_s21 + $0x68] sm:$0xff] %v498_v5  ;;  %v819_v63 = vmul.f32 %v750_v13, %v750_v13  ;;  %v597_v54 = vadd.s32 176, %v1247_v25  ;;  %908 = vst [vmem:[%s1272_s21 + $0xf8] sm:$0xff] %v1467_v52  ;;  %v820_v28 = vmul.f32 %v751_v46, %v751_v46 }
 0x118   : > { %v848_v15 = vadd.f32 %v847_v11, %v817_v10  ;;  %v780_v16 = vadd.f32 %v779_v9, %v749_v47  ;;  %v818_v17 = vmul.f32 %v749_v47, %v749_v47  ;;  %906 = vst [vmem:[%s1272_s21 + $0xe8] sm:$0xff] %v1470_v20  ;;  %v821_v30 = vmul.f32 %v752_v18, %v752_v18 }
 0x119   : > { %vm659_vm3 = vcmp.lt.s32.totalorder %v627_v8, 512  ;;  %v753_v31 = vsel %vm657_vm1, %v1330_v7, 0.0  ;;  %v629_v32 = vadd.s32 %v1249_v26, %v596_v14  ;;  %vm660_vm4 = vcmp.lt.s32.totalorder %v628_v27, 512 }
 0x11a   : > { %v781_v21 = vadd.f32 %v780_v16, %v750_v13  ;;  %v849_v22 = vadd.f32 %v848_v15, %v818_v17  ;;  %v599_v37 = vadd.s32 192, %v1247_v25  ;;  %v754_v38 = vsel %vm658_vm2, %v1290_v49, 0.0 }
 0x11b   : > { %v630_v39 = vadd.s32 %v1249_v26, %v597_v54  ;;  %v822_v2 = vmul.f32 %v753_v31, %v753_v31  ;;  %v631_v41 = vadd.s32 %v1249_v26, %v598_v48  ;;  %v755_v50 = vsel %vm659_vm3, %v1302_v58, 0.0 }
 0x11c   : > { %v850_v29 = vadd.f32 %v849_v22, %v819_v63  ;;  %v782_v35 = vadd.f32 %v781_v21, %v751_v46  ;;  %v756_v7 = vsel %vm660_vm4, %v1345_v24, 0.0  ;;  %vm661_vm5 = vcmp.lt.s32.totalorder %v629_v32, 512 }
 0x11d   : > { %v600_v40 = vadd.s32 200, %v1247_v25  ;;  %v823_v53 = vmul.f32 %v754_v38, %v754_v38  ;;  %v632_v51 = vadd.s32 %v1249_v26, %v599_v37  ;;  %vm662_vm6 = vcmp.lt.s32.totalorder %v630_v39, 512 }
 0x11e   : > { %v783_v33 = vadd.f32 %v782_v35, %v752_v18  ;;  %v851_v62 = vadd.f32 %v850_v29, %v820_v28  ;;  %v601_v49 = vadd.s32 208, %v1247_v25  ;;  %v602_v60 = vadd.s32 216, %v1247_v25 }
 0x11f   : > { %v824_v61 = vmul.f32 %v755_v50, %v755_v50  ;;  %v825_v42 = vmul.f32 %v756_v7, %v756_v7  ;;  %vm663_vm7 = vcmp.lt.s32.totalorder %v631_v41, 512  ;;  %v757_v58 = vsel %vm661_vm5, %v1384_v57, 0.0 }
 0x120   : > { %v852_v44 = vadd.f32 %v851_v62, %v821_v30  ;;  %v784_v45 = vadd.f32 %v783_v33, %v753_v31  ;;  %v633_v24 = vadd.s32 %v1249_v26, %v600_v40  ;;  %vm664_vm8 = vcmp.lt.s32.totalorder %v632_v51, 512 }
 0x121   : > { %v603_v8 = vadd.s32 224, %v1247_v25  ;;  %v758_v9 = vsel %vm662_vm6, %v1342_v23, 0.0  ;;  %v634_v10 = vadd.s32 %v1249_v26, %v601_v49  ;;  %v826_v13 = vmul.f32 %v757_v58, %v757_v58 }
 0x122   : > { %v785_v55 = vadd.f32 %v784_v45, %v754_v38  ;;  %v853_v59 = vadd.f32 %v852_v44, %v822_v2  ;;  %v635_v47 = vadd.s32 %v1249_v26, %v602_v60  ;;  %v759_v14 = vsel %vm663_vm7, %v1381_v56, 0.0 }
 0x123   : > { %v760_v57 = vsel %vm664_vm8, %v1397_v6, 0.0  ;;  %vm665_vm9 = vcmp.lt.s32.totalorder %v633_v24, 512  ;;  %v604_v15 = vadd.s32 232, %v1247_v25  ;;  %v827_v16 = vmul.f32 %v758_v9, %v758_v9 }
 0x124   : > { %v854_v0 = vadd.f32 %v853_v59, %v823_v53  ;;  %v786_v1 = vadd.f32 %v785_v55, %v755_v50  ;;  %v636_v46 = vadd.s32 %v1249_v26, %v603_v8  ;;  %vm666_vm10 = vcmp.lt.s32.totalorder %v634_v10, 512 }
 0x125   : > { %v605_v23 = vadd.s32 240, %v1247_v25  ;;  %v828_v63 = vmul.f32 %v759_v14, %v759_v14  ;;  %v829_v27 = vmul.f32 %v760_v57, %v760_v57  ;;  %vm667_vm11 = vcmp.lt.s32.totalorder %v635_v47, 512 }
 0x126   : > { %v787_v4 = vadd.f32 %v786_v1, %v756_v7  ;;  %v855_v5 = vadd.f32 %v854_v0, %v824_v61  ;;  %v761_v56 = vsel %vm665_vm9, %v1429_v36, 0.0  ;;  %v606_v6 = vadd.s32 248, %v1247_v25 }
 0x127   : > { %vm668_vm12 = vcmp.lt.s32.totalorder %v636_v46, 512  ;;  %v637_v28 = vadd.s32 %v1249_v26, %v604_v15  ;;  %v762_v29 = vsel %vm666_vm10, %v1388_v3, 0.0  ;;  %v638_v35 = vadd.s32 %v1249_v26, %v605_v23 }
 0x128   : > { %v856_v11 = vadd.f32 %v855_v5, %v825_v42  ;;  %v788_v12 = vadd.f32 %v787_v4, %v757_v58  ;;  %v830_v32 = vmul.f32 %v761_v56, %v761_v56  ;;  %v763_v33 = vsel %vm667_vm11, %v1426_v34, 0.0 }
 0x129   : > { %v764_v62 = vsel %vm668_vm12, %v1464_v19, 0.0  ;;  %v639_v36 = vadd.s32 %v1249_v26, %v606_v6  ;;  %v831_v37 = vmul.f32 %v762_v29, %v762_v29  ;;  %vm669_vm13 = vcmp.lt.s32.totalorder %v637_v28, 512 }
 0x12a   : > { %v789_v17 = vadd.f32 %v788_v12, %v758_v9  ;;  %v857_v18 = vadd.f32 %v856_v11, %v826_v13  ;;  %vm670_vm14 = vcmp.lt.s32.totalorder %v638_v35, 512  ;;  %v832_v39 = vmul.f32 %v763_v33, %v763_v33 }
 0x12b   : > { %v833_v3 = vmul.f32 %v764_v62, %v764_v62  ;;  %v765_v2 = vsel %vm669_vm13, %v1470_v20, 0.0  ;;  %vm671_vm15 = vcmp.lt.s32.totalorder %v639_v36, 512  ;;  %v766_v34 = vsel %vm670_vm14, %v1440_v43, 0.0 }
 0x12c   : > { %v858_v21 = vadd.f32 %v857_v18, %v827_v16  ;;  %v790_v22 = vadd.f32 %v789_v17, %v759_v14  ;;  %v834_v26 = vmul.f32 %v765_v2, %v765_v2  ;;  %v767_v40 = vsel %vm671_vm15, %v1467_v52, 0.0 }
 0x12d   : > { %v835_v53 = vmul.f32 %v766_v34, %v766_v34  ;;  %v836_v51 = vmul.f32 %v767_v40, %v767_v40  ;;  %vm874_vm0 = vcmask 1040384  }
 0x12e   : > { %v791_v54 = vadd.f32 %v790_v22, %v760_v57  ;;  %v859_v48 = vadd.f32 %v858_v21, %v828_v63 }
 0x130   : > { %v860_v30 = vadd.f32 %v859_v48, %v829_v27  ;;  %v792_v31 = vadd.f32 %v791_v54, %v761_v56 }
 0x132   : > { %v793_v25 = vadd.f32 %v792_v31, %v762_v29  ;;  %v861_v38 = vadd.f32 %v860_v30, %v830_v32 }
 0x134   : > { %v862_v44 = vadd.f32 %v861_v38, %v831_v37  ;;  %v794_v45 = vadd.f32 %v793_v25, %v763_v33 }
 0x136   : > { %v795_v41 = vadd.f32 %v794_v45, %v764_v62  ;;  %v863_v50 = vadd.f32 %v862_v44, %v832_v39 }
 0x138   : > { %v864_v19 = vadd.f32 %v863_v50, %v833_v3  ;;  %v796_v7 = vadd.f32 %v795_v41, %v765_v2 }
 0x13a   : > { %v797_v55 = vadd.f32 %v796_v7, %v766_v34  ;;  %v865_v59 = vadd.f32 %v864_v19, %v834_v26 }
 0x13c   : > { %v798_v49 = vadd.f32 %v797_v55, %v767_v40  ;;  %v866_v60 = vadd.f32 %v865_v59, %v835_v53 }
 0x13e   : > { %v799_v61 = vrot.slane %v798_v49, 4  ;;  %v867_v20 = vadd.f32 %v866_v60, %v836_v51 }
 0x140   : > { %v800_v0 = vadd.f32 %v799_v61, %v798_v49  ;;  %v868_v1 = vrot.slane %v867_v20, 4 }
 0x142   : > { %v801_v42 = vrot.slane %v800_v0, 2  ;;  %v869_v58 = vadd.f32 %v868_v1, %v867_v20 }
 0x144   : > { %v802_v43 = vadd.f32 %v801_v42, %v800_v0  ;;  %v870_v24 = vrot.slane %v869_v58, 2 }
 0x146   : > { %v803_v4 = vrot.slane %v802_v43, 1  ;;  %v871_v5 = vadd.f32 %v870_v24, %v869_v58 }
 0x148   : > { %v872_v52 = vrot.slane %v871_v5, 1  ;;  %v804_v8 = vadd.f32 %v803_v4, %v802_v43 }
 0x14a   : > { %v873_v9 = vadd.f32 %v872_v52, %v871_v5 }
 0x14c   : > { %v875_v10 = vsel %vm874_vm0, %v804_v8, %v873_v9 }
 0x14d   : > { %876 = vst [vmem:[%s211_s24] sm:$0x3] %v875_v10 }
 0x14e PF: > { %s15_s15 = sadd.s32 1, %s1160_s15  }
 0x14f   : > { %p12_p5 = scmp.ge.s32.totalorder %s15_s15, 4  }
 0x151   :  { %14 = sbr.rel (!%p12_p5) target bundleno = 1 (0x1), region = 74 }

// kernel: discriminator_forward.10
= control target key start
LH: loop header
LB: loop body
LE: loop exit
PB: predicated region body
PF: predicated region fallthrough
CT: control target
= control target key end

     0   :  { %s804_s12 = smov 0   ;;  %s952_s0 = inlined_call_operand.vmem [shape: f32[512,128], index: 0, kind: input, shape index: {}]   ;;  %s953_s1 = inlined_call_operand.vmem [shape: f32[1,128], index: 1, kind: input, shape index: {}]   ;;  %s954_s2 = inlined_call_operand.vmem [shape: f32[1,128], index: 2, kind: input, shape index: {}]   ;;  %s955_s3 = inlined_call_operand.vmem [shape: bf16[512,128], index: 3, kind: output, shape index: {}]  }
   0x1 LB: > { %s596_s13 = sadd.s32 4294967295, %s782_s12   ;;  %p600_p0 = scmp.ge.s32.totalorder %s782_s12, 1  ;;  %s782_s12 = sphi %s804_s12, %s13_s12  }
   0x2   : > { %p138_p1 = scmp.lt.s32.totalorder %s782_s12, 3 }
   0x4   : > { %p139_p2 = pnand %p600_p0, %p138_p1 }
   0x5   : > { %s601_s14 = sshll.u32 (!%p139_p2), %s596_s13, 5  ;;  %v818_v0 = vld [vmem:[%s953_s1] ss:$0 sm:$0xff] (!%p139_p2) }
   0x6   : > { %142 = sbr.rel (%p139_p2) target bundleno = 67 (0x43), region = 32  ;;  %p163_p3 = scmp.lt.s32.totalorder (!%p139_p2), %s601_s14, 63  ;;  %v828_v1 = vld [vmem:[%s954_s2] ss:$0 sm:$0xff] (!%p139_p2) }
   0xd   : > { %s957_s14 = smov (!%p163_p3, %s601_s14), 63 }
   0xe   : > { %s602_s15 = sshll.u32 %s957_s14, 3  ;;  %s604_s23 = sshll.u32 %s957_s14, 2 }
   0xf   : > { %s823_s20 = scalar_lea.vmem %s952_s0, %s602_s15  ;;  %s856_s26 = scalar_lea.vmem %s955_s3, %s604_s23 }
  0x10   : > { %v174_v2 = vld [vmem:[%s823_s20] sm:$0xff]  ;;  %v175_v3 = vld [vmem:[%s823_s20 + $0x8] sm:$0xff]  ;;  %v176_v4 = vld [vmem:[%s823_s20 + $0x10] sm:$0xff] }
  0x11   : > { %v213_v5 = vsub.f32 %v174_v2, %v818_v0  ;;  %v214_v6 = vsub.f32 %v175_v3, %v818_v0  ;;  %v177_v7 = vld [vmem:[%s823_s20 + $0x18] sm:$0xff]  ;;  %v215_v8 = vsub.f32 %v176_v4, %v818_v0  ;;  %v178_v9 = vld [vmem:[%s823_s20 + $0x20] sm:$0xff]  ;;  %v179_v10 = vld [vmem:[%s823_s20 + $0x28] sm:$0xff] }
  0x12   : > { %v216_v11 = vsub.f32 %v177_v7, %v818_v0  ;;  %v217_v12 = vsub.f32 %v178_v9, %v818_v0  ;;  %v218_v13 = vsub.f32 %v179_v10, %v818_v0  ;;  %v180_v14 = vld [vmem:[%s823_s20 + $0x30] sm:$0xff]  ;;  %v181_v15 = vld [vmem:[%s823_s20 + $0x38] sm:$0xff]  ;;  %v182_v30 = vld [vmem:[%s823_s20 + $0x40] sm:$0xff] }
  0x13   : > { %v252_v16 = vmul.f32 %v828_v1, %v213_v5  ;;  %v253_v17 = vmul.f32 %v828_v1, %v214_v6  ;;  %v254_v18 = vmul.f32 %v828_v1, %v215_v8  ;;  %v219_v19 = vsub.f32 %v180_v14, %v818_v0  ;;  %v183_v31 = vld [vmem:[%s823_s20 + $0x48] sm:$0xff]  ;;  %v184_v32 = vld [vmem:[%s823_s20 + $0x50] sm:$0xff]  ;;  %v185_v44 = vld [vmem:[%s823_s20 + $0x58] sm:$0xff] }
  0x14   : > { %v255_v20 = vmul.f32 %v828_v1, %v216_v11  ;;  %v256_v21 = vmul.f32 %v828_v1, %v217_v12  ;;  %v257_v22 = vmul.f32 %v828_v1, %v218_v13  ;;  %v220_v23 = vsub.f32 %v181_v15, %v818_v0  ;;  %v186_v46 = vld [vmem:[%s823_s20 + $0x60] sm:$0xff]  ;;  %v187_v56 = vld [vmem:[%s823_s20 + $0x68] sm:$0xff]  ;;  %v188_v60 = vld [vmem:[%s823_s20 + $0x70] sm:$0xff] }
  0x15   : > { %vm284_vm0 = vcmp.ge.f32.partialorder %v252_v16, 0.0  ;;  %vm285_vm1 = vcmp.ge.f32.partialorder %v253_v17, 0.0  ;;  %v316_v24 = vmul.f32 0.2, %v252_v16  ;;  %v317_v25 = vmul.f32 0.2, %v253_v17 }
  0x16   : > { %vm286_vm2 = vcmp.ge.f32.partialorder %v254_v18, 0.0  ;;  %vm287_vm3 = vcmp.ge.f32.partialorder %v255_v20, 0.0  ;;  %v318_v26 = vmul.f32 0.2, %v254_v18  ;;  %v319_v27 = vmul.f32 0.2, %v255_v20 }
  0x17   : > { %v348_v28 = vsel %vm284_vm0, %v252_v16, %v316_v24  ;;  %v349_v29 = vsel %vm285_vm1, %v253_v17, %v317_v25  ;;  %vm288_vm4 = vcmp.ge.f32.partialorder %v256_v21, 0.0  ;;  %vm289_vm5 = vcmp.ge.f32.partialorder %v257_v22, 0.0  ;;  %v189_v6 = vld [vmem:[%s823_s20 + $0x78] sm:$0xff]  ;;  %v190_v10 = vld [vmem:[%s823_s20 + $0x80] sm:$0xff] }
  0x18   : > { %v676_v33 = vpack.c.bf16 %v349_v29, %v348_v28  ;;  %v350_v34 = vsel %vm286_vm2, %v254_v18, %v318_v26  ;;  %v351_v35 = vsel %vm287_vm3, %v255_v20, %v319_v27  ;;  %v320_v36 = vmul.f32 0.2, %v256_v21  ;;  %v191_v18 = vld [vmem:[%s823_s20 + $0x88] sm:$0xff]  ;;  %v193_v26 = vld [vmem:[%s823_s20 + $0x98] sm:$0xff] }
  0x19   : > { %v681_v37 = vpack.c.bf16 %v351_v35, %v350_v34  ;;  %v321_v38 = vmul.f32 0.2, %v257_v22  ;;  %v258_v39 = vmul.f32 %v828_v1, %v219_v19  ;;  %v259_v40 = vmul.f32 %v828_v1, %v220_v23  ;;  %v192_v19 = vld [vmem:[%s823_s20 + $0x90] sm:$0xff] }
  0x1a   : > { %677 = vst [vmem:[%s856_s26] sm:$0xff] %v676_v33   ;;  %v352_v41 = vsel %vm288_vm4, %v256_v21, %v320_v36  ;;  %v221_v42 = vsub.f32 %v182_v30, %v818_v0  ;;  %v222_v43 = vsub.f32 %v183_v31, %v818_v0  ;;  %v223_v45 = vsub.f32 %v184_v32, %v818_v0  ;;  %v194_v31 = vld [vmem:[%s823_s20 + $0xa0] sm:$0xff]  ;;  %v195_v32 = vld [vmem:[%s823_s20 + $0xa8] sm:$0xff] }
  0x1b   : > { %753 = vst [vmem:[%s856_s26 + $0x8] sm:$0xff] %v681_v37   ;;  %v353_v47 = vsel %vm289_vm5, %v257_v22, %v321_v38  ;;  %vm290_vm6 = vcmp.ge.f32.partialorder %v258_v39, 0.0  ;;  %vm291_vm7 = vcmp.ge.f32.partialorder %v259_v40, 0.0  ;;  %v322_v48 = vmul.f32 0.2, %v258_v39 }
  0x1c   : > { %v686_v49 = vpack.c.bf16 %v353_v47, %v352_v41  ;;  %v323_v50 = vmul.f32 0.2, %v259_v40  ;;  %v260_v51 = vmul.f32 %v828_v1, %v221_v42  ;;  %v261_v52 = vmul.f32 %v828_v1, %v222_v43  ;;  %v196_v43 = vld [vmem:[%s823_s20 + $0xb0] sm:$0xff] }
  0x1d   : > { %v354_v53 = vsel %vm290_vm6, %v258_v39, %v322_v48  ;;  %v224_v54 = vsub.f32 %v185_v44, %v818_v0  ;;  %v262_v55 = vmul.f32 %v828_v1, %v223_v45  ;;  %v225_v57 = vsub.f32 %v186_v46, %v818_v0  ;;  %v197_v44 = vld [vmem:[%s823_s20 + $0xb8] sm:$0xff] }
  0x1e   : > { %754 = vst [vmem:[%s856_s26 + $0x10] sm:$0xff] %v686_v49   ;;  %v355_v58 = vsel %vm291_vm7, %v259_v40, %v323_v50  ;;  %vm292_vm8 = vcmp.ge.f32.partialorder %v260_v51, 0.0  ;;  %vm293_vm9 = vcmp.ge.f32.partialorder %v261_v52, 0.0  ;;  %v324_v59 = vmul.f32 0.2, %v260_v51 }
  0x1f   : > { %v691_v61 = vpack.c.bf16 %v355_v58, %v354_v53  ;;  %v325_v62 = vmul.f32 0.2, %v261_v52  ;;  %v263_v63 = vmul.f32 %v828_v1, %v224_v54  ;;  %vm294_vm10 = vcmp.ge.f32.partialorder %v262_v55, 0.0 }
  0x20   : > { %v356_v2 = vsel %vm292_vm8, %v260_v51, %v324_v59  ;;  %v326_v3 = vmul.f32 0.2, %v262_v55  ;;  %v226_v4 = vsub.f32 %v187_v56, %v818_v0  ;;  %v264_v5 = vmul.f32 %v828_v1, %v225_v57  ;;  %v199_v59 = vld [vmem:[%s823_s20 + $0xc8] sm:$0xff] }
  0x21   : > { %755 = vst [vmem:[%s856_s26 + $0x18] sm:$0xff] %v691_v61   ;;  %v357_v7 = vsel %vm293_vm9, %v261_v52, %v325_v62  ;;  %vm295_vm11 = vcmp.ge.f32.partialorder %v263_v63, 0.0  ;;  %v327_v8 = vmul.f32 0.2, %v263_v63  ;;  %v227_v9 = vsub.f32 %v188_v60, %v818_v0 }
  0x22   : > { %v696_v11 = vpack.c.bf16 %v357_v7, %v356_v2  ;;  %v358_v12 = vsel %vm294_vm10, %v262_v55, %v326_v3  ;;  %v265_v13 = vmul.f32 %v828_v1, %v226_v4  ;;  %vm296_vm12 = vcmp.ge.f32.partialorder %v264_v5, 0.0  ;;  %v198_v55 = vld [vmem:[%s823_s20 + $0xc0] sm:$0xff]  ;;  %v200_v4 = vld [vmem:[%s823_s20 + $0xd0] sm:$0xff] }
  0x23   : > { %v359_v14 = vsel %vm295_vm11, %v263_v63, %v327_v8  ;;  %v328_v15 = vmul.f32 0.2, %v264_v5  ;;  %v228_v16 = vsub.f32 %v189_v6, %v818_v0  ;;  %v266_v17 = vmul.f32 %v828_v1, %v227_v9  ;;  %v201_v9 = vld [vmem:[%s823_s20 + $0xd8] sm:$0xff] }
  0x24   : > { %756 = vst [vmem:[%s856_s26 + $0x20] sm:$0xff] %v696_v11   ;;  %v701_v20 = vpack.c.bf16 %v359_v14, %v358_v12  ;;  %vm297_vm13 = vcmp.ge.f32.partialorder %v265_v13, 0.0  ;;  %v329_v21 = vmul.f32 0.2, %v265_v13  ;;  %v229_v22 = vsub.f32 %v190_v10, %v818_v0  ;;  %v202_v10 = vld [vmem:[%s823_s20 + $0xe0] sm:$0xff]  ;;  %v203_v11 = vld [vmem:[%s823_s20 + $0xe8] sm:$0xff] }
  0x25   : > { %v360_v23 = vsel %vm296_vm12, %v264_v5, %v328_v15  ;;  %v267_v24 = vmul.f32 %v828_v1, %v228_v16  ;;  %vm298_vm14 = vcmp.ge.f32.partialorder %v266_v17, 0.0  ;;  %v330_v25 = vmul.f32 0.2, %v266_v17 }
  0x26   : > { %757 = vst [vmem:[%s856_s26 + $0x28] sm:$0xff] %v701_v20   ;;  %v361_v27 = vsel %vm297_vm13, %v265_v13, %v329_v21  ;;  %v230_v28 = vsub.f32 %v191_v18, %v818_v0  ;;  %v268_v29 = vmul.f32 %v828_v1, %v229_v22  ;;  %v231_v30 = vsub.f32 %v192_v19, %v818_v0  ;;  %v204_v22 = vld [vmem:[%s823_s20 + $0xf0] sm:$0xff] }
  0x27   : > { %v706_v33 = vpack.c.bf16 %v361_v27, %v360_v23  ;;  %vm299_vm15 = vcmp.ge.f32.partialorder %v267_v24, 0.0  ;;  %v331_v34 = vmul.f32 0.2, %v267_v24  ;;  %v362_v35 = vsel %vm298_vm14, %v266_v17, %v330_v25 }
  0x28   : > { %v269_v36 = vmul.f32 %v828_v1, %v230_v28  ;;  %vm300_vm0 = vcmp.ge.f32.partialorder %v268_v29, 0.0  ;;  %v332_v37 = vmul.f32 0.2, %v268_v29  ;;  %v232_v38 = vsub.f32 %v193_v26, %v818_v0 }
  0x29   : > { %758 = vst [vmem:[%s856_s26 + $0x30] sm:$0xff] %v706_v33   ;;  %v363_v39 = vsel %vm299_vm15, %v267_v24, %v331_v34  ;;  %v270_v40 = vmul.f32 %v828_v1, %v231_v30  ;;  %v233_v41 = vsub.f32 %v194_v31, %v818_v0  ;;  %v234_v42 = vsub.f32 %v195_v32, %v818_v0  ;;  %v205_v32 = vld [vmem:[%s823_s20 + $0xf8] sm:$0xff] }
  0x2a   : > { %v711_v45 = vpack.c.bf16 %v363_v39, %v362_v35  ;;  %vm301_vm1 = vcmp.ge.f32.partialorder %v269_v36, 0.0  ;;  %v333_v46 = vmul.f32 0.2, %v269_v36  ;;  %v364_v47 = vsel %vm300_vm0, %v268_v29, %v332_v37 }
  0x2b   : > { %v271_v48 = vmul.f32 %v828_v1, %v232_v38  ;;  %vm302_vm2 = vcmp.ge.f32.partialorder %v270_v40, 0.0  ;;  %v334_v49 = vmul.f32 0.2, %v270_v40  ;;  %v272_v50 = vmul.f32 %v828_v1, %v233_v41 }
  0x2c   : > { %759 = vst [vmem:[%s856_s26 + $0x38] sm:$0xff] %v711_v45   ;;  %v365_v51 = vsel %vm301_vm1, %v269_v36, %v333_v46  ;;  %v273_v52 = vmul.f32 %v828_v1, %v234_v42  ;;  %v235_v53 = vsub.f32 %v196_v43, %v818_v0  ;;  %v236_v54 = vsub.f32 %v197_v44, %v818_v0 }
  0x2d   : > { %v716_v56 = vpack.c.bf16 %v365_v51, %v364_v47  ;;  %vm303_vm3 = vcmp.ge.f32.partialorder %v271_v48, 0.0  ;;  %v335_v57 = vmul.f32 0.2, %v271_v48  ;;  %v366_v58 = vsel %vm302_vm2, %v270_v40, %v334_v49 }
  0x2e   : > { %vm304_vm4 = vcmp.ge.f32.partialorder %v272_v50, 0.0  ;;  %vm305_vm5 = vcmp.ge.f32.partialorder %v273_v52, 0.0  ;;  %v336_v60 = vmul.f32 0.2, %v272_v50  ;;  %v337_v61 = vmul.f32 0.2, %v273_v52 }
  0x2f   : > { %760 = vst [vmem:[%s856_s26 + $0x40] sm:$0xff] %v716_v56   ;;  %v367_v62 = vsel %vm303_vm3, %v271_v48, %v335_v57  ;;  %v274_v63 = vmul.f32 %v828_v1, %v235_v53  ;;  %v275_v2 = vmul.f32 %v828_v1, %v236_v54  ;;  %v237_v3 = vsub.f32 %v198_v55, %v818_v0 }
  0x30   : > { %v721_v5 = vpack.c.bf16 %v367_v62, %v366_v58  ;;  %v368_v6 = vsel %vm304_vm4, %v272_v50, %v336_v60  ;;  %v369_v7 = vsel %vm305_vm5, %v273_v52, %v337_v61  ;;  %v238_v8 = vsub.f32 %v199_v59, %v818_v0 }
  0x31   : > { %v726_v12 = vpack.c.bf16 %v369_v7, %v368_v6  ;;  %vm306_vm6 = vcmp.ge.f32.partialorder %v274_v63, 0.0  ;;  %vm307_vm7 = vcmp.ge.f32.partialorder %v275_v2, 0.0  ;;  %v338_v13 = vmul.f32 0.2, %v274_v63 }
  0x32   : > { %761 = vst [vmem:[%s856_s26 + $0x48] sm:$0xff] %v721_v5   ;;  %v339_v14 = vmul.f32 0.2, %v275_v2  ;;  %v276_v15 = vmul.f32 %v828_v1, %v237_v3  ;;  %v277_v16 = vmul.f32 %v828_v1, %v238_v8  ;;  %v239_v17 = vsub.f32 %v200_v4, %v818_v0 }
  0x33   : > { %762 = vst [vmem:[%s856_s26 + $0x50] sm:$0xff] %v726_v12   ;;  %v370_v18 = vsel %vm306_vm6, %v274_v63, %v338_v13  ;;  %v240_v19 = vsub.f32 %v201_v9, %v818_v0  ;;  %v241_v20 = vsub.f32 %v202_v10, %v818_v0  ;;  %v242_v21 = vsub.f32 %v203_v11, %v818_v0 }
  0x34   : > { %v371_v23 = vsel %vm307_vm7, %v275_v2, %v339_v14  ;;  %vm308_vm8 = vcmp.ge.f32.partialorder %v276_v15, 0.0  ;;  %vm309_vm9 = vcmp.ge.f32.partialorder %v277_v16, 0.0  ;;  %v340_v24 = vmul.f32 0.2, %v276_v15 }
  0x35   : > { %v731_v25 = vpack.c.bf16 %v371_v23, %v370_v18  ;;  %v341_v26 = vmul.f32 0.2, %v277_v16  ;;  %v278_v27 = vmul.f32 %v828_v1, %v239_v17  ;;  %v279_v28 = vmul.f32 %v828_v1, %v240_v19 }
  0x36   : > { %v372_v29 = vsel %vm308_vm8, %v276_v15, %v340_v24  ;;  %v280_v30 = vmul.f32 %v828_v1, %v241_v20  ;;  %v281_v31 = vmul.f32 %v828_v1, %v242_v21  ;;  %v243_v33 = vsub.f32 %v204_v22, %v818_v0 }
  0x37   : > { %763 = vst [vmem:[%s856_s26 + $0x58] sm:$0xff] %v731_v25   ;;  %v373_v34 = vsel %vm309_vm9, %v277_v16, %v341_v26  ;;  %vm310_vm10 = vcmp.ge.f32.partialorder %v278_v27, 0.0  ;;  %vm311_vm11 = vcmp.ge.f32.partialorder %v279_v28, 0.0  ;;  %v342_v35 = vmul.f32 0.2, %v278_v27 }
  0x38   : > { %v736_v36 = vpack.c.bf16 %v373_v34, %v372_v29  ;;  %v343_v37 = vmul.f32 0.2, %v279_v28  ;;  %vm312_vm12 = vcmp.ge.f32.partialorder %v280_v30, 0.0  ;;  %vm313_vm13 = vcmp.ge.f32.partialorder %v281_v31, 0.0 }
  0x39   : > { %v374_v38 = vsel %vm310_vm10, %v278_v27, %v342_v35  ;;  %v344_v39 = vmul.f32 0.2, %v280_v30  ;;  %v345_v40 = vmul.f32 0.2, %v281_v31  ;;  %v244_v41 = vsub.f32 %v205_v32, %v818_v0 }
  0x3a   : > { %764 = vst [vmem:[%s856_s26 + $0x60] sm:$0xff] %v736_v36   ;;  %v375_v42 = vsel %vm311_vm11, %v279_v28, %v343_v37  ;;  %v282_v43 = vmul.f32 %v828_v1, %v243_v33 }
  0x3b   : > { %v741_v44 = vpack.c.bf16 %v375_v42, %v374_v38  ;;  %v376_v45 = vsel %vm312_vm12, %v280_v30, %v344_v39  ;;  %v377_v46 = vsel %vm313_vm13, %v281_v31, %v345_v40  ;;  %v283_v47 = vmul.f32 %v828_v1, %v244_v41 }
  0x3c   : > { %v746_v48 = vpack.c.bf16 %v377_v46, %v376_v45  ;;  %vm314_vm14 = vcmp.ge.f32.partialorder %v282_v43, 0.0  ;;  %v346_v49 = vmul.f32 0.2, %v282_v43 }
  0x3d   : > { %765 = vst [vmem:[%s856_s26 + $0x68] sm:$0xff] %v741_v44   ;;  %vm315_vm15 = vcmp.ge.f32.partialorder %v283_v47, 0.0  ;;  %v347_v50 = vmul.f32 0.2, %v283_v47 }
  0x3e   : > { %766 = vst [vmem:[%s856_s26 + $0x70] sm:$0xff] %v746_v48   ;;  %v378_v51 = vsel %vm314_vm14, %v282_v43, %v346_v49 }
  0x3f   : > { %v379_v52 = vsel %vm315_vm15, %v283_v47, %v347_v50 }
  0x40   : > { %v751_v0 = vpack.c.bf16 %v379_v52, %v378_v51 }
  0x42   : > { %767 = vst [vmem:[%s856_s26 + $0x78] sm:$0xff] %v751_v0  }
  0x43 PF: > { %s13_s12 = sadd.s32 1, %s782_s12  }
  0x44   : > { %p10_p4 = scmp.ge.s32.totalorder %s13_s12, 4  }
  0x46   :  { %12 = sbr.rel (!%p10_p4) target bundleno = 1 (0x1), region = 62 }

// kernel: discriminator_forward.11
= control target key start
LH: loop header
LB: loop body
LE: loop exit
PB: predicated region body
PF: predicated region fallthrough
CT: control target
= control target key end

     0   :  { %vm502_vm0 = vcmask 1040384   ;;  %s899_s1 = inlined_call_operand.vmem [shape: bf16[256,128], index: 1, kind: input, shape index: {}]   ;;  %s900_s0 = inlined_call_operand.vmem [shape: bf16[128,256], index: 0, kind: input, shape index: {}]   ;;  %s901_s2 = inlined_call_operand.vmem [shape: f32[1,128], index: 2, kind: input, shape index: {}]   ;;  %s902_s3 = inlined_call_operand.vmem [shape: f32[128,128], index: 3, kind: output, shape index: {0}]   ;;  %s903_s4 = inlined_call_operand.vmem [shape: f32[1,2,128], index: 4, kind: output, shape index: {1}]  }
   0x1   :  { %v642_v0 = vld [vmem:[%s899_s1 + $0x40] sm:$0xff]   ;;  %v644_v2 = vld [vmem:[%s899_s1 + $0x48] sm:$0xff]   ;;  %v646_v4 = vld [vmem:[%s899_s1 + $0x50] sm:$0xff]  }
   0x2   :  { %v643_v1 = vld [vmem:[%s899_s1] sm:$0xff]   ;;  %562 = vmatprep.subr.bf16.mxu0 %v642_v0  ;;  %626 = vmatprep.subr.bf16.mxu1 %v642_v0  ;;  %v645_v3 = vld [vmem:[%s899_s1 + $0x8] sm:$0xff]   ;;  %v647_v5 = vld [vmem:[%s899_s1 + $0x10] sm:$0xff]  }
   0x3   :  { %563 = vmatpush3.bf16.msra.mxu0 %v643_v1  ;;  %634 = vmatpush3.bf16.msra.mxu1 %v643_v1  ;;  %v648_v6 = vld [vmem:[%s899_s1 + $0x58] sm:$0xff]   ;;  %v650_v8 = vld [vmem:[%s899_s1 + $0x60] sm:$0xff]   ;;  %v652_v10 = vld [vmem:[%s899_s1 + $0x68] sm:$0xff]  }
   0x4   :  { %564 = vmatprep.subr.bf16.mxu0 %v644_v2  ;;  %627 = vmatprep.subr.bf16.mxu1 %v644_v2  ;;  %v649_v7 = vld [vmem:[%s899_s1 + $0x18] sm:$0xff]   ;;  %v651_v9 = vld [vmem:[%s899_s1 + $0x20] sm:$0xff]   ;;  %v653_v12 = vld [vmem:[%s899_s1 + $0x28] sm:$0xff]  }
   0x5   :  { %v660_v11 = vld [vmem:[%s900_s0 + $0x4] ss:$8 sps:$4 sm:$0xff]   ;;  %v654_v14 = vld [vmem:[%s899_s1 + $0x70] sm:$0xff]   ;;  %v656_v16 = vld [vmem:[%s899_s1 + $0x78] sm:$0xff]  }
   0x6   :  { %v666_v13 = vld [vmem:[%s900_s0 + $0x44] ss:$8 sps:$4 sm:$0xff]   ;;  %280 = vmatprep.mubr.bf16.mxu0 %v660_v11  ;;  %v655_v15 = vld [vmem:[%s899_s1 + $0x30] sm:$0xff]   ;;  %v657_v17 = vld [vmem:[%s899_s1 + $0x38] sm:$0xff]  }
   0x7   :  { %565 = vmatpush3.bf16.msra.mxu0 %v645_v3  ;;  %635 = vmatpush3.bf16.msra.mxu1 %v645_v3  ;;  %v658_v18 = vld [vmem:[%s900_s0] ss:$8 sps:$4 sm:$0xff]   ;;  %v661_v20 = vld [vmem:[%s900_s0 + $0x14] ss:$8 sps:$4 sm:$0xff]   ;;  %v663_v22 = vld [vmem:[%s900_s0 + $0x10] ss:$8 sps:$4 sm:$0xff]  }
   0x8   :  { %566 = vmatprep.subr.bf16.mxu0 %v646_v4  ;;  %628 = vmatprep.subr.bf16.mxu1 %v646_v4  ;;  %v664_v19 = vld [vmem:[%s900_s0 + $0x40] ss:$8 sps:$4 sm:$0xff]   ;;  %v670_v21 = vld [vmem:[%s900_s0 + $0x54] ss:$8 sps:$4 sm:$0xff]   ;;  %v672_v23 = vld [vmem:[%s900_s0 + $0x50] ss:$8 sps:$4 sm:$0xff]  }
   0x9   :  { %312 = vmatprep.mubr.bf16.mxu1 %v666_v13  ;;  %v667_v24 = vld [vmem:[%s900_s0 + $0x24] ss:$8 sps:$4 sm:$0xff]   ;;  %v669_v26 = vld [vmem:[%s900_s0 + $0x20] ss:$8 sps:$4 sm:$0xff]   ;;  %v673_v28 = vld [vmem:[%s900_s0 + $0x34] ss:$8 sps:$4 sm:$0xff]  }
   0xa   :  { %v676_v25 = vld [vmem:[%s900_s0 + $0x64] ss:$8 sps:$4 sm:$0xff]   ;;  %v678_v27 = vld [vmem:[%s900_s0 + $0x60] ss:$8 sps:$4 sm:$0xff]   ;;  %v679_v29 = vld [vmem:[%s900_s0 + $0x74] ss:$8 sps:$4 sm:$0xff]  }
   0xb   :  { %567 = vmatpush3.bf16.msra.mxu0 %v647_v5  ;;  %636 = vmatpush3.bf16.msra.mxu1 %v647_v5  ;;  %v675_v30 = vld [vmem:[%s900_s0 + $0x30] ss:$8 sps:$4 sm:$0xff]   ;;  %v806_v34 = vld [vmem:[%s901_s2] ss:$0 sm:$0xff] }
   0xc   :  { %568 = vmatprep.subr.bf16.mxu0 %v648_v6  ;;  %629 = vmatprep.subr.bf16.mxu1 %v648_v6  ;;  %v681_v31 = vld [vmem:[%s900_s0 + $0x70] ss:$8 sps:$4 sm:$0xff]  }
   0xf   :  { %569 = vmatpush3.bf16.msra.mxu0 %v649_v7  ;;  %637 = vmatpush3.bf16.msra.mxu1 %v649_v7 }
  0x10   :  { %570 = vmatprep.subr.bf16.mxu0 %v650_v8  ;;  %630 = vmatprep.subr.bf16.mxu1 %v650_v8 }
  0x13   :  { %571 = vmatpush3.bf16.msra.mxu0 %v651_v9  ;;  %638 = vmatpush3.bf16.msra.mxu1 %v651_v9 }
  0x14   :  { %572 = vmatprep.subr.bf16.mxu0 %v652_v10  ;;  %631 = vmatprep.subr.bf16.mxu1 %v652_v10 }
  0x17   :  { %573 = vmatpush3.bf16.msra.mxu0 %v653_v12  ;;  %639 = vmatpush3.bf16.msra.mxu1 %v653_v12 }
  0x18   :  { %574 = vmatprep.subr.bf16.mxu0 %v654_v14  ;;  %632 = vmatprep.subr.bf16.mxu1 %v654_v14 }
  0x1b   :  { %575 = vmatpush3.bf16.msra.mxu0 %v655_v15  ;;  %640 = vmatpush3.bf16.msra.mxu1 %v655_v15 }
  0x1c   :  { %576 = vmatprep.subr.bf16.mxu0 %v656_v16  ;;  %633 = vmatprep.subr.bf16.mxu1 %v656_v16 }
  0x1f   :  { %577 = vmatpush3.bf16.msra.mxu0 %v657_v17  ;;  %641 = vmatpush3.bf16.msra.mxu1 %v657_v17 }
  0x22   :  { %281 = vmatmul.mubr.bf16.vlgmr.msra.gmra.mrb[0].mxu0 %v658_v18  ;;  %313 = vmatmul.mubr.bf16.vlgmr.msra.gmra.mrb[0].mxu1 %v664_v19 }
  0x23   :  { %288 = vmatprep.mubr.bf16.mxu0 %v661_v20  ;;  %320 = vmatprep.mubr.bf16.mxu1 %v670_v21 }
  0x2a   :  { %289 = vmatmul.mubr.bf16.gmra.mrb[4].mxu0 %v663_v22  ;;  %321 = vmatmul.mubr.bf16.gmra.mrb[4].mxu1 %v672_v23 }
  0x2b   :  { %296 = vmatprep.mubr.bf16.mxu0 %v667_v24  ;;  %328 = vmatprep.mubr.bf16.mxu1 %v676_v25 }
  0x32   :  { %297 = vmatmul.mubr.bf16.gmra.mrb[8].mxu0 %v669_v26  ;;  %329 = vmatmul.mubr.bf16.gmra.mrb[8].mxu1 %v678_v27 }
  0x33   :  { %304 = vmatprep.mubr.bf16.mxu0 %v673_v28  ;;  %336 = vmatprep.mubr.bf16.mxu1 %v679_v29 }
  0x3a   :  { %305 = vmatmul.mubr.bf16.gmra.mrb[12].mxu0 %v675_v30  ;;  %337 = vmatmul.mubr.bf16.gmra.mrb[12].mxu1 %v681_v31 }
  0xf5   :  { %v578_v32 = vpop.f32.mrb[0].mxu0  ;;  %v602_v33 = vpop.f32.mrb[0].mxu1 }
  0xf6   :  { %v579_v35 = vpop.f32.mrb[1].mxu0  ;;  %v603_v36 = vpop.f32.mrb[1].mxu1 }
  0xf7   :  { %v580_v37 = vadd.f32 %v579_v35, %v578_v32  ;;  %v581_v38 = vpop.f32.mrb[2].mxu0  ;;  %v604_v39 = vadd.f32 %v603_v36, %v602_v33  ;;  %v605_v40 = vpop.f32.mrb[2].mxu1 }
  0xf8   :  { %v582_v41 = vpop.f32.mrb[3].mxu0  ;;  %v606_v42 = vpop.f32.mrb[3].mxu1 }
  0xf9   :  { %v283_v43 = vadd.f32 %v580_v37, %v806_v34  ;;  %v583_v44 = vadd.f32 %v582_v41, %v581_v38  ;;  %v810_v45 = vadd.f32 %v604_v39, %v806_v34  ;;  %v607_v46 = vadd.f32 %v606_v42, %v605_v40 }
  0xfb   :  { %505 = vst [vmem:[%s902_s3] sm:$0xff] %v283_v43  ;;  %v286_v47 = vadd.f32 %v583_v44, %v806_v34  ;;  %513 = vst [vmem:[%s902_s3 + $0x40] sm:$0xff] %v810_v45  ;;  %v821_v48 = vadd.f32 %v607_v46, %v806_v34  ;;  %v465_v49 = vmul.f32 %v283_v43, %v283_v43 }
  0xfd   :  { %v444_v50 = vadd.f32 %v286_v47, %v283_v43  ;;  %v466_v51 = vmul.f32 %v286_v47, %v286_v47  ;;  %506 = vst [vmem:[%s902_s3 + $0x8] sm:$0xff] %v286_v47  ;;  %v584_v52 = vpop.f32.mrb[4].mxu0  ;;  %514 = vst [vmem:[%s902_s3 + $0x48] sm:$0xff] %v821_v48  ;;  %v608_v53 = vpop.f32.mrb[4].mxu1 }
  0xfe   :  { %v585_v54 = vpop.f32.mrb[5].mxu0  ;;  %v609_v55 = vpop.f32.mrb[5].mxu1 }
  0xff   :  { %v481_v56 = vadd.f32 %v466_v51, %v465_v49  ;;  %v586_v57 = vadd.f32 %v585_v54, %v584_v52  ;;  %v587_v58 = vpop.f32.mrb[6].mxu0  ;;  %v610_v59 = vadd.f32 %v609_v55, %v608_v53  ;;  %v611_v60 = vpop.f32.mrb[6].mxu1 }
 0x100   :  { %v588_v61 = vpop.f32.mrb[7].mxu0  ;;  %v612_v62 = vpop.f32.mrb[7].mxu1 }
 0x101   :  { %v291_v63 = vadd.f32 %v586_v57, %v806_v34  ;;  %v589_v0 = vadd.f32 %v588_v61, %v587_v58  ;;  %v832_v1 = vadd.f32 %v610_v59, %v806_v34  ;;  %v613_v2 = vadd.f32 %v612_v62, %v611_v60 }
 0x102   :  { %v473_v57 = vmul.f32 %v810_v45, %v810_v45 }
 0x103   :  { %v445_v3 = vadd.f32 %v444_v50, %v291_v63  ;;  %v467_v4 = vmul.f32 %v291_v63, %v291_v63  ;;  %507 = vst [vmem:[%s902_s3 + $0x10] sm:$0xff] %v291_v63  ;;  %v294_v5 = vadd.f32 %v589_v0, %v806_v34  ;;  %515 = vst [vmem:[%s902_s3 + $0x50] sm:$0xff] %v832_v1 }
 0x104   :  { %v843_v6 = vadd.f32 %v613_v2, %v806_v34  ;;  %v475_v62 = vmul.f32 %v832_v1, %v832_v1 }
 0x105   :  { %v482_v7 = vadd.f32 %v481_v56, %v467_v4  ;;  %v446_v8 = vadd.f32 %v445_v3, %v294_v5  ;;  %v468_v9 = vmul.f32 %v294_v5, %v294_v5  ;;  %508 = vst [vmem:[%s902_s3 + $0x18] sm:$0xff] %v294_v5  ;;  %v590_v10 = vpop.f32.mrb[8].mxu0  ;;  %v614_v11 = vpop.f32.mrb[8].mxu1 }
 0x106   :  { %v591_v12 = vpop.f32.mrb[9].mxu0  ;;  %516 = vst [vmem:[%s902_s3 + $0x58] sm:$0xff] %v843_v6  ;;  %v615_v13 = vpop.f32.mrb[9].mxu1  ;;  %v476_v2 = vmul.f32 %v843_v6, %v843_v6 }
 0x107   :  { %v483_v14 = vadd.f32 %v482_v7, %v468_v9  ;;  %v592_v15 = vadd.f32 %v591_v12, %v590_v10  ;;  %v593_v16 = vpop.f32.mrb[10].mxu0  ;;  %v616_v17 = vadd.f32 %v615_v13, %v614_v11  ;;  %v617_v18 = vpop.f32.mrb[10].mxu1 }
 0x108   :  { %v594_v19 = vpop.f32.mrb[11].mxu0  ;;  %v618_v20 = vpop.f32.mrb[11].mxu1 }
 0x109   :  { %v299_v21 = vadd.f32 %v592_v15, %v806_v34  ;;  %v595_v22 = vadd.f32 %v594_v19, %v593_v16  ;;  %v331_v23 = vadd.f32 %v616_v17, %v806_v34  ;;  %v619_v24 = vadd.f32 %v618_v20, %v617_v18 }
 0x10b   :  { %v447_v25 = vadd.f32 %v446_v8, %v299_v21  ;;  %v469_v26 = vmul.f32 %v299_v21, %v299_v21  ;;  %509 = vst [vmem:[%s902_s3 + $0x20] sm:$0xff] %v299_v21  ;;  %v302_v27 = vadd.f32 %v595_v22, %v806_v34  ;;  %517 = vst [vmem:[%s902_s3 + $0x60] sm:$0xff] %v331_v23 }
 0x10c   :  { %v334_v28 = vadd.f32 %v619_v24, %v806_v34  ;;  %v477_v5 = vmul.f32 %v331_v23, %v331_v23 }
 0x10d   :  { %v484_v29 = vadd.f32 %v483_v14, %v469_v26  ;;  %v448_v30 = vadd.f32 %v447_v25, %v302_v27  ;;  %v470_v31 = vmul.f32 %v302_v27, %v302_v27  ;;  %510 = vst [vmem:[%s902_s3 + $0x28] sm:$0xff] %v302_v27  ;;  %v596_v32 = vpop.f32.mrb[12].mxu0  ;;  %v620_v33 = vpop.f32.mrb[12].mxu1 }
 0x10e   :  { %v597_v35 = vpop.f32.mrb[13].mxu0  ;;  %518 = vst [vmem:[%s902_s3 + $0x68] sm:$0xff] %v334_v28  ;;  %v621_v36 = vpop.f32.mrb[13].mxu1  ;;  %v478_v10 = vmul.f32 %v334_v28, %v334_v28 }
 0x10f   :  { %v485_v37 = vadd.f32 %v484_v29, %v470_v31  ;;  %v598_v38 = vadd.f32 %v597_v35, %v596_v32  ;;  %v599_v39 = vpop.f32.mrb[14].mxu0  ;;  %v622_v40 = vadd.f32 %v621_v36, %v620_v33  ;;  %v623_v41 = vpop.f32.mrb[14].mxu1 }
 0x110   :  { %v600_v42 = vpop.f32.mrb[15].mxu0  ;;  %v624_v43 = vpop.f32.mrb[15].mxu1 }
 0x111   :  { %v307_v44 = vadd.f32 %v598_v38, %v806_v34  ;;  %v601_v46 = vadd.f32 %v600_v42, %v599_v39  ;;  %v339_v47 = vadd.f32 %v622_v40, %v806_v34  ;;  %v625_v49 = vadd.f32 %v624_v43, %v623_v41 }
 0x113   :  { %v449_v50 = vadd.f32 %v448_v30, %v307_v44  ;;  %v471_v51 = vmul.f32 %v307_v44, %v307_v44  ;;  %511 = vst [vmem:[%s902_s3 + $0x30] sm:$0xff] %v307_v44  ;;  %v310_v52 = vadd.f32 %v601_v46, %v806_v34  ;;  %519 = vst [vmem:[%s902_s3 + $0x70] sm:$0xff] %v339_v47 }
 0x114   :  { %v342_v53 = vadd.f32 %v625_v49, %v806_v34  ;;  %v474_v34 = vmul.f32 %v821_v48, %v821_v48 }
 0x115   :  { %v486_v54 = vadd.f32 %v485_v37, %v471_v51  ;;  %v450_v55 = vadd.f32 %v449_v50, %v310_v52  ;;  %v472_v56 = vmul.f32 %v310_v52, %v310_v52  ;;  %512 = vst [vmem:[%s902_s3 + $0x38] sm:$0xff] %v310_v52 }
 0x116   :  { %520 = vst [vmem:[%s902_s3 + $0x78] sm:$0xff] %v342_v53  ;;  %v480_v15 = vmul.f32 %v342_v53, %v342_v53 }
 0x117   :  { %v451_v58 = vadd.f32 %v450_v55, %v810_v45  ;;  %v487_v59 = vadd.f32 %v486_v54, %v472_v56 }
 0x119   :  { %v452_v60 = vadd.f32 %v451_v58, %v821_v48  ;;  %v488_v61 = vadd.f32 %v487_v59, %v473_v57  ;;  %v479_v48 = vmul.f32 %v339_v47, %v339_v47 }
 0x11b   :  { %v489_v63 = vadd.f32 %v488_v61, %v474_v34  ;;  %v453_v0 = vadd.f32 %v452_v60, %v832_v1 }
 0x11d   :  { %v454_v3 = vadd.f32 %v453_v0, %v843_v6  ;;  %v490_v4 = vadd.f32 %v489_v63, %v475_v62 }
 0x11f   :  { %v455_v45 = vadd.f32 %v454_v3, %v331_v23  ;;  %v491_v7 = vadd.f32 %v490_v4, %v476_v2 }
 0x121   :  { %v492_v8 = vadd.f32 %v491_v7, %v477_v5  ;;  %v456_v9 = vadd.f32 %v455_v45, %v334_v28 }
 0x123   :  { %v493_v11 = vadd.f32 %v492_v8, %v478_v10  ;;  %v457_v12 = vadd.f32 %v456_v9, %v339_v47 }
 0x125   :  { %v494_v13 = vadd.f32 %v493_v11, %v479_v48  ;;  %v458_v14 = vadd.f32 %v457_v12, %v342_v53 }
 0x127   :  { %v459_v16 = vrot.slane %v458_v14, 4  ;;  %v495_v1 = vadd.f32 %v494_v13, %v480_v15 }
 0x129   :  { %v460_v17 = vadd.f32 %v459_v16, %v458_v14  ;;  %v496_v18 = vrot.slane %v495_v1, 4 }
 0x12b   :  { %v461_v19 = vrot.slane %v460_v17, 2  ;;  %v497_v20 = vadd.f32 %v496_v18, %v495_v1 }
 0x12d   :  { %v462_v6 = vadd.f32 %v461_v19, %v460_v17  ;;  %v498_v21 = vrot.slane %v497_v20, 2 }
 0x12f   :  { %v463_v22 = vrot.slane %v462_v6, 1  ;;  %v499_v23 = vadd.f32 %v498_v21, %v497_v20 }
 0x131   :  { %v500_v24 = vrot.slane %v499_v23, 1  ;;  %v464_v25 = vadd.f32 %v463_v22, %v462_v6 }
 0x133   :  { %v501_v26 = vadd.f32 %v500_v24, %v499_v23 }
 0x135   :  { %v503_v27 = vsel %vm502_vm0, %v464_v25, %v501_v26 }
 0x136   :  { %504 = vst [vmem:[%s903_s4] sm:$0x3] %v503_v27 }

// kernel: discriminator_forward.12
= control target key start
LH: loop header
LB: loop body
LE: loop exit
PB: predicated region body
PF: predicated region fallthrough
CT: control target
= control target key end

     0   :  { %s423_s0 = inlined_call_operand.vmem [shape: f32[128,128], index: 0, kind: input, shape index: {}]   ;;  %s424_s1 = inlined_call_operand.vmem [shape: f32[1,128], index: 1, kind: input, shape index: {}]   ;;  %s425_s2 = inlined_call_operand.vmem [shape: f32[1,128], index: 2, kind: input, shape index: {}]   ;;  %s426_s3 = inlined_call_operand.vmem [shape: bf16[128,128], index: 3, kind: output, shape index: {}]  }
   0x1   :  { %v14_v0 = vld [vmem:[%s423_s0] sm:$0xff]  ;;  %v15_v1 = vld [vmem:[%s423_s0 + $0x8] sm:$0xff]  ;;  %v16_v6 = vld [vmem:[%s423_s0 + $0x10] sm:$0xff] }
   0x2   :  { %v318_v2 = vld [vmem:[%s424_s1] ss:$0 sm:$0xff]  ;;  %v17_v7 = vld [vmem:[%s423_s0 + $0x18] sm:$0xff]  ;;  %v19_v11 = vld [vmem:[%s423_s0 + $0x28] sm:$0xff] }
   0x3   :  { %v37_v3 = vsub.f32 %v14_v0, %v318_v2  ;;  %v38_v4 = vsub.f32 %v15_v1, %v318_v2  ;;  %v325_v5 = vld [vmem:[%s425_s2] ss:$0 sm:$0xff]  ;;  %v39_v8 = vsub.f32 %v16_v6, %v318_v2  ;;  %v40_v9 = vsub.f32 %v17_v7, %v318_v2  ;;  %v20_v12 = vld [vmem:[%s423_s0 + $0x30] sm:$0xff]  ;;  %v21_v17 = vld [vmem:[%s423_s0 + $0x38] sm:$0xff] }
   0x4   :  { %v18_v10 = vld [vmem:[%s423_s0 + $0x20] sm:$0xff]  ;;  %v42_v16 = vsub.f32 %v19_v11, %v318_v2  ;;  %v43_v20 = vsub.f32 %v20_v12, %v318_v2  ;;  %v44_v21 = vsub.f32 %v21_v17, %v318_v2  ;;  %v23_v35 = vld [vmem:[%s423_s0 + $0x48] sm:$0xff]  ;;  %v24_v36 = vld [vmem:[%s423_s0 + $0x50] sm:$0xff] }
   0x5   :  { %v60_v13 = vmul.f32 %v325_v5, %v37_v3  ;;  %v61_v14 = vmul.f32 %v325_v5, %v38_v4  ;;  %v41_v15 = vsub.f32 %v18_v10, %v318_v2  ;;  %v62_v18 = vmul.f32 %v325_v5, %v39_v8  ;;  %v22_v34 = vld [vmem:[%s423_s0 + $0x40] sm:$0xff]  ;;  %v25_v42 = vld [vmem:[%s423_s0 + $0x58] sm:$0xff]  ;;  %v27_v48 = vld [vmem:[%s423_s0 + $0x68] sm:$0xff] }
   0x6   :  { %v63_v19 = vmul.f32 %v325_v5, %v40_v9  ;;  %v65_v29 = vmul.f32 %v325_v5, %v42_v16  ;;  %v66_v33 = vmul.f32 %v325_v5, %v43_v20  ;;  %v67_v40 = vmul.f32 %v325_v5, %v44_v21  ;;  %v26_v47 = vld [vmem:[%s423_s0 + $0x60] sm:$0xff]  ;;  %v28_v60 = vld [vmem:[%s423_s0 + $0x70] sm:$0xff]  ;;  %v29_v7 = vld [vmem:[%s423_s0 + $0x78] sm:$0xff] }
   0x7   :  { %vm76_vm0 = vcmp.ge.f32.partialorder %v60_v13, 0.0  ;;  %vm77_vm1 = vcmp.ge.f32.partialorder %v61_v14, 0.0  ;;  %v92_v22 = vmul.f32 0.2, %v60_v13  ;;  %v93_v23 = vmul.f32 0.2, %v61_v14 }
   0x8   :  { %vm78_vm2 = vcmp.ge.f32.partialorder %v62_v18, 0.0  ;;  %vm79_vm3 = vcmp.ge.f32.partialorder %v63_v19, 0.0  ;;  %v94_v24 = vmul.f32 0.2, %v62_v18  ;;  %v95_v25 = vmul.f32 0.2, %v63_v19 }
   0x9   :  { %v108_v26 = vsel %vm76_vm0, %v60_v13, %v92_v22  ;;  %v109_v27 = vsel %vm77_vm1, %v61_v14, %v93_v23  ;;  %v64_v28 = vmul.f32 %v325_v5, %v41_v15  ;;  %vm81_vm5 = vcmp.ge.f32.partialorder %v65_v29, 0.0 }
   0xa   :  { %v245_v30 = vpack.c.bf16 %v109_v27, %v108_v26  ;;  %v110_v31 = vsel %vm78_vm2, %v62_v18, %v94_v24  ;;  %v111_v32 = vsel %vm79_vm3, %v63_v19, %v95_v25  ;;  %v97_v39 = vmul.f32 0.2, %v65_v29 }
   0xb   :  { %v250_v37 = vpack.c.bf16 %v111_v32, %v110_v31  ;;  %vm80_vm4 = vcmp.ge.f32.partialorder %v64_v28, 0.0  ;;  %v96_v38 = vmul.f32 0.2, %v64_v28  ;;  %vm82_vm6 = vcmp.ge.f32.partialorder %v66_v33, 0.0 }
   0xc   :  { %246 = vst [vmem:[%s426_s3] sm:$0xff] %v245_v30   ;;  %v98_v41 = vmul.f32 0.2, %v66_v33  ;;  %v45_v44 = vsub.f32 %v22_v34, %v318_v2  ;;  %v46_v45 = vsub.f32 %v23_v35, %v318_v2  ;;  %v47_v46 = vsub.f32 %v24_v36, %v318_v2 }
   0xd   :  { %282 = vst [vmem:[%s426_s3 + $0x8] sm:$0xff] %v250_v37   ;;  %v112_v43 = vsel %vm80_vm4, %v64_v28, %v96_v38  ;;  %v113_v49 = vsel %vm81_vm5, %v65_v29, %v97_v39  ;;  %vm83_vm7 = vcmp.ge.f32.partialorder %v67_v40, 0.0  ;;  %v99_v50 = vmul.f32 0.2, %v67_v40 }
   0xe   :  { %v114_v51 = vsel %vm82_vm6, %v66_v33, %v98_v41  ;;  %v255_v52 = vpack.c.bf16 %v113_v49, %v112_v43  ;;  %v68_v53 = vmul.f32 %v325_v5, %v45_v44  ;;  %v69_v54 = vmul.f32 %v325_v5, %v46_v45 }
   0xf   :  { %v48_v55 = vsub.f32 %v25_v42, %v318_v2  ;;  %v115_v56 = vsel %vm83_vm7, %v67_v40, %v99_v50  ;;  %v70_v57 = vmul.f32 %v325_v5, %v47_v46  ;;  %v49_v58 = vsub.f32 %v26_v47, %v318_v2 }
  0x10   :  { %v50_v59 = vsub.f32 %v27_v48, %v318_v2  ;;  %283 = vst [vmem:[%s426_s3 + $0x10] sm:$0xff] %v255_v52   ;;  %v260_v61 = vpack.c.bf16 %v115_v56, %v114_v51  ;;  %vm84_vm8 = vcmp.ge.f32.partialorder %v68_v53, 0.0  ;;  %vm85_vm9 = vcmp.ge.f32.partialorder %v69_v54, 0.0 }
  0x11   :  { %v100_v62 = vmul.f32 0.2, %v68_v53  ;;  %v101_v63 = vmul.f32 0.2, %v69_v54  ;;  %v71_v0 = vmul.f32 %v325_v5, %v48_v55  ;;  %vm86_vm10 = vcmp.ge.f32.partialorder %v70_v57, 0.0 }
  0x12   :  { %v102_v1 = vmul.f32 0.2, %v70_v57  ;;  %284 = vst [vmem:[%s426_s3 + $0x18] sm:$0xff] %v260_v61   ;;  %v72_v4 = vmul.f32 %v325_v5, %v49_v58  ;;  %v73_v6 = vmul.f32 %v325_v5, %v50_v59  ;;  %v51_v8 = vsub.f32 %v28_v60, %v318_v2 }
  0x13   :  { %v116_v3 = vsel %vm84_vm8, %v68_v53, %v100_v62  ;;  %v117_v9 = vsel %vm85_vm9, %v69_v54, %v101_v63  ;;  %vm87_vm11 = vcmp.ge.f32.partialorder %v71_v0, 0.0  ;;  %v103_v10 = vmul.f32 0.2, %v71_v0 }
  0x14   :  { %v118_v11 = vsel %vm86_vm10, %v70_v57, %v102_v1  ;;  %v265_v12 = vpack.c.bf16 %v117_v9, %v116_v3  ;;  %vm88_vm12 = vcmp.ge.f32.partialorder %v72_v4, 0.0  ;;  %vm89_vm13 = vcmp.ge.f32.partialorder %v73_v6, 0.0 }
  0x15   :  { %v104_v13 = vmul.f32 0.2, %v72_v4  ;;  %v119_v14 = vsel %vm87_vm11, %v71_v0, %v103_v10  ;;  %v105_v15 = vmul.f32 0.2, %v73_v6  ;;  %v52_v16 = vsub.f32 %v29_v7, %v318_v2 }
  0x16   :  { %v74_v17 = vmul.f32 %v325_v5, %v51_v8  ;;  %285 = vst [vmem:[%s426_s3 + $0x20] sm:$0xff] %v265_v12   ;;  %v270_v18 = vpack.c.bf16 %v119_v14, %v118_v11 }
  0x17   :  { %v120_v19 = vsel %vm88_vm12, %v72_v4, %v104_v13  ;;  %v121_v20 = vsel %vm89_vm13, %v73_v6, %v105_v15  ;;  %v75_v21 = vmul.f32 %v325_v5, %v52_v16 }
  0x18   :  { %vm90_vm14 = vcmp.ge.f32.partialorder %v74_v17, 0.0  ;;  %v106_v22 = vmul.f32 0.2, %v74_v17  ;;  %286 = vst [vmem:[%s426_s3 + $0x28] sm:$0xff] %v270_v18   ;;  %v275_v23 = vpack.c.bf16 %v121_v20, %v120_v19 }
  0x19   :  { %vm91_vm15 = vcmp.ge.f32.partialorder %v75_v21, 0.0  ;;  %v107_v2 = vmul.f32 0.2, %v75_v21 }
  0x1a   :  { %v122_v24 = vsel %vm90_vm14, %v74_v17, %v106_v22  ;;  %287 = vst [vmem:[%s426_s3 + $0x30] sm:$0xff] %v275_v23  }
  0x1b   :  { %v123_v25 = vsel %vm91_vm15, %v75_v21, %v107_v2 }
  0x1c   :  { %v280_v26 = vpack.c.bf16 %v123_v25, %v122_v24 }
  0x1e   :  { %288 = vst [vmem:[%s426_s3 + $0x38] sm:$0xff] %v280_v26  }

// kernel: discriminator_forward.14
= control target key start
LH: loop header
LB: loop body
LE: loop exit
PB: predicated region body
PF: predicated region fallthrough
CT: control target
= control target key end

     0   :  { %s355_s0 = inlined_call_operand.vmem [shape: f32[104,128], index: 0, kind: input, shape index: {}]   ;;  %s356_s1 = inlined_call_operand.vmem [shape: f32[1,128], index: 1, kind: input, shape index: {}]   ;;  %s357_s2 = inlined_call_operand.vmem [shape: f32[1,128], index: 2, kind: input, shape index: {}]   ;;  %s358_s3 = inlined_call_operand.vmem [shape: bf16[104,128], index: 3, kind: output, shape index: {}]  }
   0x1   :  { %v14_v0 = vld [vmem:[%s355_s0] sm:$0xff]  ;;  %v15_v1 = vld [vmem:[%s355_s0 + $0x8] sm:$0xff]  ;;  %v16_v6 = vld [vmem:[%s355_s0 + $0x10] sm:$0xff] }
   0x2   :  { %v268_v2 = vld [vmem:[%s356_s1] ss:$0 sm:$0xff]  ;;  %v17_v7 = vld [vmem:[%s355_s0 + $0x18] sm:$0xff]  ;;  %v19_v11 = vld [vmem:[%s355_s0 + $0x28] sm:$0xff] }
   0x3   :  { %v34_v3 = vsub.f32 %v14_v0, %v268_v2  ;;  %v35_v4 = vsub.f32 %v15_v1, %v268_v2  ;;  %v275_v5 = vld [vmem:[%s357_s2] ss:$0 sm:$0xff]  ;;  %v36_v8 = vsub.f32 %v16_v6, %v268_v2  ;;  %v37_v9 = vsub.f32 %v17_v7, %v268_v2  ;;  %v20_v12 = vld [vmem:[%s355_s0 + $0x30] sm:$0xff]  ;;  %v21_v17 = vld [vmem:[%s355_s0 + $0x38] sm:$0xff] }
   0x4   :  { %v18_v10 = vld [vmem:[%s355_s0 + $0x20] sm:$0xff]  ;;  %v39_v16 = vsub.f32 %v19_v11, %v268_v2  ;;  %v40_v20 = vsub.f32 %v20_v12, %v268_v2  ;;  %v41_v21 = vsub.f32 %v21_v17, %v268_v2  ;;  %v23_v35 = vld [vmem:[%s355_s0 + $0x48] sm:$0xff]  ;;  %v24_v36 = vld [vmem:[%s355_s0 + $0x50] sm:$0xff] }
   0x5   :  { %v54_v13 = vmul.f32 %v275_v5, %v34_v3  ;;  %v55_v14 = vmul.f32 %v275_v5, %v35_v4  ;;  %v38_v15 = vsub.f32 %v18_v10, %v268_v2  ;;  %v56_v18 = vmul.f32 %v275_v5, %v36_v8  ;;  %v22_v34 = vld [vmem:[%s355_s0 + $0x40] sm:$0xff]  ;;  %v25_v42 = vld [vmem:[%s355_s0 + $0x58] sm:$0xff] }
   0x6   :  { %v57_v19 = vmul.f32 %v275_v5, %v37_v9  ;;  %v59_v29 = vmul.f32 %v275_v5, %v39_v16  ;;  %v60_v33 = vmul.f32 %v275_v5, %v40_v20  ;;  %v61_v40 = vmul.f32 %v275_v5, %v41_v21  ;;  %v26_v47 = vld [vmem:[%s355_s0 + $0x60] sm:$0xff] }
   0x7   :  { %vm67_vm0 = vcmp.ge.f32.partialorder %v54_v13, 0.0  ;;  %vm68_vm1 = vcmp.ge.f32.partialorder %v55_v14, 0.0  ;;  %v80_v22 = vmul.f32 0.2, %v54_v13  ;;  %v81_v23 = vmul.f32 0.2, %v55_v14 }
   0x8   :  { %vm69_vm2 = vcmp.ge.f32.partialorder %v56_v18, 0.0  ;;  %vm70_vm3 = vcmp.ge.f32.partialorder %v57_v19, 0.0  ;;  %v82_v24 = vmul.f32 0.2, %v56_v18  ;;  %v83_v25 = vmul.f32 0.2, %v57_v19 }
   0x9   :  { %v93_v26 = vsel %vm67_vm0, %v54_v13, %v80_v22  ;;  %v94_v27 = vsel %vm68_vm1, %v55_v14, %v81_v23  ;;  %v58_v28 = vmul.f32 %v275_v5, %v38_v15  ;;  %vm72_vm5 = vcmp.ge.f32.partialorder %v59_v29, 0.0 }
   0xa   :  { %v207_v30 = vpack.c.bf16 %v94_v27, %v93_v26  ;;  %v95_v31 = vsel %vm69_vm2, %v56_v18, %v82_v24  ;;  %v96_v32 = vsel %vm70_vm3, %v57_v19, %v83_v25  ;;  %v85_v39 = vmul.f32 0.2, %v59_v29 }
   0xb   :  { %v212_v37 = vpack.c.bf16 %v96_v32, %v95_v31  ;;  %vm71_vm4 = vcmp.ge.f32.partialorder %v58_v28, 0.0  ;;  %v84_v38 = vmul.f32 0.2, %v58_v28  ;;  %vm73_vm6 = vcmp.ge.f32.partialorder %v60_v33, 0.0 }
   0xc   :  { %208 = vst [vmem:[%s358_s3] sm:$0xff] %v207_v30   ;;  %v86_v41 = vmul.f32 0.2, %v60_v33  ;;  %v42_v44 = vsub.f32 %v22_v34, %v268_v2  ;;  %v43_v45 = vsub.f32 %v23_v35, %v268_v2  ;;  %v44_v46 = vsub.f32 %v24_v36, %v268_v2 }
   0xd   :  { %234 = vst [vmem:[%s358_s3 + $0x8] sm:$0xff] %v212_v37   ;;  %v97_v43 = vsel %vm71_vm4, %v58_v28, %v84_v38  ;;  %v98_v48 = vsel %vm72_vm5, %v59_v29, %v85_v39  ;;  %vm74_vm7 = vcmp.ge.f32.partialorder %v61_v40, 0.0  ;;  %v87_v49 = vmul.f32 0.2, %v61_v40 }
   0xe   :  { %v99_v50 = vsel %vm73_vm6, %v60_v33, %v86_v41  ;;  %v217_v51 = vpack.c.bf16 %v98_v48, %v97_v43  ;;  %v62_v52 = vmul.f32 %v275_v5, %v42_v44  ;;  %v63_v53 = vmul.f32 %v275_v5, %v43_v45 }
   0xf   :  { %v45_v54 = vsub.f32 %v25_v42, %v268_v2  ;;  %v100_v55 = vsel %vm74_vm7, %v61_v40, %v87_v49  ;;  %v64_v56 = vmul.f32 %v275_v5, %v44_v46  ;;  %v46_v57 = vsub.f32 %v26_v47, %v268_v2 }
  0x10   :  { %235 = vst [vmem:[%s358_s3 + $0x10] sm:$0xff] %v217_v51   ;;  %v222_v58 = vpack.c.bf16 %v100_v55, %v99_v50  ;;  %vm75_vm8 = vcmp.ge.f32.partialorder %v62_v52, 0.0  ;;  %vm76_vm9 = vcmp.ge.f32.partialorder %v63_v53, 0.0  ;;  %v88_v59 = vmul.f32 0.2, %v62_v52 }
  0x11   :  { %v89_v60 = vmul.f32 0.2, %v63_v53  ;;  %v65_v61 = vmul.f32 %v275_v5, %v45_v54  ;;  %vm77_vm10 = vcmp.ge.f32.partialorder %v64_v56, 0.0  ;;  %v90_v62 = vmul.f32 0.2, %v64_v56 }
  0x12   :  { %236 = vst [vmem:[%s358_s3 + $0x18] sm:$0xff] %v222_v58   ;;  %v101_v63 = vsel %vm75_vm8, %v62_v52, %v88_v59  ;;  %v66_v0 = vmul.f32 %v275_v5, %v46_v57 }
  0x13   :  { %v102_v1 = vsel %vm76_vm9, %v63_v53, %v89_v60  ;;  %vm78_vm11 = vcmp.ge.f32.partialorder %v65_v61, 0.0  ;;  %v91_v2 = vmul.f32 0.2, %v65_v61  ;;  %v103_v3 = vsel %vm77_vm10, %v64_v56, %v90_v62 }
  0x14   :  { %v227_v4 = vpack.c.bf16 %v102_v1, %v101_v63  ;;  %vm79_vm12 = vcmp.ge.f32.partialorder %v66_v0, 0.0  ;;  %v92_v6 = vmul.f32 0.2, %v66_v0 }
  0x15   :  { %v104_v7 = vsel %vm78_vm11, %v65_v61, %v91_v2 }
  0x16   :  { %237 = vst [vmem:[%s358_s3 + $0x20] sm:$0xff] %v227_v4   ;;  %v232_v8 = vpack.c.bf16 %v104_v7, %v103_v3  ;;  %v105_v9 = vsel %vm79_vm12, %v66_v0, %v92_v6 }
  0x17   :  { %v203_v10 = vpack.c.bf16 %v105_v9, %v105_v9 }
  0x18   :  { %238 = vst [vmem:[%s358_s3 + $0x28] sm:$0xff] %v232_v8  }
  0x19   :  { %171 = vst [vmem:[%s358_s3 + $0x30] sm:$0xf] %v203_v10 }

// kernel: discriminator_forward.13
= control target key start
LH: loop header
LB: loop body
LE: loop exit
PB: predicated region body
PF: predicated region fallthrough
CT: control target
= control target key end

     0   :  { %vm746_vm1 = vcmask 1040384   ;;  %s1278_s1 = inlined_call_operand.vmem [shape: bf16[512,128], index: 1, kind: input, shape index: {}]   ;;  %s1279_s0 = inlined_call_operand.vmem [shape: bf16[104,512], index: 0, kind: input, shape index: {}]   ;;  %s1280_s2 = inlined_call_operand.vmem [shape: f32[1,128], index: 2, kind: input, shape index: {}]   ;;  %s1281_s3 = inlined_call_operand.vmem [shape: f32[104,128], index: 3, kind: output, shape index: {0}]   ;;  %s1282_s4 = inlined_call_operand.vmem [shape: f32[1,2,128], index: 4, kind: output, shape index: {1}]  }
   0x1   :  { %v947_v0 = vld [vmem:[%s1278_s1 + $0x40] sm:$0xff]   ;;  %v951_v4 = vld [vmem:[%s1278_s1 + $0x48] sm:$0xff]   ;;  %v955_v8 = vld [vmem:[%s1278_s1 + $0x50] sm:$0xff]  }
   0x2   :  { %v948_v1 = vld [vmem:[%s1278_s1 + $0xc0] sm:$0xff]   ;;  %831 = vmatprep.subr.bf16.mxu0 %v947_v0  ;;  %v952_v5 = vld [vmem:[%s1278_s1 + $0xc8] sm:$0xff]   ;;  %v956_v9 = vld [vmem:[%s1278_s1 + $0xd0] sm:$0xff]  }
   0x3   :  { %v949_v2 = vld [vmem:[%s1278_s1] sm:$0xff]   ;;  %889 = vmatprep.subr.bf16.mxu1 %v948_v1  ;;  %v953_v6 = vld [vmem:[%s1278_s1 + $0x8] sm:$0xff]   ;;  %v957_v10 = vld [vmem:[%s1278_s1 + $0x10] sm:$0xff]  }
   0x4   :  { %v950_v3 = vld [vmem:[%s1278_s1 + $0x80] sm:$0xff]   ;;  %832 = vmatpush3.bf16.msra.mxu0 %v949_v2  ;;  %v954_v7 = vld [vmem:[%s1278_s1 + $0x88] sm:$0xff]   ;;  %v958_v11 = vld [vmem:[%s1278_s1 + $0x90] sm:$0xff]  }
   0x5   :  { %890 = vmatpush3.bf16.msra.mxu1 %v950_v3  ;;  %833 = vmatprep.subr.bf16.mxu0 %v951_v4  ;;  %v959_v12 = vld [vmem:[%s1278_s1 + $0x58] sm:$0xff]   ;;  %v963_v16 = vld [vmem:[%s1278_s1 + $0x60] sm:$0xff]   ;;  %v967_v20 = vld [vmem:[%s1278_s1 + $0x68] sm:$0xff]  }
   0x6   :  { %891 = vmatprep.subr.bf16.mxu1 %v952_v5  ;;  %v960_v13 = vld [vmem:[%s1278_s1 + $0xd8] sm:$0xff]   ;;  %v964_v17 = vld [vmem:[%s1278_s1 + $0xe0] sm:$0xff]   ;;  %v968_v21 = vld [vmem:[%s1278_s1 + $0xe8] sm:$0xff]  }
   0x7   :  { %v961_v14 = vld [vmem:[%s1278_s1 + $0x18] sm:$0xff]   ;;  %v965_v18 = vld [vmem:[%s1278_s1 + $0x20] sm:$0xff]   ;;  %v969_v22 = vld [vmem:[%s1278_s1 + $0x28] sm:$0xff]  }
   0x8   :  { %834 = vmatpush3.bf16.msra.mxu0 %v953_v6  ;;  %v962_v15 = vld [vmem:[%s1278_s1 + $0x98] sm:$0xff]   ;;  %v966_v19 = vld [vmem:[%s1278_s1 + $0xa0] sm:$0xff]   ;;  %v970_v23 = vld [vmem:[%s1278_s1 + $0xa8] sm:$0xff]  }
   0x9   :  { %892 = vmatpush3.bf16.msra.mxu1 %v954_v7  ;;  %835 = vmatprep.subr.bf16.mxu0 %v955_v8  ;;  %v971_v24 = vld [vmem:[%s1278_s1 + $0x70] sm:$0xff]   ;;  %v975_v28 = vld [vmem:[%s1278_s1 + $0x78] sm:$0xff]   ;;  %v41_v54 = vld [vmem:[%s1279_s0 + $0xc0] sm:$0xff] }
   0xa   :  { %893 = vmatprep.subr.bf16.mxu1 %v956_v9  ;;  %v972_v25 = vld [vmem:[%s1278_s1 + $0xf0] sm:$0xff]   ;;  %v976_v29 = vld [vmem:[%s1278_s1 + $0xf8] sm:$0xff]   ;;  %v42_v55 = vld [vmem:[%s1279_s0 + $0xc8] sm:$0xff]  ;;  %v796_v58 = vcombine.high %v41_v54, %v41_v54  ;;  %v795_v60 = vcombine.low %v41_v54, %v41_v54 }
   0xb   :  { %v973_v26 = vld [vmem:[%s1278_s1 + $0x30] sm:$0xff]   ;;  %v977_v30 = vld [vmem:[%s1278_s1 + $0x38] sm:$0xff]   ;;  %v798_v59 = vcombine.high %v42_v55, %v42_v55  ;;  %v797_v61 = vcombine.low %v42_v55, %v42_v55  ;;  %v1221_v0 = vld [vmem:[%s1280_s2] ss:$0 sm:$0xff] }
   0xc   :  { %836 = vmatpush3.bf16.msra.mxu0 %v957_v10  ;;  %v974_v27 = vld [vmem:[%s1278_s1 + $0xb0] sm:$0xff]   ;;  %v978_v31 = vld [vmem:[%s1278_s1 + $0xb8] sm:$0xff]  }
   0xd   :  { %894 = vmatpush3.bf16.msra.mxu1 %v958_v11  ;;  %837 = vmatprep.subr.bf16.mxu0 %v959_v12  ;;  %v979_v32 = vld [vmem:[%s1279_s0] ss:$16 sps:$4 sm:$0xff]   ;;  %v981_v33 = vld [vmem:[%s1279_s0 + $0x4] ss:$16 sps:$4 sm:$0xff]   ;;  %v982_v34 = vld [vmem:[%s1279_s0 + $0x8] ss:$16 sps:$4 sm:$0xff]  }
   0xe   :  { %895 = vmatprep.subr.bf16.mxu1 %v960_v13  ;;  %v984_v35 = vld [vmem:[%s1279_s0 + $0xc] ss:$16 sps:$4 sm:$0xff]   ;;  %472 = vmatprep.mubr.bf16.mxu0 %v981_v33  ;;  %v985_v36 = vld [vmem:[%s1279_s0 + $0x24] ss:$16 sps:$4 sm:$0xff]   ;;  %v989_v38 = vld [vmem:[%s1279_s0 + $0x20] ss:$16 sps:$4 sm:$0xff]  }
   0xf   :  { %560 = vmatprep.mubr.bf16.mxu1 %v984_v35  ;;  %v987_v37 = vld [vmem:[%s1279_s0 + $0x2c] ss:$16 sps:$4 sm:$0xff]   ;;  %v990_v39 = vld [vmem:[%s1279_s0 + $0x28] ss:$16 sps:$4 sm:$0xff]   ;;  %v991_v40 = vld [vmem:[%s1279_s0 + $0x44] ss:$16 sps:$4 sm:$0xff]  }
  0x10   :  { %838 = vmatpush3.bf16.msra.mxu0 %v961_v14  ;;  %v993_v41 = vld [vmem:[%s1279_s0 + $0x4c] ss:$16 sps:$4 sm:$0xff]   ;;  %v995_v42 = vld [vmem:[%s1279_s0 + $0x40] ss:$16 sps:$4 sm:$0xff]   ;;  %v996_v43 = vld [vmem:[%s1279_s0 + $0x48] ss:$16 sps:$4 sm:$0xff]  }
  0x11   :  { %896 = vmatpush3.bf16.msra.mxu1 %v962_v15  ;;  %839 = vmatprep.subr.bf16.mxu0 %v963_v16  ;;  %v997_v44 = vld [vmem:[%s1279_s0 + $0x64] ss:$16 sps:$4 sm:$0xff]   ;;  %v999_v45 = vld [vmem:[%s1279_s0 + $0x6c] ss:$16 sps:$4 sm:$0xff]   ;;  %v1001_v46 = vld [vmem:[%s1279_s0 + $0x60] ss:$16 sps:$4 sm:$0xff]  }
  0x12   :  { %897 = vmatprep.subr.bf16.mxu1 %v964_v17  ;;  %v1002_v47 = vld [vmem:[%s1279_s0 + $0x68] ss:$16 sps:$4 sm:$0xff]   ;;  %v1003_v48 = vld [vmem:[%s1279_s0 + $0x84] ss:$16 sps:$4 sm:$0xff]   ;;  %v1005_v49 = vld [vmem:[%s1279_s0 + $0x8c] ss:$16 sps:$4 sm:$0xff]  }
  0x13   :  { %v1007_v50 = vld [vmem:[%s1279_s0 + $0x80] ss:$16 sps:$4 sm:$0xff]   ;;  %v1008_v51 = vld [vmem:[%s1279_s0 + $0x88] ss:$16 sps:$4 sm:$0xff]   ;;  %v1009_v52 = vld [vmem:[%s1279_s0 + $0xa4] ss:$16 sps:$4 sm:$0xff]  }
  0x14   :  { %840 = vmatpush3.bf16.msra.mxu0 %v965_v18  ;;  %v1011_v53 = vld [vmem:[%s1279_s0 + $0xac] ss:$16 sps:$4 sm:$0xff]   ;;  %v1013_v56 = vld [vmem:[%s1279_s0 + $0xa0] ss:$16 sps:$4 sm:$0xff]   ;;  %v1014_v57 = vld [vmem:[%s1279_s0 + $0xa8] ss:$16 sps:$4 sm:$0xff]  }
  0x15   :  { %898 = vmatpush3.bf16.msra.mxu1 %v966_v19  ;;  %841 = vmatprep.subr.bf16.mxu0 %v967_v20 }
  0x16   :  { %899 = vmatprep.subr.bf16.mxu1 %v968_v21 }
  0x18   :  { %842 = vmatpush3.bf16.msra.mxu0 %v969_v22 }
  0x19   :  { %900 = vmatpush3.bf16.msra.mxu1 %v970_v23  ;;  %843 = vmatprep.subr.bf16.mxu0 %v971_v24 }
  0x1a   :  { %901 = vmatprep.subr.bf16.mxu1 %v972_v25 }
  0x1c   :  { %844 = vmatpush3.bf16.msra.mxu0 %v973_v26 }
  0x1d   :  { %902 = vmatpush3.bf16.msra.mxu1 %v974_v27  ;;  %845 = vmatprep.subr.bf16.mxu0 %v975_v28 }
  0x1e   :  { %903 = vmatprep.subr.bf16.mxu1 %v976_v29 }
  0x20   :  { %846 = vmatpush3.bf16.msra.mxu0 %v977_v30 }
  0x21   :  { %904 = vmatpush3.bf16.msra.mxu1 %v978_v31 }
  0x23   :  { %473 = vmatmul.mubr.bf16.vlgmr.msra.gmra.mrb[0].mxu0 %v979_v32 }
  0x24   :  { %561 = vmatmul.mubr.bf16.vlgmr.msra.gmra.mrb[0].mxu1 %v982_v34  ;;  %480 = vmatprep.mubr.bf16.mxu0 %v985_v36 }
  0x25   :  { %568 = vmatprep.mubr.bf16.mxu1 %v987_v37 }
  0x2b   :  { %481 = vmatmul.mubr.bf16.gmra.mrb[4].mxu0 %v989_v38 }
  0x2c   :  { %569 = vmatmul.mubr.bf16.gmra.mrb[4].mxu1 %v990_v39  ;;  %488 = vmatprep.mubr.bf16.mxu0 %v991_v40 }
  0x2d   :  { %576 = vmatprep.mubr.bf16.mxu1 %v993_v41 }
  0x33   :  { %489 = vmatmul.mubr.bf16.gmra.mrb[8].mxu0 %v995_v42 }
  0x34   :  { %577 = vmatmul.mubr.bf16.gmra.mrb[8].mxu1 %v996_v43  ;;  %496 = vmatprep.mubr.bf16.mxu0 %v997_v44 }
  0x35   :  { %584 = vmatprep.mubr.bf16.mxu1 %v999_v45 }
  0x3b   :  { %497 = vmatmul.mubr.bf16.gmra.mrb[12].mxu0 %v1001_v46 }
  0x3c   :  { %585 = vmatmul.mubr.bf16.gmra.mrb[12].mxu1 %v1002_v47  ;;  %504 = vmatprep.mubr.bf16.mxu0 %v1003_v48 }
  0x3d   :  { %592 = vmatprep.mubr.bf16.mxu1 %v1005_v49 }
  0x43   :  { %505 = vmatmul.mubr.bf16.gmra.mrb[16].mxu0 %v1007_v50 }
  0x44   :  { %593 = vmatmul.mubr.bf16.gmra.mrb[16].mxu1 %v1008_v51  ;;  %512 = vmatprep.mubr.bf16.mxu0 %v1009_v52 }
  0x45   :  { %600 = vmatprep.mubr.bf16.mxu1 %v1011_v53 }
  0x4b   :  { %513 = vmatmul.mubr.bf16.gmra.mrb[20].mxu0 %v1013_v56 }
  0x4c   :  { %601 = vmatmul.mubr.bf16.gmra.mrb[20].mxu1 %v1014_v57  ;;  %520 = vmatprep.mubr.bf16.mxu0 %v796_v58 }
  0x4d   :  { %608 = vmatprep.mubr.bf16.mxu1 %v798_v59 }
  0x53   :  { %521 = vmatmul.mubr.bf16.gmra.mrb[24].mxu0 %v795_v60 }
  0x54   :  { %609 = vmatmul.mubr.bf16.gmra.mrb[24].mxu1 %v797_v61 }
  0xf6   :  { %v847_v62 = vpop.f32.mrb[0].mxu0 }
  0xf7   :  { %v905_v63 = vpop.f32.mrb[0].mxu1  ;;  %v848_v1 = vpop.f32.mrb[1].mxu0 }
  0xf8   :  { %v849_v2 = vadd.f32 %v848_v1, %v847_v62  ;;  %v906_v3 = vpop.f32.mrb[1].mxu1  ;;  %v850_v4 = vpop.f32.mrb[2].mxu0 }
  0xf9   :  { %v907_v5 = vadd.f32 %v906_v3, %v905_v63  ;;  %v908_v6 = vpop.f32.mrb[2].mxu1  ;;  %v851_v7 = vpop.f32.mrb[3].mxu0 }
  0xfa   :  { %v475_v8 = vadd.f32 %v849_v2, %v1221_v0  ;;  %v852_v9 = vadd.f32 %v851_v7, %v850_v4  ;;  %v909_v10 = vpop.f32.mrb[3].mxu1 }
  0xfb   :  { %v910_v11 = vadd.f32 %v909_v10, %v908_v6 }
  0xfc   :  { %v563_v12 = vadd.f32 %v907_v5, %v475_v8  ;;  %v478_v13 = vadd.f32 %v852_v9, %v1221_v0 }
  0xfe   :  { %749 = vst [vmem:[%s1281_s3] sm:$0xff] %v563_v12  ;;  %v566_v14 = vadd.f32 %v910_v11, %v478_v13  ;;  %v853_v15 = vpop.f32.mrb[4].mxu0  ;;  %v715_v18 = vmul.f32 %v563_v12, %v563_v12 }
  0xff   :  { %v911_v16 = vpop.f32.mrb[4].mxu1  ;;  %v854_v17 = vpop.f32.mrb[5].mxu0 }
 0x100   :  { %v697_v19 = vadd.f32 %v566_v14, %v563_v12  ;;  %v716_v20 = vmul.f32 %v566_v14, %v566_v14  ;;  %750 = vst [vmem:[%s1281_s3 + $0x8] sm:$0xff] %v566_v14  ;;  %v855_v21 = vadd.f32 %v854_v17, %v853_v15  ;;  %v912_v22 = vpop.f32.mrb[5].mxu1  ;;  %v856_v23 = vpop.f32.mrb[6].mxu0 }
 0x101   :  { %v913_v24 = vadd.f32 %v912_v22, %v911_v16  ;;  %v914_v25 = vpop.f32.mrb[6].mxu1  ;;  %v857_v26 = vpop.f32.mrb[7].mxu0 }
 0x102   :  { %v728_v27 = vadd.f32 %v716_v20, %v715_v18  ;;  %v483_v28 = vadd.f32 %v855_v21, %v1221_v0  ;;  %v858_v29 = vadd.f32 %v857_v26, %v856_v23  ;;  %v915_v30 = vpop.f32.mrb[7].mxu1 }
 0x103   :  { %v916_v31 = vadd.f32 %v915_v30, %v914_v25 }
 0x104   :  { %v571_v32 = vadd.f32 %v913_v24, %v483_v28  ;;  %v486_v33 = vadd.f32 %v858_v29, %v1221_v0 }
 0x106   :  { %v698_v34 = vadd.f32 %v697_v19, %v571_v32  ;;  %v717_v35 = vmul.f32 %v571_v32, %v571_v32  ;;  %751 = vst [vmem:[%s1281_s3 + $0x10] sm:$0xff] %v571_v32  ;;  %v574_v36 = vadd.f32 %v916_v31, %v486_v33  ;;  %v859_v37 = vpop.f32.mrb[8].mxu0 }
 0x107   :  { %v917_v38 = vpop.f32.mrb[8].mxu1  ;;  %v860_v39 = vpop.f32.mrb[9].mxu0 }
 0x108   :  { %v729_v40 = vadd.f32 %v728_v27, %v717_v35  ;;  %v699_v41 = vadd.f32 %v698_v34, %v574_v36  ;;  %v718_v42 = vmul.f32 %v574_v36, %v574_v36  ;;  %752 = vst [vmem:[%s1281_s3 + $0x18] sm:$0xff] %v574_v36  ;;  %v861_v43 = vadd.f32 %v860_v39, %v859_v37  ;;  %v918_v44 = vpop.f32.mrb[9].mxu1  ;;  %v862_v45 = vpop.f32.mrb[10].mxu0 }
 0x109   :  { %v919_v46 = vadd.f32 %v918_v44, %v917_v38  ;;  %v920_v47 = vpop.f32.mrb[10].mxu1  ;;  %v863_v48 = vpop.f32.mrb[11].mxu0 }
 0x10a   :  { %v730_v49 = vadd.f32 %v729_v40, %v718_v42  ;;  %v491_v50 = vadd.f32 %v861_v43, %v1221_v0  ;;  %v864_v51 = vadd.f32 %v863_v48, %v862_v45  ;;  %v921_v52 = vpop.f32.mrb[11].mxu1  ;;  %v617_v43 = vlaneseq }
 0x10b   :  { %v922_v53 = vadd.f32 %v921_v52, %v920_v47 }
 0x10c   :  { %v579_v54 = vadd.f32 %v919_v46, %v491_v50  ;;  %v494_v55 = vadd.f32 %v864_v51, %v1221_v0 }
 0x10e   :  { %v700_v56 = vadd.f32 %v699_v41, %v579_v54  ;;  %v719_v57 = vmul.f32 %v579_v54, %v579_v54  ;;  %753 = vst [vmem:[%s1281_s3 + $0x20] sm:$0xff] %v579_v54  ;;  %v582_v58 = vadd.f32 %v922_v53, %v494_v55  ;;  %v865_v59 = vpop.f32.mrb[12].mxu0 }
 0x10f   :  { %v923_v60 = vpop.f32.mrb[12].mxu1  ;;  %v866_v61 = vpop.f32.mrb[13].mxu0 }
 0x110   :  { %v731_v62 = vadd.f32 %v730_v49, %v719_v57  ;;  %v701_v63 = vadd.f32 %v700_v56, %v582_v58  ;;  %v720_v1 = vmul.f32 %v582_v58, %v582_v58  ;;  %754 = vst [vmem:[%s1281_s3 + $0x28] sm:$0xff] %v582_v58  ;;  %v867_v2 = vadd.f32 %v866_v61, %v865_v59  ;;  %v924_v3 = vpop.f32.mrb[13].mxu1  ;;  %v868_v4 = vpop.f32.mrb[14].mxu0 }
 0x111   :  { %v925_v5 = vadd.f32 %v924_v3, %v923_v60  ;;  %v926_v6 = vpop.f32.mrb[14].mxu1  ;;  %v869_v7 = vpop.f32.mrb[15].mxu0  ;;  %v618_v58 = vshrl.u32 %v617_v43, 7 }
 0x112   :  { %v732_v8 = vadd.f32 %v731_v62, %v720_v1  ;;  %v499_v9 = vadd.f32 %v867_v2, %v1221_v0  ;;  %v870_v10 = vadd.f32 %v869_v7, %v868_v4  ;;  %v927_v11 = vpop.f32.mrb[15].mxu1 }
 0x113   :  { %v928_v12 = vadd.f32 %v927_v11, %v926_v6  ;;  %v630_v4 = vadd.s32 96, %v618_v58 }
 0x114   :  { %v587_v13 = vadd.f32 %v925_v5, %v499_v9  ;;  %v502_v14 = vadd.f32 %v870_v10, %v1221_v0 }
 0x115   :  { %vm657_vm0 = vcmp.lt.s32.totalorder %v630_v4, 98 }
 0x116   :  { %v702_v15 = vadd.f32 %v701_v63, %v587_v13  ;;  %v721_v16 = vmul.f32 %v587_v13, %v587_v13  ;;  %755 = vst [vmem:[%s1281_s3 + $0x30] sm:$0xff] %v587_v13  ;;  %v590_v17 = vadd.f32 %v928_v12, %v502_v14  ;;  %v871_v18 = vpop.f32.mrb[16].mxu0 }
 0x117   :  { %v929_v19 = vpop.f32.mrb[16].mxu1  ;;  %v872_v20 = vpop.f32.mrb[17].mxu0 }
 0x118   :  { %v733_v21 = vadd.f32 %v732_v8, %v721_v16  ;;  %v703_v22 = vadd.f32 %v702_v15, %v590_v17  ;;  %v722_v23 = vmul.f32 %v590_v17, %v590_v17  ;;  %756 = vst [vmem:[%s1281_s3 + $0x38] sm:$0xff] %v590_v17  ;;  %v873_v24 = vadd.f32 %v872_v20, %v871_v18  ;;  %v930_v25 = vpop.f32.mrb[17].mxu1  ;;  %v874_v26 = vpop.f32.mrb[18].mxu0 }
 0x119   :  { %v931_v27 = vadd.f32 %v930_v25, %v929_v19  ;;  %v932_v28 = vpop.f32.mrb[18].mxu1  ;;  %v875_v29 = vpop.f32.mrb[19].mxu0 }
 0x11a   :  { %v734_v30 = vadd.f32 %v733_v21, %v722_v23  ;;  %v507_v31 = vadd.f32 %v873_v24, %v1221_v0  ;;  %v876_v32 = vadd.f32 %v875_v29, %v874_v26  ;;  %v933_v33 = vpop.f32.mrb[19].mxu1 }
 0x11b   :  { %v934_v34 = vadd.f32 %v933_v33, %v932_v28 }
 0x11c   :  { %v595_v35 = vadd.f32 %v931_v27, %v507_v31  ;;  %v510_v36 = vadd.f32 %v876_v32, %v1221_v0 }
 0x11e   :  { %v704_v37 = vadd.f32 %v703_v22, %v595_v35  ;;  %v723_v38 = vmul.f32 %v595_v35, %v595_v35  ;;  %757 = vst [vmem:[%s1281_s3 + $0x40] sm:$0xff] %v595_v35  ;;  %v598_v39 = vadd.f32 %v934_v34, %v510_v36  ;;  %v877_v40 = vpop.f32.mrb[20].mxu0 }
 0x11f   :  { %v935_v41 = vpop.f32.mrb[20].mxu1  ;;  %v878_v42 = vpop.f32.mrb[21].mxu0 }
 0x120   :  { %v735_v44 = vadd.f32 %v734_v30, %v723_v38  ;;  %v705_v45 = vadd.f32 %v704_v37, %v598_v39  ;;  %v724_v46 = vmul.f32 %v598_v39, %v598_v39  ;;  %758 = vst [vmem:[%s1281_s3 + $0x48] sm:$0xff] %v598_v39  ;;  %v879_v47 = vadd.f32 %v878_v42, %v877_v40  ;;  %v936_v48 = vpop.f32.mrb[21].mxu1  ;;  %v880_v49 = vpop.f32.mrb[22].mxu0 }
 0x121   :  { %v937_v50 = vadd.f32 %v936_v48, %v935_v41  ;;  %v938_v51 = vpop.f32.mrb[22].mxu1  ;;  %v881_v52 = vpop.f32.mrb[23].mxu0 }
 0x122   :  { %v736_v53 = vadd.f32 %v735_v44, %v724_v46  ;;  %v515_v54 = vadd.f32 %v879_v47, %v1221_v0  ;;  %v882_v55 = vadd.f32 %v881_v52, %v880_v49  ;;  %v939_v56 = vpop.f32.mrb[23].mxu1 }
 0x123   :  { %v940_v57 = vadd.f32 %v939_v56, %v938_v51 }
 0x124   :  { %v603_v59 = vadd.f32 %v937_v50, %v515_v54  ;;  %v518_v60 = vadd.f32 %v882_v55, %v1221_v0 }
 0x126   :  { %v706_v61 = vadd.f32 %v705_v45, %v603_v59  ;;  %v725_v62 = vmul.f32 %v603_v59, %v603_v59  ;;  %759 = vst [vmem:[%s1281_s3 + $0x50] sm:$0xff] %v603_v59  ;;  %v606_v63 = vadd.f32 %v940_v57, %v518_v60  ;;  %v883_v1 = vpop.f32.mrb[24].mxu0 }
 0x127   :  { %v941_v2 = vpop.f32.mrb[24].mxu1  ;;  %v884_v3 = vpop.f32.mrb[25].mxu0 }
 0x128   :  { %v737_v5 = vadd.f32 %v736_v53, %v725_v62  ;;  %v707_v6 = vadd.f32 %v706_v61, %v606_v63  ;;  %v726_v7 = vmul.f32 %v606_v63, %v606_v63  ;;  %760 = vst [vmem:[%s1281_s3 + $0x58] sm:$0xff] %v606_v63  ;;  %v885_v8 = vadd.f32 %v884_v3, %v883_v1  ;;  %v942_v9 = vpop.f32.mrb[25].mxu1  ;;  %v886_v10 = vpop.f32.mrb[26].mxu0 }
 0x129   :  { %v943_v11 = vadd.f32 %v942_v9, %v941_v2  ;;  %v944_v12 = vpop.f32.mrb[26].mxu1  ;;  %v887_v13 = vpop.f32.mrb[27].mxu0 }
 0x12a   :  { %v738_v14 = vadd.f32 %v737_v5, %v726_v7  ;;  %v523_v15 = vadd.f32 %v885_v8, %v1221_v0  ;;  %v945_v16 = vpop.f32.mrb[27].mxu1 }
 0x12c   :  { %v611_v17 = vadd.f32 %v943_v11, %v523_v15 }
 0x12e   :  { %v696_v18 = vsel %vm657_vm0, %v611_v17, 0.0  ;;  %761 = vst [vmem:[%s1281_s3 + $0x60] sm:$0xff] %v611_v17 }
 0x12f   :  { %v708_v19 = vadd.f32 %v707_v6, %v696_v18  ;;  %v727_v20 = vmul.f32 %v696_v18, %v696_v18 }
 0x131   :  { %v709_v21 = vrot.slane %v708_v19, 4  ;;  %v739_v22 = vadd.f32 %v738_v14, %v727_v20 }
 0x133   :  { %v710_v23 = vadd.f32 %v709_v21, %v708_v19  ;;  %v740_v24 = vrot.slane %v739_v22, 4 }
 0x135   :  { %v711_v25 = vrot.slane %v710_v23, 2  ;;  %v741_v26 = vadd.f32 %v740_v24, %v739_v22 }
 0x137   :  { %v712_v27 = vadd.f32 %v711_v25, %v710_v23  ;;  %v742_v28 = vrot.slane %v741_v26, 2 }
 0x139   :  { %v713_v29 = vrot.slane %v712_v27, 1  ;;  %v743_v0 = vadd.f32 %v742_v28, %v741_v26 }
 0x13b   :  { %v744_v30 = vrot.slane %v743_v0, 1  ;;  %v714_v31 = vadd.f32 %v713_v29, %v712_v27 }
 0x13d   :  { %v745_v32 = vadd.f32 %v744_v30, %v743_v0 }
 0x13f   :  { %v747_v33 = vsel %vm746_vm1, %v714_v31, %v745_v32 }
 0x140   :  { %748 = vst [vmem:[%s1282_s4] sm:$0x3] %v747_v33 }

// kernel: discriminator_forward.15
= control target key start
LH: loop header
LB: loop body
LE: loop exit
PB: predicated region body
PF: predicated region fallthrough
CT: control target
= control target key end

     0   :  { %v976_v1 = vmov 0   ;;  %vm731_vm0 = vcmask 588800   ;;  %s1207_s1 = inlined_call_operand.vmem [shape: bf16[1024,72], index: 1, kind: input, shape index: {}]   ;;  %s1208_s0 = inlined_call_operand.vmem [shape: bf16[8,1024], index: 0, kind: input, shape index: {}]   ;;  %s1209_s2 = inlined_call_operand.vmem [shape: f32[8,1], index: 2, kind: input, shape index: {}]   ;;  %s1210_s3 = inlined_call_operand.vmem [shape: f32[8,72], index: 3, kind: output, shape index: {}]  }
   0x1   :  { %v900_v0 = vld [vmem:[%s1207_s1 + $0x40] sm:$0xff]   ;;  %899 = vset.pattern.permute.xlu0 %v976_v1  ;;  %v904_v5 = vld [vmem:[%s1207_s1 + $0x48] sm:$0xff]   ;;  %v908_v9 = vld [vmem:[%s1207_s1 + $0x50] sm:$0xff]  }
   0x2   :  { %v901_v2 = vld [vmem:[%s1207_s1 + $0xc0] sm:$0xff]   ;;  %810 = vmatprep.subr.bf16.mxu0 %v900_v0  ;;  %v905_v6 = vld [vmem:[%s1207_s1 + $0xc8] sm:$0xff]   ;;  %v909_v10 = vld [vmem:[%s1207_s1 + $0xd0] sm:$0xff]  }
   0x3   :  { %v902_v3 = vld [vmem:[%s1207_s1] sm:$0xff]   ;;  %832 = vmatprep.subr.bf16.mxu1 %v901_v2  ;;  %v906_v7 = vld [vmem:[%s1207_s1 + $0x8] sm:$0xff]   ;;  %v910_v11 = vld [vmem:[%s1207_s1 + $0x10] sm:$0xff]  }
   0x4   :  { %v903_v4 = vld [vmem:[%s1207_s1 + $0x80] sm:$0xff]   ;;  %811 = vmatpush3.bf16.msra.mxu0 %v902_v3  ;;  %v907_v8 = vld [vmem:[%s1207_s1 + $0x88] sm:$0xff]   ;;  %v911_v12 = vld [vmem:[%s1207_s1 + $0x90] sm:$0xff]  }
   0x5   :  { %833 = vmatpush3.bf16.msra.mxu1 %v903_v4  ;;  %812 = vmatprep.subr.bf16.mxu0 %v904_v5  ;;  %v912_v13 = vld [vmem:[%s1207_s1 + $0x58] sm:$0xff]   ;;  %v916_v17 = vld [vmem:[%s1207_s1 + $0x60] sm:$0xff]   ;;  %v920_v21 = vld [vmem:[%s1207_s1 + $0x68] sm:$0xff]  }
   0x6   :  { %834 = vmatprep.subr.bf16.mxu1 %v905_v6  ;;  %v913_v14 = vld [vmem:[%s1207_s1 + $0xd8] sm:$0xff]   ;;  %v917_v18 = vld [vmem:[%s1207_s1 + $0xe0] sm:$0xff]   ;;  %v921_v22 = vld [vmem:[%s1207_s1 + $0xe8] sm:$0xff]  }
   0x7   :  { %v914_v15 = vld [vmem:[%s1207_s1 + $0x18] sm:$0xff]   ;;  %v918_v19 = vld [vmem:[%s1207_s1 + $0x20] sm:$0xff]   ;;  %v922_v23 = vld [vmem:[%s1207_s1 + $0x28] sm:$0xff]  }
   0x8   :  { %813 = vmatpush3.bf16.msra.mxu0 %v906_v7  ;;  %v915_v16 = vld [vmem:[%s1207_s1 + $0x98] sm:$0xff]   ;;  %v919_v20 = vld [vmem:[%s1207_s1 + $0xa0] sm:$0xff]   ;;  %v923_v24 = vld [vmem:[%s1207_s1 + $0xa8] sm:$0xff]  }
   0x9   :  { %835 = vmatpush3.bf16.msra.mxu1 %v907_v8  ;;  %814 = vmatprep.subr.bf16.mxu0 %v908_v9  ;;  %v924_v25 = vld [vmem:[%s1207_s1 + $0x70] sm:$0xff]   ;;  %v928_v29 = vld [vmem:[%s1207_s1 + $0x78] sm:$0xff]   ;;  %v15_v33 = vld [vmem:[%s1208_s0] sm:$0xff] }
   0xa   :  { %836 = vmatprep.subr.bf16.mxu1 %v909_v10  ;;  %v925_v26 = vld [vmem:[%s1207_s1 + $0xf0] sm:$0xff]   ;;  %v929_v30 = vld [vmem:[%s1207_s1 + $0xf8] sm:$0xff]   ;;  %v16_v34 = vld [vmem:[%s1208_s0 + $0x8] sm:$0xff]  ;;  %v737_v35 = vcombine.low %v15_v33, %v15_v33  ;;  %v738_v36 = vcombine.high %v15_v33, %v15_v33 }
   0xb   :  { %v926_v27 = vld [vmem:[%s1207_s1 + $0x30] sm:$0xff]   ;;  %v930_v31 = vld [vmem:[%s1207_s1 + $0x38] sm:$0xff]   ;;  %v739_v37 = vcombine.low %v16_v34, %v16_v34  ;;  %v740_v38 = vcombine.high %v16_v34, %v16_v34  ;;  %v936_v39 = vld [vmem:[%s1207_s1 + $0x140] sm:$0xff]  }
   0xc   :  { %815 = vmatpush3.bf16.msra.mxu0 %v910_v11  ;;  %v927_v28 = vld [vmem:[%s1207_s1 + $0xb0] sm:$0xff]   ;;  %v931_v32 = vld [vmem:[%s1207_s1 + $0xb8] sm:$0xff]   ;;  %v937_v40 = vld [vmem:[%s1207_s1 + $0x1c0] sm:$0xff]   ;;  %597 = vmatprep.mubr.bf16.mxu0 %v738_v36 }
   0xd   :  { %837 = vmatpush3.bf16.msra.mxu1 %v911_v12  ;;  %816 = vmatprep.subr.bf16.mxu0 %v912_v13  ;;  %v938_v41 = vld [vmem:[%s1207_s1 + $0x100] sm:$0xff]   ;;  %v940_v43 = vld [vmem:[%s1207_s1 + $0x148] sm:$0xff]   ;;  %v944_v47 = vld [vmem:[%s1207_s1 + $0x150] sm:$0xff]  }
   0xe   :  { %838 = vmatprep.subr.bf16.mxu1 %v913_v14  ;;  %637 = vmatprep.mubr.bf16.mxu1 %v740_v38  ;;  %v939_v42 = vld [vmem:[%s1207_s1 + $0x180] sm:$0xff]   ;;  %v941_v44 = vld [vmem:[%s1207_s1 + $0x1c8] sm:$0xff]   ;;  %v945_v48 = vld [vmem:[%s1207_s1 + $0x1d0] sm:$0xff]  }
   0xf   :  { %v942_v45 = vld [vmem:[%s1207_s1 + $0x108] sm:$0xff]   ;;  %v946_v49 = vld [vmem:[%s1207_s1 + $0x110] sm:$0xff]   ;;  %v948_v51 = vld [vmem:[%s1207_s1 + $0x158] sm:$0xff]  }
  0x10   :  { %817 = vmatpush3.bf16.msra.mxu0 %v914_v15  ;;  %v943_v46 = vld [vmem:[%s1207_s1 + $0x188] sm:$0xff]   ;;  %v947_v50 = vld [vmem:[%s1207_s1 + $0x190] sm:$0xff]   ;;  %v949_v52 = vld [vmem:[%s1207_s1 + $0x1d8] sm:$0xff]  }
  0x11   :  { %839 = vmatpush3.bf16.msra.mxu1 %v915_v16  ;;  %818 = vmatprep.subr.bf16.mxu0 %v916_v17  ;;  %v950_v53 = vld [vmem:[%s1207_s1 + $0x118] sm:$0xff]   ;;  %v952_v55 = vld [vmem:[%s1207_s1 + $0x160] sm:$0xff]   ;;  %v956_v59 = vld [vmem:[%s1207_s1 + $0x168] sm:$0xff]  }
  0x12   :  { %840 = vmatprep.subr.bf16.mxu1 %v917_v18  ;;  %v951_v54 = vld [vmem:[%s1207_s1 + $0x198] sm:$0xff]   ;;  %v953_v56 = vld [vmem:[%s1207_s1 + $0x1e0] sm:$0xff]   ;;  %v957_v60 = vld [vmem:[%s1207_s1 + $0x1e8] sm:$0xff]  }
  0x13   :  { %v954_v57 = vld [vmem:[%s1207_s1 + $0x120] sm:$0xff]   ;;  %v958_v61 = vld [vmem:[%s1207_s1 + $0x128] sm:$0xff]   ;;  %v960_v63 = vld [vmem:[%s1207_s1 + $0x170] sm:$0xff]  }
  0x14   :  { %819 = vmatpush3.bf16.msra.mxu0 %v918_v19  ;;  %v955_v58 = vld [vmem:[%s1207_s1 + $0x1a0] sm:$0xff]   ;;  %v959_v62 = vld [vmem:[%s1207_s1 + $0x1a8] sm:$0xff]   ;;  %v961_v0 = vld [vmem:[%s1207_s1 + $0x1f0] sm:$0xff]  }
  0x15   :  { %841 = vmatpush3.bf16.msra.mxu1 %v919_v20  ;;  %820 = vmatprep.subr.bf16.mxu0 %v920_v21  ;;  %v962_v1 = vld [vmem:[%s1207_s1 + $0x130] sm:$0xff]   ;;  %v964_v3 = vld [vmem:[%s1207_s1 + $0x178] sm:$0xff]   ;;  %v147_v11 = vld [vmem:[%s1209_s2] sm:$0xff] }
  0x16   :  { %842 = vmatprep.subr.bf16.mxu1 %v921_v22  ;;  %v963_v2 = vld [vmem:[%s1207_s1 + $0x1b0] sm:$0xff]   ;;  %v965_v4 = vld [vmem:[%s1207_s1 + $0x1f8] sm:$0xff]   ;;  %150 = vperm.xlu0 %899, %v147_v11  }
  0x17   :  { %v966_v5 = vld [vmem:[%s1207_s1 + $0x138] sm:$0xff]   ;;  %v17_v7 = vld [vmem:[%s1208_s0 + $0x10] sm:$0xff] }
  0x18   :  { %821 = vmatpush3.bf16.msra.mxu0 %v922_v23  ;;  %v967_v6 = vld [vmem:[%s1207_s1 + $0x1b8] sm:$0xff]   ;;  %v741_v8 = vcombine.low %v17_v7, %v17_v7  ;;  %v742_v9 = vcombine.high %v17_v7, %v17_v7 }
  0x19   :  { %843 = vmatpush3.bf16.msra.mxu1 %v923_v24  ;;  %822 = vmatprep.subr.bf16.mxu0 %v924_v25  ;;  %v18_v10 = vld [vmem:[%s1208_s0 + $0x18] sm:$0xff] }
  0x1a   :  { %844 = vmatprep.subr.bf16.mxu1 %v925_v26  ;;  %v743_v12 = vcombine.low %v18_v10, %v18_v10  ;;  %v744_v13 = vcombine.high %v18_v10, %v18_v10 }
  0x1c   :  { %823 = vmatpush3.bf16.msra.mxu0 %v926_v27 }
  0x1d   :  { %845 = vmatpush3.bf16.msra.mxu1 %v927_v28  ;;  %824 = vmatprep.subr.bf16.mxu0 %v928_v29 }
  0x1e   :  { %846 = vmatprep.subr.bf16.mxu1 %v929_v30 }
  0x20   :  { %825 = vmatpush3.bf16.msra.mxu0 %v930_v31 }
  0x21   :  { %847 = vmatpush3.bf16.msra.mxu1 %v931_v32  ;;  %854 = vmatprep.subr.bf16.mxu0 %v936_v39 }
  0x22   :  { %876 = vmatprep.subr.bf16.mxu1 %v937_v40 }
  0x23   :  { %598 = vmatmul.mubr.bf16.vlgmr.msra.gmra.mrb[0].mxu0 %v737_v35 }
  0x24   :  { %638 = vmatmul.mubr.bf16.vlgmr.msra.gmra.mrb[0].mxu1 %v739_v37  ;;  %855 = vmatpush3.bf16.msra.mxu0 %v938_v41 }
  0x25   :  { %877 = vmatpush3.bf16.msra.mxu1 %v939_v42  ;;  %856 = vmatprep.subr.bf16.mxu0 %v940_v43 }
  0x26   :  { %878 = vmatprep.subr.bf16.mxu1 %v941_v44  ;;  %677 = vmatprep.mubr.bf16.mxu0 %v742_v9 }
  0x27   :  { %717 = vmatprep.mubr.bf16.mxu1 %v744_v13 }
  0x28   :  { %857 = vmatpush3.bf16.msra.mxu0 %v942_v45 }
  0x29   :  { %879 = vmatpush3.bf16.msra.mxu1 %v943_v46  ;;  %858 = vmatprep.subr.bf16.mxu0 %v944_v47 }
  0x2a   :  { %880 = vmatprep.subr.bf16.mxu1 %v945_v48 }
  0x2c   :  { %859 = vmatpush3.bf16.msra.mxu0 %v946_v49 }
  0x2d   :  { %881 = vmatpush3.bf16.msra.mxu1 %v947_v50  ;;  %860 = vmatprep.subr.bf16.mxu0 %v948_v51 }
  0x2e   :  { %882 = vmatprep.subr.bf16.mxu1 %v949_v52 }
  0x30   :  { %861 = vmatpush3.bf16.msra.mxu0 %v950_v53 }
  0x31   :  { %883 = vmatpush3.bf16.msra.mxu1 %v951_v54  ;;  %862 = vmatprep.subr.bf16.mxu0 %v952_v55 }
  0x32   :  { %884 = vmatprep.subr.bf16.mxu1 %v953_v56 }
  0x34   :  { %863 = vmatpush3.bf16.msra.mxu0 %v954_v57 }
  0x35   :  { %885 = vmatpush3.bf16.msra.mxu1 %v955_v58  ;;  %864 = vmatprep.subr.bf16.mxu0 %v956_v59 }
  0x36   :  { %886 = vmatprep.subr.bf16.mxu1 %v957_v60 }
  0x38   :  { %865 = vmatpush3.bf16.msra.mxu0 %v958_v61 }
  0x39   :  { %887 = vmatpush3.bf16.msra.mxu1 %v959_v62  ;;  %866 = vmatprep.subr.bf16.mxu0 %v960_v63 }
  0x3a   :  { %888 = vmatprep.subr.bf16.mxu1 %v961_v0 }
  0x3c   :  { %867 = vmatpush3.bf16.msra.mxu0 %v962_v1 }
  0x3d   :  { %889 = vmatpush3.bf16.msra.mxu1 %v963_v2  ;;  %868 = vmatprep.subr.bf16.mxu0 %v964_v3 }
  0x3e   :  { %890 = vmatprep.subr.bf16.mxu1 %v965_v4 }
  0x40   :  { %869 = vmatpush3.bf16.msra.mxu0 %v966_v5 }
  0x41   :  { %891 = vmatpush3.bf16.msra.mxu1 %v967_v6 }
  0x43   :  { %678 = vmatmul.mubr.bf16.vlgmr.msra.gmra.mrb[4].mxu0 %v741_v8 }
  0x44   :  { %718 = vmatmul.mubr.bf16.vlgmr.msra.gmra.mrb[4].mxu1 %v743_v12 }
  0x95   :  { %v151_v14 = vpop.permute.xlu0 %150 }
  0xf6   :  { %v826_v15 = vpop.f32.mrb[0].mxu0 }
  0xf7   :  { %v848_v16 = vpop.f32.mrb[0].mxu1  ;;  %v827_v17 = vpop.f32.mrb[1].mxu0 }
  0xf8   :  { %v849_v18 = vpop.f32.mrb[1].mxu1  ;;  %v828_v19 = vadd.f32 %v827_v17, %v826_v15  ;;  %v829_v21 = vpop.f32.mrb[2].mxu0 }
  0xf9   :  { %v850_v20 = vadd.f32 %v849_v18, %v848_v16  ;;  %v851_v22 = vpop.f32.mrb[2].mxu1  ;;  %v830_v23 = vpop.f32.mrb[3].mxu0 }
  0xfa   :  { %v852_v24 = vpop.f32.mrb[3].mxu1  ;;  %v600_v25 = vadd.f32 %v828_v19, %v151_v14 }
  0xfc   :  { %v640_v26 = vadd.f32 %v850_v20, %v600_v25 }
 0x116   :  { %v870_v27 = vpop.f32.mrb[4].mxu0 }
 0x117   :  { %v892_v28 = vpop.f32.mrb[4].mxu1  ;;  %v871_v29 = vpop.f32.mrb[5].mxu0 }
 0x118   :  { %v893_v30 = vpop.f32.mrb[5].mxu1  ;;  %v872_v31 = vadd.f32 %v871_v29, %v870_v27  ;;  %v873_v33 = vpop.f32.mrb[6].mxu0 }
 0x119   :  { %v894_v32 = vadd.f32 %v893_v30, %v892_v28  ;;  %v895_v34 = vpop.f32.mrb[6].mxu1  ;;  %v874_v35 = vpop.f32.mrb[7].mxu0 }
 0x11a   :  { %v896_v36 = vpop.f32.mrb[7].mxu1  ;;  %v680_v37 = vadd.f32 %v872_v31, %v640_v26 }
 0x11c   :  { %v720_v38 = vadd.f32 %v894_v32, %v680_v37 }
 0x11e   :  { %v809_v39 = vmul.f32 -1.442695, %v720_v38 }
 0x120   :  { %972 = vpow2.f32 %v809_v39 }
 0x12a   :  { %v973_v40 = vpop.eup %972 }
 0x12b   :  { %v728_v41 = vadd.f32 1.0, %v973_v40 }
 0x12d   :  { %974 = vrcp.f32 %v728_v41 }
 0x137   :  { %v975_v42 = vpop.eup %974 }
 0x138   :  { %732 = vst.msk [vmem:[%s1210_s3] sm:$0xff] %vm731_vm0, %v975_v42 }

</bundles_post_ra>
